<compile_context>
chip_gen: v7x
topology: tpu7x:2x2x1
jax: 0.10.0
libtpu: 0.0.40
codegen_flags: <defaults>
</compile_context>

<pallas_src>
import functools

import jax
import jax.numpy as jnp
from jax.experimental import pallas as pl
from jax.experimental.pallas import tpu as pltpu


def _round_up(x, m):
    return (x + m - 1) // m * m


def _bitconv_kernel(patches_ref, w_hi_ref, w_lo_ref, bias_ref, out_ref, *,
                    bits_num, n_scale, patch_offset):
    # Raw integer patch tile: stored int8 (offset-centered) in HBM, widened to
    # int32 once so per-bit extraction is shift/mask/cast on the VPU.
    xi = patches_ref[...].astype(jnp.int32) + patch_offset
    w_hi = w_hi_ref[...]
    w_lo = w_lo_ref[...]

    acc = jnp.zeros(out_ref.shape, jnp.float32)
    # Static unroll over bit planes: bits_num is small; the patch tile and the
    # hi/lo weights stay resident in VMEM across all 2*bits_num bf16 matmuls.
    # TODO(synk): on v5e/v6e, pltpu.matmul_push_rhs/acc_lhs/pop could hold the
    # RHS in the MXU across the bit loop instead of re-pushing it per jnp.dot.
    for b in range(bits_num):
        shift = bits_num - 1 - b
        # separate_to_bits(): bit plane `shift`, exactly {0,1} in bf16
        # (1/n_scale is folded into the weights in the wrapper).
        bit = ((xi >> shift) & 1).astype(jnp.bfloat16)
        # f32-accurate product on the bf16 MXU path: {0,1} LHS x hi/lo bf16
        # split of the f32 (weight / n_scale), accumulated in f32.
        conv = (jnp.dot(bit, w_hi, preferred_element_type=jnp.float32)
                + jnp.dot(bit, w_lo, preferred_element_type=jnp.float32))
        # quantized(): float -> int32 -> float == truncation toward zero.
        # n_scale is folded into the per-bit constant (no final *n_scale pass).
        acc = acc + jnp.trunc(conv) * jnp.float32(n_scale * (1 << shift))

    out_ref[...] = acc + bias_ref[...]


def bit_conv2d(x, weight, bias, *, bits_num, n_scale, stride=1, padding=0,
               tm=512, channels_last=False):
    """x: NCHW float32 with integer values in [0, 2**bits_num);
    weight: (C_out, C_in, KH, KW); bias: (C_out,) or None."""
    B, Cin, H, W = x.shape
    Cout, _, KH, KW = weight.shape
    H_out = (H + 2 * padding - KH) // stride + 1
    W_out = (W + 2 * padding - KW) // stride + 1
    M = B * H_out * W_out
    K = Cin * KH * KW

    if bias is None:
        bias = jnp.zeros((Cout,), jnp.float32)

    # ---- narrow patch dtype: int8 holds the raw integer values exactly for
    # bits_num <= 8 once offset-centered; int32 fallback for wider inputs.
    if bits_num <= 8:
        patch_dtype = jnp.int8
        patch_offset = 1 << (bits_num - 1)
    else:
        patch_dtype = jnp.int32
        patch_offset = 0

    # Cast/offset BEFORE im2col so the KH*KW-fold patch blowup is 1 byte/elem.
    xq = (x.astype(jnp.int32) - patch_offset).astype(patch_dtype)
    # conv zero-padding must be value 0 -> store -patch_offset in the centered domain.
    xp = jnp.pad(xq, ((0, 0), (0, 0), (padding, padding), (padding, padding)),
                 constant_values=-patch_offset)
    cols = []
    for dy in range(KH):
        for dx in range(KW):
            cols.append(xp[:, :, dy:dy + stride * H_out:stride,
                               dx:dx + stride * W_out:stride])
    cols = jnp.stack(cols, axis=2)                        # [B, Cin, KH*KW, Ho, Wo]
    cols = cols.reshape(B, K, H_out, W_out)               # K ordered (cin, kh, kw)
    patches = jnp.transpose(cols, (0, 2, 3, 1)).reshape(M, K)
    # TODO(synk): for 3x3+ kernels with large Cin, move im2col into the kernel
    # (shifted NHWC windows per (kh,kw)) so patch HBM traffic drops to ~1x input.

    # ---- lane-dense padding / tiling ----
    K_pad = _round_up(K, 128)
    Cout_pad = _round_up(Cout, 128)
    # Cout tile: <=512 wide, keeps resident weight/output small on v7x and
    # gives both TensorCores parallel blocks on wide layers.
    if Cout_pad <= 512:
        TN = Cout_pad
    elif Cout_pad % 512 == 0:
        TN = 512
    elif Cout_pad % 256 == 0:
        TN = 256
    else:
        TN = 128
    # M tile: 512 default; multiple of 32 for int8 sublane packing.
    TM = max(32, min(_round_up(tm, 32), _round_up(M, 32)))
    M_pad = _round_up(M, TM)
    num_m = M_pad // TM
    num_n = Cout_pad // TN

    patches = jnp.pad(patches, ((0, M_pad - M), (0, K_pad - K)))

    # Fold 1/n_scale into the f32 weights, then split into hi/lo bf16 halves so
    # the {0,1}-LHS matmul runs at bf16 MXU rate with ~f32 accuracy.
    w_mat = weight.reshape(Cout, K).T.astype(jnp.float32) * jnp.float32(1.0 / n_scale)
    w_mat = jnp.pad(w_mat, ((0, K_pad - K), (0, Cout_pad - Cout)))  # [K_pad, Cout_pad]
    w_hi = w_mat.astype(jnp.bfloat16)
    w_lo = (w_mat - w_hi.astype(jnp.float32)).astype(jnp.bfloat16)
    bias2d = jnp.pad(bias.reshape(1, Cout).astype(jnp.float32),
                     ((0, 0), (0, Cout_pad - Cout)))                # [1, Cout_pad]

    # ---- VMEM budget: real footprint + headroom, clamped per generation.
    patch_item = jnp.dtype(patch_dtype).itemsize
    tile_bytes = (2 * TM * K_pad * patch_item          # patch tile (double-buffered)
                  + 2 * 2 * K_pad * TN * 2             # hi/lo bf16 weight tiles
                  + 2 * 8 * TN * 4                     # bias tile
                  + 2 * TM * TN * 4                    # output tile
                  + TM * K_pad * (4 + 2)               # int32 copy + bf16 bit plane
                  + 3 * TM * TN * 4)                   # acc / conv temporaries
    try:
        vmem_cap = int(pltpu.get_tpu_info().vmem_capacity_bytes)
    except Exception:
        vmem_cap = 64 * 1024 * 1024                    # conservative: v7x per-TC
    vmem_limit = int(min(int(0.8 * vmem_cap),
                         max(16 * 1024 * 1024, int(1.5 * tile_bytes))))

    kernel = functools.partial(_bitconv_kernel, bits_num=bits_num,
                               n_scale=n_scale, patch_offset=patch_offset)
    # Grid = (Cout tiles, M tiles); M innermost so the weight tiles keep a
    # constant block index across consecutive steps (fetched once per Cout tile).
    out_flat = pl.pallas_call(
        kernel,
        out_shape=jax.ShapeDtypeStruct((M_pad, Cout_pad), jnp.float32),
        grid_spec=pltpu.PrefetchScalarGridSpec(
            num_scalar_prefetch=0,
            grid=(num_n, num_m),
            in_specs=[
                pl.BlockSpec((TM, K_pad), lambda n, m: (m, 0)),    # int8 patches
                pl.BlockSpec((K_pad, TN), lambda n, m: (0, n)),    # weight hi
                pl.BlockSpec((K_pad, TN), lambda n, m: (0, n)),    # weight lo
                pl.BlockSpec((1, TN), lambda n, m: (0, n)),        # bias
            ],
            out_specs=pl.BlockSpec((TM, TN), lambda n, m: (m, n)),
        ),
        compiler_params=pltpu.CompilerParams(
            dimension_semantics=("parallel", "parallel"),
            vmem_limit_bytes=vmem_limit,
        ),
    )(patches, w_hi, w_lo, bias2d)

    out = out_flat[:M, :Cout].reshape(B, H_out, W_out, Cout)
    if channels_last:
        return out                      # NHWC: skip the epilogue HBM transpose
    return out.transpose(0, 3, 1, 2)    # NCHW, matching the PyTorch module


def _bitconv_reference(x, weight, bias, *, bits_num, n_scale, stride, padding):
    """Pure-JAX transcription of the PyTorch forward (f32 conv per bit plane)."""
    xi = x.astype(jnp.int32)
    acc = 0.0
    for b in range(bits_num):
        shift = bits_num - 1 - b
        plane = ((xi >> shift) & 1).astype(jnp.float32) * (1.0 / n_scale)
        conv = jax.lax.conv_general_dilated(
            plane, weight.astype(jnp.float32), (stride, stride),
            [(padding, padding), (padding, padding)],
            dimension_numbers=("NCHW", "OIHW", "NCHW"),
            precision=jax.lax.Precision.HIGHEST)
        acc = acc + jnp.trunc(conv) * float(1 << shift)
    return acc * n_scale + bias.reshape(1, -1, 1, 1)


if __name__ == "__main__":
    B, Cin, Cout, H, W = 2, 4, 8, 16, 16
    KH = KW = 3
    bits_num, n_scale, stride, padding = 4, 2, 1, 1

    key = jax.random.PRNGKey(0)
    k1, k2, k3 = jax.random.split(key, 3)
    # integer-valued input as produced by the upstream quantizer
    x = jax.random.randint(k1, (B, Cin, H, W), 0, 2 ** bits_num).astype(jnp.float32)
    weight = jax.random.normal(k2, (Cout, Cin, KH, KW), jnp.float32) * 0.5
    bias = jax.random.normal(k3, (Cout,), jnp.float32)

    out = bit_conv2d(x, weight, bias, bits_num=bits_num, n_scale=n_scale,
                     stride=stride, padding=padding)
    out = jax.block_until_ready(out)

    ref = _bitconv_reference(x, weight, bias, bits_num=bits_num, n_scale=n_scale,
                             stride=stride, padding=padding)
    # trunc() sits on integer boundaries, so sub-ULP differences between the
    # hi/lo-bf16 MXU path and the f32 reference conv may flip rare isolated
    # elements by one quantization step; everything else must match tightly.
    bad_frac = float(jnp.mean((jnp.abs(out - ref) > 1e-2).astype(jnp.float32)))
    assert bad_frac < 0.02, f"mismatch fraction too high: {bad_frac}"
    print("KERNEL_OK")
</pallas_src>

<mosaic_0001>
module attributes {stable_mosaic.version = 11 : i64} {
  func.func @_bitconv_kernel(%arg0: i32, %arg1: i32, %arg2: memref<512x128xi8, #tpu.memory_space<vmem>>, %arg3: memref<128x128xbf16, #tpu.memory_space<vmem>>, %arg4: memref<128x128xbf16, #tpu.memory_space<vmem>>, %arg5: memref<1x128xf32, #tpu.memory_space<vmem>>, %arg6: memref<512x128xf32, #tpu.memory_space<vmem>>) attributes {dimension_semantics = [#tpu.dimension_semantics<parallel>, #tpu.dimension_semantics<parallel>], iteration_bounds = array<i64: 1, 1>, scalar_prefetch = 0 : i64, scratch_operands = 0 : i64, tpu.core_type = #tpu.core_type<tc>, window_params = [{transform_indices = @transform_0, window_bounds = array<i64: 512, 128>}, {transform_indices = @transform_1, window_bounds = array<i64: 128, 128>}, {transform_indices = @transform_2, window_bounds = array<i64: 128, 128>}, {transform_indices = @transform_3, window_bounds = array<i64: 1, 128>}, {transform_indices = @transform_4, window_bounds = array<i64: 512, 128>}]} {
    %c0 = arith.constant 0 : index
    %c0_0 = arith.constant 0 : index
    %0 = vector.load %arg2[%c0, %c0_0] : memref<512x128xi8, #tpu.memory_space<vmem>>, vector<512x128xi8>
    %1 = arith.extsi %0 : vector<512x128xi8> to vector<512x128xi32>
    %c8_i32 = arith.constant 8 : i32
    %2 = vector.broadcast %c8_i32 : i32 to vector<512x128xi32>
    %3 = arith.addi %1, %2 : vector<512x128xi32>
    %c0_1 = arith.constant 0 : index
    %c0_2 = arith.constant 0 : index
    %4 = vector.load %arg3[%c0_1, %c0_2] : memref<128x128xbf16, #tpu.memory_space<vmem>>, vector<128x128xbf16>
    %c0_3 = arith.constant 0 : index
    %c0_4 = arith.constant 0 : index
    %5 = vector.load %arg4[%c0_3, %c0_4] : memref<128x128xbf16, #tpu.memory_space<vmem>>, vector<128x128xbf16>
    %cst = arith.constant 0.000000e+00 : f32
    %6 = vector.broadcast %cst : f32 to vector<512x128xf32>
    %c3_i32 = arith.constant 3 : i32
    %7 = vector.broadcast %c3_i32 : i32 to vector<512x128xi32>
    %8 = arith.shrsi %3, %7 : vector<512x128xi32>
    %c1_i32 = arith.constant 1 : i32
    %9 = vector.broadcast %c1_i32 : i32 to vector<512x128xi32>
    %10 = arith.andi %8, %9 : vector<512x128xi32>
    %11 = arith.sitofp %10 : vector<512x128xi32> to vector<512x128xbf16>
    %cst_5 = arith.constant dense<0.000000e+00> : vector<512x128xf32>
    %12 = tpu.matmul %11, %4, %cst_5 {dimension_numbers = #tpu.dot_dimension_numbers<[1], [0], [0], [1], [0, 0, 1, 1], [], []>} : vector<512x128xbf16>, vector<128x128xbf16>, vector<512x128xf32> -> vector<512x128xf32>
    %cst_6 = arith.constant dense<0.000000e+00> : vector<512x128xf32>
    %13 = tpu.matmul %11, %5, %cst_6 {dimension_numbers = #tpu.dot_dimension_numbers<[1], [0], [0], [1], [0, 0, 1, 1], [], []>} : vector<512x128xbf16>, vector<128x128xbf16>, vector<512x128xf32> -> vector<512x128xf32>
    %14 = arith.addf %12, %13 : vector<512x128xf32>
    %cst_7 = arith.constant 0.000000e+00 : f32
    %15 = vector.broadcast %cst_7 : f32 to vector<512x128xf32>
    %16 = arith.cmpf olt, %14, %15 : vector<512x128xf32>
    %17 = math.ceil %14 : vector<512x128xf32>
    %18 = math.floor %14 : vector<512x128xf32>
    %19 = arith.select %16, %17, %18 : vector<512x128xi1>, vector<512x128xf32>
    %cst_8 = arith.constant 1.600000e+01 : f32
    %20 = vector.broadcast %cst_8 : f32 to vector<512x128xf32>
    %21 = arith.mulf %19, %20 : vector<512x128xf32>
    %22 = arith.addf %6, %21 : vector<512x128xf32>
    %c2_i32 = arith.constant 2 : i32
    %23 = vector.broadcast %c2_i32 : i32 to vector<512x128xi32>
    %24 = arith.shrsi %3, %23 : vector<512x128xi32>
    %c1_i32_9 = arith.constant 1 : i32
    %25 = vector.broadcast %c1_i32_9 : i32 to vector<512x128xi32>
    %26 = arith.andi %24, %25 : vector<512x128xi32>
    %27 = arith.sitofp %26 : vector<512x128xi32> to vector<512x128xbf16>
    %cst_10 = arith.constant dense<0.000000e+00> : vector<512x128xf32>
    %28 = tpu.matmul %27, %4, %cst_10 {dimension_numbers = #tpu.dot_dimension_numbers<[1], [0], [0], [1], [0, 0, 1, 1], [], []>} : vector<512x128xbf16>, vector<128x128xbf16>, vector<512x128xf32> -> vector<512x128xf32>
    %cst_11 = arith.constant dense<0.000000e+00> : vector<512x128xf32>
    %29 = tpu.matmul %27, %5, %cst_11 {dimension_numbers = #tpu.dot_dimension_numbers<[1], [0], [0], [1], [0, 0, 1, 1], [], []>} : vector<512x128xbf16>, vector<128x128xbf16>, vector<512x128xf32> -> vector<512x128xf32>
    %30 = arith.addf %28, %29 : vector<512x128xf32>
    %cst_12 = arith.constant 0.000000e+00 : f32
    %31 = vector.broadcast %cst_12 : f32 to vector<512x128xf32>
    %32 = arith.cmpf olt, %30, %31 : vector<512x128xf32>
    %33 = math.ceil %30 : vector<512x128xf32>
    %34 = math.floor %30 : vector<512x128xf32>
    %35 = arith.select %32, %33, %34 : vector<512x128xi1>, vector<512x128xf32>
    %cst_13 = arith.constant 8.000000e+00 : f32
    %36 = vector.broadcast %cst_13 : f32 to vector<512x128xf32>
    %37 = arith.mulf %35, %36 : vector<512x128xf32>
    %38 = arith.addf %22, %37 : vector<512x128xf32>
    %c1_i32_14 = arith.constant 1 : i32
    %39 = vector.broadcast %c1_i32_14 : i32 to vector<512x128xi32>
    %40 = arith.shrsi %3, %39 : vector<512x128xi32>
    %c1_i32_15 = arith.constant 1 : i32
    %41 = vector.broadcast %c1_i32_15 : i32 to vector<512x128xi32>
    %42 = arith.andi %40, %41 : vector<512x128xi32>
    %43 = arith.sitofp %42 : vector<512x128xi32> to vector<512x128xbf16>
    %cst_16 = arith.constant dense<0.000000e+00> : vector<512x128xf32>
    %44 = tpu.matmul %43, %4, %cst_16 {dimension_numbers = #tpu.dot_dimension_numbers<[1], [0], [0], [1], [0, 0, 1, 1], [], []>} : vector<512x128xbf16>, vector<128x128xbf16>, vector<512x128xf32> -> vector<512x128xf32>
    %cst_17 = arith.constant dense<0.000000e+00> : vector<512x128xf32>
    %45 = tpu.matmul %43, %5, %cst_17 {dimension_numbers = #tpu.dot_dimension_numbers<[1], [0], [0], [1], [0, 0, 1, 1], [], []>} : vector<512x128xbf16>, vector<128x128xbf16>, vector<512x128xf32> -> vector<512x128xf32>
    %46 = arith.addf %44, %45 : vector<512x128xf32>
    %cst_18 = arith.constant 0.000000e+00 : f32
    %47 = vector.broadcast %cst_18 : f32 to vector<512x128xf32>
    %48 = arith.cmpf olt, %46, %47 : vector<512x128xf32>
    %49 = math.ceil %46 : vector<512x128xf32>
    %50 = math.floor %46 : vector<512x128xf32>
    %51 = arith.select %48, %49, %50 : vector<512x128xi1>, vector<512x128xf32>
    %cst_19 = arith.constant 4.000000e+00 : f32
    %52 = vector.broadcast %cst_19 : f32 to vector<512x128xf32>
    %53 = arith.mulf %51, %52 : vector<512x128xf32>
    %54 = arith.addf %38, %53 : vector<512x128xf32>
    %c0_i32 = arith.constant 0 : i32
    %55 = vector.broadcast %c0_i32 : i32 to vector<512x128xi32>
    %56 = arith.shrsi %3, %55 : vector<512x128xi32>
    %c1_i32_20 = arith.constant 1 : i32
    %57 = vector.broadcast %c1_i32_20 : i32 to vector<512x128xi32>
    %58 = arith.andi %56, %57 : vector<512x128xi32>
    %59 = arith.sitofp %58 : vector<512x128xi32> to vector<512x128xbf16>
    %cst_21 = arith.constant dense<0.000000e+00> : vector<512x128xf32>
    %60 = tpu.matmul %59, %4, %cst_21 {dimension_numbers = #tpu.dot_dimension_numbers<[1], [0], [0], [1], [0, 0, 1, 1], [], []>} : vector<512x128xbf16>, vector<128x128xbf16>, vector<512x128xf32> -> vector<512x128xf32>
    %cst_22 = arith.constant dense<0.000000e+00> : vector<512x128xf32>
    %61 = tpu.matmul %59, %5, %cst_22 {dimension_numbers = #tpu.dot_dimension_numbers<[1], [0], [0], [1], [0, 0, 1, 1], [], []>} : vector<512x128xbf16>, vector<128x128xbf16>, vector<512x128xf32> -> vector<512x128xf32>
    %62 = arith.addf %60, %61 : vector<512x128xf32>
    %cst_23 = arith.constant 0.000000e+00 : f32
    %63 = vector.broadcast %cst_23 : f32 to vector<512x128xf32>
    %64 = arith.cmpf olt, %62, %63 : vector<512x128xf32>
    %65 = math.ceil %62 : vector<512x128xf32>
    %66 = math.floor %62 : vector<512x128xf32>
    %67 = arith.select %64, %65, %66 : vector<512x128xi1>, vector<512x128xf32>
    %cst_24 = arith.constant 2.000000e+00 : f32
    %68 = vector.broadcast %cst_24 : f32 to vector<512x128xf32>
    %69 = arith.mulf %67, %68 : vector<512x128xf32>
    %70 = arith.addf %54, %69 : vector<512x128xf32>
    %c0_25 = arith.constant 0 : index
    %c0_26 = arith.constant 0 : index
    %71 = vector.load %arg5[%c0_25, %c0_26] : memref<1x128xf32, #tpu.memory_space<vmem>>, vector<1x128xf32>
    %72 = vector.broadcast %71 : vector<1x128xf32> to vector<512x128xf32>
    %73 = arith.addf %70, %72 : vector<512x128xf32>
    %c0_27 = arith.constant 0 : index
    %c0_28 = arith.constant 0 : index
    %74 = vector.load %arg6[%c0_27, %c0_28] : memref<512x128xf32, #tpu.memory_space<vmem>>, vector<512x128xf32>
    tpu.vector_store %arg6[%c0_27, %c0_28], %73 {strides = array<i32>} : memref<512x128xf32, #tpu.memory_space<vmem>>, vector<512x128xf32>,
    return
  }
  func.func @transform_0(%arg0: i32, %arg1: i32) -> (i32, i32) {
    %c0_i32 = arith.constant 0 : i32
    %c0_i32_0 = arith.constant 0 : i32
    return %arg1, %c0_i32 : i32, i32
  }
  func.func @transform_1(%arg0: i32, %arg1: i32) -> (i32, i32) {
    %c0_i32 = arith.constant 0 : i32
    %c0_i32_0 = arith.constant 0 : i32
    return %c0_i32, %arg0 : i32, i32
  }
  func.func @transform_2(%arg0: i32, %arg1: i32) -> (i32, i32) {
    %c0_i32 = arith.constant 0 : i32
    %c0_i32_0 = arith.constant 0 : i32
    return %c0_i32, %arg0 : i32, i32
  }
  func.func @transform_3(%arg0: i32, %arg1: i32) -> (i32, i32) {
    %c0_i32 = arith.constant 0 : i32
    %c0_i32_0 = arith.constant 0 : i32
    return %c0_i32, %arg0 : i32, i32
  }
  func.func @transform_4(%arg0: i32, %arg1: i32) -> (i32, i32) {
    %c0_i32 = arith.constant 0 : i32
    return %arg1, %arg0 : i32, i32
  }
}

</mosaic_0001>

<bundles_post_ra>
// kernel: tpu_custom_call.1
= control target key start
LH: loop header
LB: loop body
LE: loop exit
PB: predicated region body
PF: predicated region fallthrough
CT: control target
= control target key end

     0   :  { %9 = vsyncpa [#allocation3], 0  ;;  %s9048_s0 = inlined_call_operand.hbm [shape: s8[512,128], index: 0, kind: input, shape index: {}]   ;;  %s9049_s1 = inlined_call_operand.hbm [shape: bf16[128,128], index: 1, kind: input, shape index: {}]   ;;  %s9050_s2 = inlined_call_operand.hbm [shape: bf16[128,128], index: 2, kind: input, shape index: {}]   ;;  %s9051_s3 = inlined_call_operand.vmem [shape: f32[1,128], index: 3, kind: input, shape index: {}]   ;;  %s9052_s4 = inlined_call_operand.hbm [shape: f32[512,128], index: 4, kind: output, shape index: {}]  }
   0x1   :  { %10 = vsyncpa [#allocation6], 0 }
   0x2   :  { %11 = vsyncpa [#allocation4], 0  ;;  %s6533_s15 = smov [#allocation5]   ;;  %s6439_s19 = scalar_lea.hbm %s9049_s1, 1024 }
   0x3   :  { %s29_s16 = sshll.u32 %s6533_s15, 4  ;;  %p6440_p0 = scmp.ne.s32.totalorder %s9049_s1, %s6439_s19  ;;  %s30_s16 = int_to_ptr.vmem [resolvable:$true] %s29_s16 }
   0x4   :  { %p6443_p1 = scmp.lt.u32.totalorder %s6439_s19, %s9049_s1 }
   0x6   :  { %p6445_p2 = pnand %p6443_p1, %p6440_p0 }
   0x8   :  { %6448 = shalt.err (!%p6445_p2)
}
   0x9   :  { %s6449_s24 = scalar_lea.vmem %s30_s16, 1024  ;;  %p6454_p4 = scmp.lt.s32.totalorder %s30_s16, %s30_s16 }
   0xa   :  { %p6450_p3 = scmp.ne.s32.totalorder %s30_s16, %s6449_s24  ;;  %p6455_p5 = scmp.lt.s32.totalorder %s6449_s24, %s6449_s24 }
   0xc   :  { %p6456_p6 = por %p6455_p5, %p6454_p4 }
   0xe   :  { %p6457_p7 = pnand %p6456_p6, %p6450_p3 }
  0x10   :  { %6460 = shalt.err (!%p6457_p7)
}
  0x11   :  { %s6534_s25 = smov 64   ;;  %s6535_s26 = smov 4  }
  0x12   :  { %35 = dma.hbm_to_vmem [thread:$0]  %s9049_s1, 1024, %s30_s16, [#allocation6], %s6534_s25, %s6534_s25, %s6535_s26  }
  0x13   :  { %s6536_s29 = smov [#allocation2]   ;;  %s6461_s7 = scalar_lea.hbm %s9048_s0, 2048 }
  0x14   :  { %s17_s30 = sshll.u32 %s6536_s29, 4  ;;  %p6462_p8 = scmp.ne.s32.totalorder %s9048_s0, %s6461_s7  ;;  %s18_s30 = int_to_ptr.vmem [resolvable:$true] %s17_s30 }
  0x15   :  { %p6465_p9 = scmp.lt.u32.totalorder %s6461_s7, %s9048_s0 }
  0x17   :  { %p6467_p10 = pnand %p6465_p9, %p6462_p8 }
  0x19   :  { %6470 = shalt.err (!%p6467_p10)
}
  0x1a   :  { %s6471_s12 = scalar_lea.vmem %s18_s30, 2048  ;;  %p6476_p12 = scmp.lt.s32.totalorder %s18_s30, %s18_s30 }
  0x1b   :  { %p6472_p11 = scmp.ne.s32.totalorder %s18_s30, %s6471_s12  ;;  %p6477_p13 = scmp.lt.s32.totalorder %s6471_s12, %s6471_s12 }
  0x1d   :  { %p6478_p0 = por %p6477_p13, %p6476_p12 }
  0x1f   :  { %p6479_p1 = pnand %p6478_p0, %p6472_p11 }
  0x21   :  { %6482 = shalt.err (!%p6479_p1)
}
  0x22   :  { %s6537_s1 = smov 128   ;;  %s6538_s13 = smov 8  }
  0x23   :  { %23 = dma.hbm_to_vmem [thread:$0]  %s9048_s0, 2048, %s18_s30, [#allocation3], %s6537_s1, %s6537_s1, %s6538_s13  }
  0x24   :  { %s6539_s16 = smov [#allocation7]   ;;  %s6483_s20 = scalar_lea.hbm %s9050_s2, 1024 }
  0x25   :  { %s41_s17 = sshll.u32 %s6539_s16, 4  ;;  %p6484_p2 = scmp.ne.s32.totalorder %s9050_s2, %s6483_s20  ;;  %s42_s17 = int_to_ptr.vmem [resolvable:$true] %s41_s17 }
  0x26   :  { %p6487_p3 = scmp.lt.u32.totalorder %s6483_s20, %s9050_s2 }
  0x28   :  { %p6489_p4 = pnand %p6487_p3, %p6484_p2 }
  0x2a   :  { %6492 = shalt.err (!%p6489_p4)
}
  0x2b   :  { %s6493_s27 = scalar_lea.vmem %s42_s17, 1024  ;;  %p6498_p6 = scmp.lt.s32.totalorder %s42_s17, %s42_s17 }
  0x2c   :  { %p6494_p5 = scmp.ne.s32.totalorder %s42_s17, %s6493_s27  ;;  %p6499_p7 = scmp.lt.s32.totalorder %s6493_s27, %s6493_s27 }
  0x2e   :  { %p6500_p8 = por %p6499_p7, %p6498_p6 }
  0x30   :  { %p6501_p9 = pnand %p6500_p8, %p6494_p5 }
  0x32   :  { %6504 = shalt.err (!%p6501_p9)
}
  0x33   :  { %47 = dma.hbm_to_vmem [thread:$0]  %s9050_s2, 1024, %s42_s17, [#allocation6], %s6534_s25, %s6534_s25, %s6535_s26  }
  0x34   :  { %6527 = dma.done.wait [#allocation3], 2048  }
  0x35   :  { %6528 = vsyncadd [#allocation3], 4294965248 }
  0x36   :  { %6529 = dma.done.wait [#allocation6], 2048  }
  0x37   :  { %6530 = vsyncadd [#allocation6], 4294965248  ;;  %v6611_v0 = vld [vmem:[#allocation7] sm:$0xff]   ;;  %v6407_v1 = vld [vmem:[#allocation7 + $0x8] sm:$0xff]  }
  0x38   :  { %5502 = vmatprep.subr.bf16.mxu0 %v6611_v0  ;;  %5662 = vmatprep.subr.bf16.mxu1 %v6611_v0  ;;  %v6408_v2 = vld [vmem:[#allocation7 + $0x10] sm:$0xff]   ;;  %v6409_v3 = vld [vmem:[#allocation7 + $0x18] sm:$0xff]   ;;  %v60_v4 = vld [vmem:[#allocation2] sm:$0xff] }
  0x39   :  { %5503 = vmatpush3.bf16.msra.mxu0 %v6611_v0  ;;  %5663 = vmatpush3.bf16.msra.mxu1 %v6611_v0  ;;  %v76_v5 = vunpack.c.0.s8 %v60_v4  ;;  %v77_v6 = vunpack.c.1.s8 %v60_v4  ;;  %v78_v7 = vunpack.c.2.s8 %v60_v4  ;;  %v79_v8 = vunpack.c.3.s8 %v60_v4  ;;  %v61_v9 = vld [vmem:[#allocation2 + $0x8] sm:$0xff]  ;;  %v6410_v14 = vld [vmem:[#allocation7 + $0x20] sm:$0xff]   ;;  %v6412_v52 = vld [vmem:[#allocation7 + $0x30] sm:$0xff]  }
  0x3a   :  { %5504 = vmatprep.subr.bf16.mxu0 %v6407_v1  ;;  %5664 = vmatprep.subr.bf16.mxu1 %v6407_v1  ;;  %v80_v10 = vunpack.c.0.s8 %v61_v9  ;;  %v81_v11 = vunpack.c.1.s8 %v61_v9  ;;  %v82_v12 = vunpack.c.2.s8 %v61_v9  ;;  %v83_v13 = vunpack.c.3.s8 %v61_v9  ;;  %v6411_v31 = vld [vmem:[#allocation7 + $0x28] sm:$0xff]   ;;  %v62_v61 = vld [vmem:[#allocation2 + $0x10] sm:$0xff] }
  0x3b   :  { %v6617_v15 = vadd.s32 8, %v76_v5  ;;  %v6619_v16 = vadd.s32 8, %v77_v6  ;;  %v6621_v17 = vadd.s32 8, %v78_v7  ;;  %v6623_v18 = vadd.s32 8, %v79_v8 }
  0x3c   :  { %v6625_v19 = vadd.s32 8, %v80_v10  ;;  %v6627_v20 = vadd.s32 8, %v81_v11  ;;  %v6629_v21 = vadd.s32 8, %v82_v12  ;;  %v6631_v22 = vadd.s32 8, %v83_v13 }
  0x3d   :  { %5505 = vmatpush3.bf16.msra.mxu0 %v6407_v1  ;;  %5665 = vmatpush3.bf16.msra.mxu1 %v6407_v1  ;;  %9253 = vst [vmem:[#allocation12_spill] sm:$0xff] %v6617_v15  ;;  %9254 = vst [vmem:[#allocation13_spill] sm:$0xff] %v6619_v16  ;;  %v236_v23 = vshra.s32 %v6617_v15, 3  ;;  %v237_v24 = vshra.s32 %v6619_v16, 3  ;;  %v1518_v25 = vshra.s32 %v6617_v15, 2  ;;  %v1519_v26 = vshra.s32 %v6619_v16, 2 }
  0x3e   :  { %5506 = vmatprep.subr.bf16.mxu0 %v6408_v2  ;;  %5666 = vmatprep.subr.bf16.mxu1 %v6408_v2  ;;  %9255 = vst [vmem:[#allocation14_spill] sm:$0xff] %v6621_v17  ;;  %9256 = vst [vmem:[#allocation15_spill] sm:$0xff] %v6623_v18  ;;  %v238_v27 = vshra.s32 %v6621_v17, 3  ;;  %v239_v28 = vshra.s32 %v6623_v18, 3  ;;  %v1520_v29 = vshra.s32 %v6621_v17, 2  ;;  %v1521_v30 = vshra.s32 %v6623_v18, 2 }
  0x3f   :  { %9257 = vst [vmem:[#allocation16_spill] sm:$0xff] %v6625_v19  ;;  %9258 = vst [vmem:[#allocation17_spill] sm:$0xff] %v6627_v20  ;;  %v300_v32 = vand.u32 1, %v236_v23  ;;  %v301_v33 = vand.u32 1, %v237_v24  ;;  %v1582_v34 = vand.u32 1, %v1518_v25  ;;  %v1583_v35 = vand.u32 1, %v1519_v26 }
  0x40   :  { %9259 = vst [vmem:[#allocation18_spill] sm:$0xff] %v6629_v21  ;;  %9260 = vst [vmem:[#allocation19_spill] sm:$0xff] %v6631_v22  ;;  %v302_v36 = vand.u32 1, %v238_v27  ;;  %v303_v37 = vand.u32 1, %v239_v28  ;;  %v1584_v38 = vand.u32 1, %v1520_v29  ;;  %v1585_v39 = vand.u32 1, %v1521_v30 }
  0x41   :  { %5507 = vmatpush3.bf16.msra.mxu0 %v6408_v2  ;;  %5667 = vmatpush3.bf16.msra.mxu1 %v6408_v2  ;;  %v364_v40 = vcvt.s32.f32 %v300_v32  ;;  %v365_v41 = vcvt.s32.f32 %v301_v33  ;;  %v1646_v42 = vcvt.s32.f32 %v1582_v34  ;;  %v1647_v43 = vcvt.s32.f32 %v1583_v35  ;;  %v6661_v24 = vld [vmem:[#allocation2 + $0x18] sm:$0xff]  ;;  %v6414_v33 = vld [vmem:[#allocation5] sm:$0xff]  }
  0x42   :  { %5508 = vmatprep.subr.bf16.mxu0 %v6409_v3  ;;  %5668 = vmatprep.subr.bf16.mxu1 %v6409_v3  ;;  %v366_v44 = vcvt.s32.f32 %v302_v36  ;;  %v367_v45 = vcvt.s32.f32 %v303_v37  ;;  %v1648_v46 = vcvt.s32.f32 %v1584_v38  ;;  %v1649_v47 = vcvt.s32.f32 %v1585_v39 }
  0x43   :  { %v6641_v48 = vpack.c.bf16 %v365_v41, %v364_v40  ;;  %v6643_v49 = vpack.c.bf16 %v1647_v43, %v1646_v42  ;;  %v240_v50 = vshra.s32 %v6625_v19, 3  ;;  %v241_v51 = vshra.s32 %v6627_v20, 3 }
  0x44   :  { %v6647_v53 = vpack.c.bf16 %v367_v45, %v366_v44  ;;  %v6649_v54 = vpack.c.bf16 %v1649_v47, %v1648_v46  ;;  %v1522_v55 = vshra.s32 %v6625_v19, 2  ;;  %v1523_v56 = vshra.s32 %v6627_v20, 2 }
  0x45   :  { %5509 = vmatpush3.bf16.msra.mxu0 %v6409_v3  ;;  %5669 = vmatpush3.bf16.msra.mxu1 %v6409_v3  ;;  %v304_v57 = vand.u32 1, %v240_v50  ;;  %v305_v58 = vand.u32 1, %v241_v51  ;;  %v242_v59 = vshra.s32 %v6629_v21, 3  ;;  %v243_v60 = vshra.s32 %v6631_v22, 3  ;;  %v6413_v3 = vld [vmem:[#allocation7 + $0x38] sm:$0xff]  }
  0x46   :  { %5510 = vmatprep.subr.bf16.mxu0 %v6410_v14  ;;  %5670 = vmatprep.subr.bf16.mxu1 %v6410_v14  ;;  %v1586_v62 = vand.u32 1, %v1522_v55  ;;  %v1587_v63 = vand.u32 1, %v1523_v56  ;;  %v1524_v1 = vshra.s32 %v6629_v21, 2  ;;  %v1525_v2 = vshra.s32 %v6631_v22, 2 }
  0x47   :  { %5518 = vmatprep.mubr.bf16.mxu0 %v6641_v48  ;;  %5678 = vmatprep.mubr.bf16.mxu1 %v6643_v49  ;;  %v368_v4 = vcvt.s32.f32 %v304_v57  ;;  %v369_v5 = vcvt.s32.f32 %v305_v58  ;;  %v306_v6 = vand.u32 1, %v242_v59  ;;  %v307_v7 = vand.u32 1, %v243_v60 }
  0x48   :  { %v1650_v8 = vcvt.s32.f32 %v1586_v62  ;;  %v1651_v9 = vcvt.s32.f32 %v1587_v63  ;;  %v1588_v10 = vand.u32 1, %v1524_v1  ;;  %v1589_v11 = vand.u32 1, %v1525_v2  ;;  %v6415_v62 = vld [vmem:[#allocation5 + $0x8] sm:$0xff]  }
  0x49   :  { %5511 = vmatpush3.bf16.msra.mxu0 %v6410_v14  ;;  %5671 = vmatpush3.bf16.msra.mxu1 %v6410_v14  ;;  %v6659_v12 = vpack.c.bf16 %v369_v5, %v368_v4  ;;  %v370_v13 = vcvt.s32.f32 %v306_v6  ;;  %v371_v14 = vcvt.s32.f32 %v307_v7  ;;  %v84_v23 = vunpack.c.0.s8 %v62_v61 }
  0x4a   :  { %5512 = vmatprep.subr.bf16.mxu0 %v6411_v31  ;;  %5672 = vmatprep.subr.bf16.mxu1 %v6411_v31  ;;  %v6663_v25 = vpack.c.bf16 %v1651_v9, %v1650_v8  ;;  %v1652_v26 = vcvt.s32.f32 %v1588_v10  ;;  %v1653_v27 = vcvt.s32.f32 %v1589_v11  ;;  %v85_v28 = vunpack.c.1.s8 %v62_v61 }
  0x4b   :  { %v6665_v29 = vpack.c.bf16 %v371_v14, %v370_v13  ;;  %v6667_v30 = vadd.s32 8, %v84_v23  ;;  %v87_v32 = vunpack.c.3.s8 %v62_v61  ;;  %v88_v36 = vunpack.c.0.s8 %v6661_v24  ;;  %v6701_v13 = vld [vmem:[#allocation2 + $0x20] sm:$0xff]  ;;  %v6416_v14 = vld [vmem:[#allocation5 + $0x10] sm:$0xff]  }
  0x4c   :  { %v6669_v34 = vpack.c.bf16 %v1653_v27, %v1652_v26  ;;  %v6671_v35 = vadd.s32 8, %v85_v28  ;;  %v89_v37 = vunpack.c.1.s8 %v6661_v24 }
  0x4d   :  { %5513 = vmatpush3.bf16.msra.mxu0 %v6411_v31  ;;  %5673 = vmatpush3.bf16.msra.mxu1 %v6411_v31  ;;  %9261 = vst [vmem:[#allocation20_spill] sm:$0xff] %v6667_v30  ;;  %v86_v31 = vunpack.c.2.s8 %v62_v61  ;;  %v244_v38 = vshra.s32 %v6667_v30, 3  ;;  %v1526_v39 = vshra.s32 %v6667_v30, 2  ;;  %v6679_v41 = vadd.s32 8, %v87_v32 }
  0x4e   :  { %5514 = vmatprep.subr.bf16.mxu0 %v6412_v52  ;;  %5674 = vmatprep.subr.bf16.mxu1 %v6412_v52  ;;  %9262 = vst [vmem:[#allocation21_spill] sm:$0xff] %v6671_v35  ;;  %v245_v42 = vshra.s32 %v6671_v35, 3  ;;  %v1527_v43 = vshra.s32 %v6671_v35, 2  ;;  %v6683_v44 = vadd.s32 8, %v88_v36  ;;  %v6685_v45 = vadd.s32 8, %v89_v37 }
  0x4f   :  { %v6677_v40 = vadd.s32 8, %v86_v31  ;;  %9264 = vst [vmem:[#allocation23_spill] sm:$0xff] %v6679_v41  ;;  %v308_v46 = vand.u32 1, %v244_v38  ;;  %v1590_v47 = vand.u32 1, %v1526_v39  ;;  %v247_v51 = vshra.s32 %v6679_v41, 3 }
  0x50   :  { %9265 = vst [vmem:[#allocation24_spill] sm:$0xff] %v6683_v44  ;;  %9266 = vst [vmem:[#allocation25_spill] sm:$0xff] %v6685_v45  ;;  %v1591_v55 = vand.u32 1, %v1527_v43  ;;  %v1529_v57 = vshra.s32 %v6679_v41, 2  ;;  %v248_v6 = vshra.s32 %v6683_v44, 3  ;;  %v249_v7 = vshra.s32 %v6685_v45, 3 }
  0x51   :  { %5515 = vmatpush3.bf16.msra.mxu0 %v6412_v52  ;;  %5675 = vmatpush3.bf16.msra.mxu1 %v6412_v52  ;;  %9263 = vst [vmem:[#allocation22_spill] sm:$0xff] %v6677_v40  ;;  %v246_v50 = vshra.s32 %v6677_v40, 3  ;;  %v309_v52 = vand.u32 1, %v245_v42  ;;  %v1528_v56 = vshra.s32 %v6677_v40, 2  ;;  %v372_v58 = vcvt.s32.f32 %v308_v46 }
  0x52   :  { %5516 = vmatprep.subr.bf16.mxu0 %v6413_v3  ;;  %5676 = vmatprep.subr.bf16.mxu1 %v6413_v3  ;;  %v1654_v59 = vcvt.s32.f32 %v1590_v47  ;;  %v311_v61 = vand.u32 1, %v247_v51  ;;  %v1655_v1 = vcvt.s32.f32 %v1591_v55  ;;  %v312_v26 = vand.u32 1, %v248_v6 }
  0x53   :  { %v310_v60 = vand.u32 1, %v246_v50  ;;  %v373_v63 = vcvt.s32.f32 %v309_v52  ;;  %v1592_v2 = vand.u32 1, %v1528_v56  ;;  %v313_v27 = vand.u32 1, %v249_v7  ;;  %v6417_v56 = vld [vmem:[#allocation5 + $0x18] sm:$0xff]  }
  0x54   :  { %v375_v5 = vcvt.s32.f32 %v311_v61  ;;  %v6699_v9 = vpack.c.bf16 %v1655_v1, %v1654_v59  ;;  %v1530_v28 = vshra.s32 %v6683_v44, 2  ;;  %v1531_v32 = vshra.s32 %v6685_v45, 2 }
  0x55   :  { %5517 = vmatpush3.bf16.msra.mxu0 %v6413_v3  ;;  %5677 = vmatpush3.bf16.msra.mxu1 %v6413_v3  ;;  %v1593_v3 = vand.u32 1, %v1529_v57  ;;  %v374_v4 = vcvt.s32.f32 %v310_v60  ;;  %v6697_v8 = vpack.c.bf16 %v373_v63, %v372_v58  ;;  %v1656_v10 = vcvt.s32.f32 %v1592_v2 }
  0x56   :  { %5582 = vmatprep.subr.bf16.mxu0 %v6414_v33  ;;  %5742 = vmatprep.subr.bf16.mxu1 %v6414_v33  ;;  %v91_v36 = vunpack.c.3.s8 %v6661_v24  ;;  %v376_v37 = vcvt.s32.f32 %v312_v26  ;;  %v377_v38 = vcvt.s32.f32 %v313_v27  ;;  %v1594_v39 = vand.u32 1, %v1530_v28  ;;  %v6418_v26 = vld [vmem:[#allocation5 + $0x20] sm:$0xff]  }
  0x57   :  { %v1657_v11 = vcvt.s32.f32 %v1593_v3  ;;  %v6703_v23 = vpack.c.bf16 %v375_v5, %v374_v4  ;;  %v92_v42 = vunpack.c.0.s8 %v6701_v13  ;;  %v1595_v43 = vand.u32 1, %v1531_v32 }
  0x58   :  { %5519 = vmatmul.mubr.bf16.vlgmr.msra.gmra.mrb[0].mxu0 %v6647_v53  ;;  %5679 = vmatmul.mubr.bf16.vlgmr.msra.gmra.mrb[0].mxu1 %v6649_v54  ;;  %v6714_v47 = vadd.s32 8, %v91_v36  ;;  %v93_v50 = vunpack.c.1.s8 %v6701_v13  ;;  %v6717_v51 = vpack.c.bf16 %v377_v38, %v376_v37  ;;  %v1658_v52 = vcvt.s32.f32 %v1594_v39  ;;  %v65_v36 = vld [vmem:[#allocation2 + $0x28] sm:$0xff] }
  0x59   :  { %5583 = vmatpush3.bf16.msra.mxu0 %v6414_v33  ;;  %5743 = vmatpush3.bf16.msra.mxu1 %v6414_v33  ;;  %v6706_v31 = vpack.c.bf16 %v1657_v11, %v1656_v10  ;;  %v90_v33 = vunpack.c.2.s8 %v6661_v24  ;;  %v6719_v24 = vadd.s32 8, %v92_v42  ;;  %v94_v55 = vunpack.c.2.s8 %v6701_v13 }
  0x5a   :  { %5522 = vmatprep.mubr.bf16.mxu0 %v6659_v12  ;;  %5682 = vmatprep.mubr.bf16.mxu1 %v6663_v25  ;;  %9268 = vst [vmem:[#allocation27_spill] sm:$0xff] %v6714_v47  ;;  %v1659_v57 = vcvt.s32.f32 %v1595_v43  ;;  %v251_v59 = vshra.s32 %v6714_v47, 3  ;;  %v1533_v61 = vshra.s32 %v6714_v47, 2 }
  0x5b   :  { %5584 = vmatprep.subr.bf16.mxu0 %v6415_v62  ;;  %5744 = vmatprep.subr.bf16.mxu1 %v6415_v62  ;;  %v6712_v46 = vadd.s32 8, %v90_v33  ;;  %9269 = vst [vmem:[#allocation28_spill] sm:$0xff] %v6719_v24  ;;  %v252_v63 = vshra.s32 %v6719_v24, 3  ;;  %v1534_v1 = vshra.s32 %v6719_v24, 2  ;;  %v6817_v24 = vld [vmem:[#allocation2 + $0x40] sm:$0xff] }
  0x5c   :  { %v6734_v2 = vpack.c.bf16 %v1659_v57, %v1658_v52  ;;  %v315_v4 = vand.u32 1, %v251_v59  ;;  %v1597_v6 = vand.u32 1, %v1533_v61  ;;  %v6741_v52 = vadd.s32 8, %v94_v55  ;;  %v6419_v61 = vld [vmem:[#allocation5 + $0x28] sm:$0xff]  }
  0x5d   :  { %5585 = vmatpush3.bf16.msra.mxu0 %v6415_v62  ;;  %5745 = vmatpush3.bf16.msra.mxu1 %v6415_v62  ;;  %9267 = vst [vmem:[#allocation26_spill] sm:$0xff] %v6712_v46  ;;  %v250_v58 = vshra.s32 %v6712_v46, 3  ;;  %v1532_v60 = vshra.s32 %v6712_v46, 2  ;;  %v6730_v62 = vadd.s32 8, %v93_v50  ;;  %v316_v10 = vand.u32 1, %v252_v63 }
  0x5e   :  { %5586 = vmatprep.subr.bf16.mxu0 %v6416_v14  ;;  %5746 = vmatprep.subr.bf16.mxu1 %v6416_v14  ;;  %v379_v28 = vcvt.s32.f32 %v315_v4  ;;  %v1598_v33 = vand.u32 1, %v1534_v1  ;;  %v1661_v37 = vcvt.s32.f32 %v1597_v6  ;;  %v95_v50 = vunpack.c.3.s8 %v6701_v13  ;;  %9271 = vst [vmem:[#allocation30_spill] sm:$0xff] %v6741_v52 }
  0x5f   :  { %9270 = vst [vmem:[#allocation29_spill] sm:$0xff] %v6730_v62  ;;  %v314_v3 = vand.u32 1, %v250_v58  ;;  %v1596_v5 = vand.u32 1, %v1532_v60  ;;  %v253_v7 = vshra.s32 %v6730_v62, 3  ;;  %v1535_v11 = vshra.s32 %v6730_v62, 2  ;;  %v67_v62 = vld [vmem:[#allocation2 + $0x38] sm:$0xff] }
  0x60   :  { %5523 = vmatmul.mubr.bf16.gmra.mrb[4].mxu0 %v6665_v29  ;;  %5683 = vmatmul.mubr.bf16.gmra.mrb[4].mxu1 %v6669_v34  ;;  %v380_v39 = vcvt.s32.f32 %v316_v10  ;;  %v96_v60 = vunpack.c.0.s8 %v65_v36  ;;  %v6747_v63 = vadd.s32 8, %v95_v50  ;;  %v254_v13 = vshra.s32 %v6741_v52, 3 }
  0x61   :  { %5526 = vmatprep.mubr.bf16.mxu0 %v6697_v8  ;;  %5686 = vmatprep.mubr.bf16.mxu1 %v6699_v9  ;;  %v378_v27 = vcvt.s32.f32 %v314_v3  ;;  %v1660_v32 = vcvt.s32.f32 %v1596_v5  ;;  %v317_v38 = vand.u32 1, %v253_v7  ;;  %v1599_v42 = vand.u32 1, %v1535_v11 }
  0x62   :  { %5587 = vmatpush3.bf16.msra.mxu0 %v6416_v14  ;;  %5747 = vmatpush3.bf16.msra.mxu1 %v6416_v14  ;;  %v1662_v14 = vcvt.s32.f32 %v1598_v33  ;;  %9272 = vst [vmem:[#allocation31_spill] sm:$0xff] %v6747_v63  ;;  %v1536_v55 = vshra.s32 %v6741_v52, 2  ;;  %v97_v1 = vunpack.c.1.s8 %v65_v36  ;;  %v6757_v4 = vadd.s32 8, %v96_v60 }
  0x63   :  { %5588 = vmatprep.subr.bf16.mxu0 %v6417_v56  ;;  %5748 = vmatprep.subr.bf16.mxu1 %v6417_v56  ;;  %v6738_v43 = vpack.c.bf16 %v379_v28, %v378_v27  ;;  %v6743_v57 = vpack.c.bf16 %v1661_v37, %v1660_v32  ;;  %v381_v58 = vcvt.s32.f32 %v317_v38  ;;  %v1663_v59 = vcvt.s32.f32 %v1599_v42  ;;  %v6420_v37 = vld [vmem:[#allocation5 + $0x30] sm:$0xff]  }
  0x64   :  { %9273 = vst [vmem:[#allocation32_spill] sm:$0xff] %v6757_v4  ;;  %v98_v5 = vunpack.c.2.s8 %v65_v36  ;;  %v255_v6 = vshra.s32 %v6747_v63, 3  ;;  %v318_v7 = vand.u32 1, %v254_v13  ;;  %v1537_v10 = vshra.s32 %v6747_v63, 2 }
  0x65   :  { %v6755_v3 = vpack.c.bf16 %v1663_v59, %v1662_v14  ;;  %v1600_v11 = vand.u32 1, %v1536_v55  ;;  %v6761_v27 = vadd.s32 8, %v97_v1  ;;  %v256_v28 = vshra.s32 %v6757_v4, 3 }
  0x66   :  { %5589 = vmatpush3.bf16.msra.mxu0 %v6417_v56  ;;  %5749 = vmatpush3.bf16.msra.mxu1 %v6417_v56  ;;  %v6753_v56 = vpack.c.bf16 %v381_v58, %v380_v39  ;;  %v1538_v32 = vshra.s32 %v6757_v4, 2  ;;  %v99_v33 = vunpack.c.3.s8 %v65_v36  ;;  %v319_v38 = vand.u32 1, %v255_v6 }
  0x67   :  { %5590 = vmatprep.subr.bf16.mxu0 %v6418_v26  ;;  %5750 = vmatprep.subr.bf16.mxu1 %v6418_v26  ;;  %9274 = vst [vmem:[#allocation33_spill] sm:$0xff] %v6761_v27  ;;  %v382_v39 = vcvt.s32.f32 %v318_v7  ;;  %v1601_v42 = vand.u32 1, %v1537_v10  ;;  %v1664_v14 = vcvt.s32.f32 %v1600_v11  ;;  %v257_v50 = vshra.s32 %v6761_v27, 3  ;;  %v66_v10 = vld [vmem:[#allocation2 + $0x30] sm:$0xff]  ;;  %v6421_v11 = vld [vmem:[#allocation5 + $0x38] sm:$0xff]  }
  0x68   :  { %5527 = vmatmul.mubr.bf16.gmra.mrb[8].mxu0 %v6703_v23  ;;  %5687 = vmatmul.mubr.bf16.gmra.mrb[8].mxu1 %v6706_v31  ;;  %v320_v58 = vand.u32 1, %v256_v28  ;;  %v1539_v59 = vshra.s32 %v6761_v27, 2  ;;  %v383_v60 = vcvt.s32.f32 %v319_v38  ;;  %v6767_v55 = vadd.s32 8, %v98_v5 }
  0x69   :  { %5530 = vmatprep.mubr.bf16.mxu0 %v6717_v51  ;;  %5690 = vmatprep.mubr.bf16.mxu1 %v6734_v2  ;;  %v1665_v13 = vcvt.s32.f32 %v1601_v42  ;;  %v6769_v1 = vadd.s32 8, %v99_v33  ;;  %v321_v36 = vand.u32 1, %v257_v50  ;;  %v103_v52 = vunpack.c.3.s8 %v66_v10 }
  0x6a   :  { %5591 = vmatpush3.bf16.msra.mxu0 %v6418_v26  ;;  %5751 = vmatpush3.bf16.msra.mxu1 %v6418_v26  ;;  %v1602_v26 = vand.u32 1, %v1538_v32  ;;  %9275 = vst [vmem:[#allocation34_spill] sm:$0xff] %v6767_v55  ;;  %v384_v4 = vcvt.s32.f32 %v320_v58  ;;  %v1603_v6 = vand.u32 1, %v1539_v59  ;;  %v6773_v28 = vpack.c.bf16 %v383_v60, %v382_v39 }
  0x6b   :  { %5592 = vmatprep.subr.bf16.mxu0 %v6419_v61  ;;  %5752 = vmatprep.subr.bf16.mxu1 %v6419_v61  ;;  %9276 = vst [vmem:[#allocation35_spill] sm:$0xff] %v6769_v1  ;;  %v6775_v5 = vpack.c.bf16 %v1665_v13, %v1664_v14  ;;  %v258_v32 = vshra.s32 %v6767_v55, 3  ;;  %v385_v33 = vcvt.s32.f32 %v321_v36  ;;  %v1540_v42 = vshra.s32 %v6767_v55, 2 }
  0x6c   :  { %v1666_v7 = vcvt.s32.f32 %v1602_v26  ;;  %v1667_v38 = vcvt.s32.f32 %v1603_v6  ;;  %v1541_v50 = vshra.s32 %v6769_v1, 2  ;;  %v100_v39 = vunpack.c.0.s8 %v66_v10 }
  0x6d   :  { %v322_v58 = vand.u32 1, %v258_v32  ;;  %v101_v26 = vunpack.c.1.s8 %v66_v10  ;;  %v6783_v14 = vpack.c.bf16 %v385_v33, %v384_v4  ;;  %v1604_v13 = vand.u32 1, %v1540_v42 }
  0x6e   :  { %5593 = vmatpush3.bf16.msra.mxu0 %v6419_v61  ;;  %5753 = vmatpush3.bf16.msra.mxu1 %v6419_v61  ;;  %v259_v61 = vshra.s32 %v6769_v1, 3  ;;  %v6785_v60 = vpack.c.bf16 %v1667_v38, %v1666_v7  ;;  %v1605_v27 = vand.u32 1, %v1541_v50  ;;  %v6787_v63 = vadd.s32 8, %v100_v39 }
  0x6f   :  { %5594 = vmatprep.subr.bf16.mxu0 %v6420_v37  ;;  %5754 = vmatprep.subr.bf16.mxu1 %v6420_v37  ;;  %v386_v36 = vcvt.s32.f32 %v322_v58  ;;  %v6789_v55 = vadd.s32 8, %v101_v26  ;;  %v1668_v32 = vcvt.s32.f32 %v1604_v13  ;;  %v102_v1 = vunpack.c.2.s8 %v66_v10 }
  0x70   :  { %5531 = vmatmul.mubr.bf16.gmra.mrb[12].mxu0 %v6738_v43  ;;  %5691 = vmatmul.mubr.bf16.gmra.mrb[12].mxu1 %v6743_v57  ;;  %v323_v59 = vand.u32 1, %v259_v61  ;;  %9277 = vst [vmem:[#allocation36_spill] sm:$0xff] %v6787_v63  ;;  %v1669_v61 = vcvt.s32.f32 %v1605_v27  ;;  %v260_v4 = vshra.s32 %v6787_v63, 3  ;;  %v1542_v33 = vshra.s32 %v6787_v63, 2 }
  0x71   :  { %5534 = vmatprep.mubr.bf16.mxu0 %v6753_v56  ;;  %5694 = vmatprep.mubr.bf16.mxu1 %v6755_v3  ;;  %9278 = vst [vmem:[#allocation37_spill] sm:$0xff] %v6789_v55  ;;  %v261_v7 = vshra.s32 %v6789_v55, 3  ;;  %v1543_v42 = vshra.s32 %v6789_v55, 2  ;;  %v6799_v50 = vadd.s32 8, %v102_v1  ;;  %v6801_v27 = vadd.s32 8, %v103_v52 }
  0x72   :  { %5595 = vmatpush3.bf16.msra.mxu0 %v6420_v37  ;;  %5755 = vmatpush3.bf16.msra.mxu1 %v6420_v37  ;;  %v387_v6 = vcvt.s32.f32 %v323_v59  ;;  %v6796_v38 = vpack.c.bf16 %v1669_v61, %v1668_v32  ;;  %v324_v10 = vand.u32 1, %v260_v4  ;;  %v1606_v59 = vand.u32 1, %v1542_v33 }
  0x73   :  { %5596 = vmatprep.subr.bf16.mxu0 %v6421_v11  ;;  %5756 = vmatprep.subr.bf16.mxu1 %v6421_v11  ;;  %9279 = vst [vmem:[#allocation38_spill] sm:$0xff] %v6799_v50  ;;  %9280 = vst [vmem:[#allocation39_spill] sm:$0xff] %v6801_v27  ;;  %v325_v58 = vand.u32 1, %v261_v7  ;;  %v1607_v1 = vand.u32 1, %v1543_v42  ;;  %v262_v52 = vshra.s32 %v6799_v50, 3  ;;  %v263_v39 = vshra.s32 %v6801_v27, 3 }
  0x74   :  { %v6791_v37 = vpack.c.bf16 %v387_v6, %v386_v36  ;;  %v1544_v26 = vshra.s32 %v6799_v50, 2  ;;  %v1670_v36 = vcvt.s32.f32 %v1606_v59  ;;  %v1545_v6 = vshra.s32 %v6801_v27, 2 }
  0x75   :  { %v389_v13 = vcvt.s32.f32 %v325_v58  ;;  %v1671_v32 = vcvt.s32.f32 %v1607_v1  ;;  %v326_v61 = vand.u32 1, %v262_v52  ;;  %v327_v4 = vand.u32 1, %v263_v39 }
  0x76   :  { %5597 = vmatpush3.bf16.msra.mxu0 %v6421_v11  ;;  %5757 = vmatpush3.bf16.msra.mxu1 %v6421_v11  ;;  %v104_v11 = vunpack.c.0.s8 %v67_v62  ;;  %v1608_v7 = vand.u32 1, %v1544_v26  ;;  %v1609_v55 = vand.u32 1, %v1545_v6  ;;  %v105_v63 = vunpack.c.1.s8 %v67_v62 }
  0x77   :  { %5822 = vmatprep.subr.bf16.mxu0 %v6611_v0  ;;  %5982 = vmatprep.subr.bf16.mxu1 %v6611_v0  ;;  %v388_v0 = vcvt.s32.f32 %v324_v10  ;;  %v6819_v47 = vpack.c.bf16 %v1671_v32, %v1670_v36  ;;  %v390_v50 = vcvt.s32.f32 %v326_v61  ;;  %v391_v10 = vcvt.s32.f32 %v327_v4 }
  0x78   :  { %5535 = vmatmul.mubr.bf16.gmra.mrb[16].mxu0 %v6773_v28  ;;  %5695 = vmatmul.mubr.bf16.gmra.mrb[16].mxu1 %v6775_v5  ;;  %v6815_v42 = vadd.s32 8, %v104_v11  ;;  %v1672_v58 = vcvt.s32.f32 %v1608_v7  ;;  %v1673_v59 = vcvt.s32.f32 %v1609_v55  ;;  %v6821_v46 = vadd.s32 8, %v105_v63 }
  0x79   :  { %5538 = vmatprep.mubr.bf16.mxu0 %v6783_v14  ;;  %5698 = vmatprep.mubr.bf16.mxu1 %v6785_v60  ;;  %v6813_v33 = vpack.c.bf16 %v389_v13, %v388_v0  ;;  %v6825_v39 = vpack.c.bf16 %v391_v10, %v390_v50  ;;  %v106_v26 = vunpack.c.2.s8 %v67_v62  ;;  %v107_v0 = vunpack.c.3.s8 %v67_v62 }
  0x7a   :  { %9281 = vst [vmem:[#allocation40_spill] sm:$0xff] %v6815_v42  ;;  %9282 = vst [vmem:[#allocation41_spill] sm:$0xff] %v6821_v46  ;;  %v264_v1 = vshra.s32 %v6815_v42, 3  ;;  %v1546_v52 = vshra.s32 %v6815_v42, 2  ;;  %v108_v11 = vunpack.c.0.s8 %v6817_v24  ;;  %v6830_v13 = vpack.c.bf16 %v1673_v59, %v1672_v58 }
  0x7b   :  { %v265_v55 = vshra.s32 %v6821_v46, 3  ;;  %v1547_v36 = vshra.s32 %v6821_v46, 2  ;;  %v6836_v6 = vadd.s32 8, %v106_v26  ;;  %v6838_v62 = vadd.s32 8, %v107_v0 }
  0x7c   :  { %v328_v63 = vand.u32 1, %v264_v1  ;;  %v1610_v50 = vand.u32 1, %v1546_v52  ;;  %v109_v32 = vunpack.c.1.s8 %v6817_v24  ;;  %v6841_v10 = vadd.s32 8, %v108_v11 }
  0x7d   :  { %9283 = vst [vmem:[#allocation42_spill] sm:$0xff] %v6836_v6  ;;  %9284 = vst [vmem:[#allocation43_spill] sm:$0xff] %v6838_v62  ;;  %v329_v61 = vand.u32 1, %v265_v55  ;;  %v1611_v7 = vand.u32 1, %v1547_v36  ;;  %v266_v59 = vshra.s32 %v6836_v6, 3  ;;  %v267_v1 = vshra.s32 %v6838_v62, 3 }
  0x7e   :  { %v392_v4 = vcvt.s32.f32 %v328_v63  ;;  %9285 = vst [vmem:[#allocation44_spill] sm:$0xff] %v6841_v10  ;;  %v1674_v58 = vcvt.s32.f32 %v1610_v50  ;;  %v1548_v46 = vshra.s32 %v6836_v6, 2  ;;  %v1549_v26 = vshra.s32 %v6838_v62, 2 }
  0x7f   :  { %v393_v42 = vcvt.s32.f32 %v329_v61  ;;  %v1675_v52 = vcvt.s32.f32 %v1611_v7  ;;  %v6847_v0 = vadd.s32 8, %v109_v32  ;;  %v330_v27 = vand.u32 1, %v266_v59 }
  0x80   :  { %5539 = vmatmul.mubr.bf16.gmra.mrb[20].mxu0 %v6791_v37  ;;  %5699 = vmatmul.mubr.bf16.gmra.mrb[20].mxu1 %v6796_v38  ;;  %v331_v45 = vand.u32 1, %v267_v1  ;;  %v1612_v55 = vand.u32 1, %v1548_v46  ;;  %v268_v63 = vshra.s32 %v6841_v10, 3  ;;  %v1613_v50 = vand.u32 1, %v1549_v26 }
  0x81   :  { %5542 = vmatprep.mubr.bf16.mxu0 %v6813_v33  ;;  %5702 = vmatprep.mubr.bf16.mxu1 %v6819_v47  ;;  %9286 = vst [vmem:[#allocation45_spill] sm:$0xff] %v6847_v0  ;;  %v6850_v11 = vpack.c.bf16 %v393_v42, %v392_v4  ;;  %v6852_v36 = vpack.c.bf16 %v1675_v52, %v1674_v58  ;;  %v269_v44 = vshra.s32 %v6847_v0, 3  ;;  %v394_v41 = vcvt.s32.f32 %v330_v27  ;;  %v69_v4 = vld [vmem:[#allocation2 + $0x48] sm:$0xff] }
  0x82   :  { %v395_v6 = vcvt.s32.f32 %v331_v45  ;;  %v1676_v61 = vcvt.s32.f32 %v1612_v55  ;;  %v332_v7 = vand.u32 1, %v268_v63  ;;  %v1677_v32 = vcvt.s32.f32 %v1613_v50 }
  0x83   :  { %v333_v59 = vand.u32 1, %v269_v44  ;;  %v1550_v46 = vshra.s32 %v6841_v10, 2  ;;  %v1551_v42 = vshra.s32 %v6847_v0, 2  ;;  %v110_v27 = vunpack.c.2.s8 %v6817_v24 }
  0x84   :  { %v6861_v58 = vpack.c.bf16 %v395_v6, %v394_v41  ;;  %v396_v45 = vcvt.s32.f32 %v332_v7  ;;  %v111_v1 = vunpack.c.3.s8 %v6817_v24  ;;  %v6865_v52 = vpack.c.bf16 %v1677_v32, %v1676_v61 }
  0x85   :  { %v397_v26 = vcvt.s32.f32 %v333_v59  ;;  %v1614_v44 = vand.u32 1, %v1550_v46  ;;  %v1615_v55 = vand.u32 1, %v1551_v42  ;;  %v6867_v63 = vadd.s32 8, %v110_v27 }
  0x86   :  { %v6869_v50 = vadd.s32 8, %v111_v1  ;;  %v112_v0 = vunpack.c.0.s8 %v69_v4  ;;  %v113_v10 = vunpack.c.1.s8 %v69_v4  ;;  %v114_v7 = vunpack.c.2.s8 %v69_v4 }
  0x87   :  { %9287 = vst [vmem:[#allocation46_spill] sm:$0xff] %v6867_v63  ;;  %v6871_v62 = vpack.c.bf16 %v397_v26, %v396_v45  ;;  %v1678_v41 = vcvt.s32.f32 %v1614_v44  ;;  %v1679_v6 = vcvt.s32.f32 %v1615_v55  ;;  %v270_v40 = vshra.s32 %v6867_v63, 3 }
  0x88   :  { %5543 = vmatmul.mubr.bf16.gmra.mrb[24].mxu0 %v6825_v39  ;;  %5703 = vmatmul.mubr.bf16.gmra.mrb[24].mxu1 %v6830_v13  ;;  %9288 = vst [vmem:[#allocation47_spill] sm:$0xff] %v6869_v50  ;;  %v271_v24 = vshra.s32 %v6869_v50, 3  ;;  %v1552_v61 = vshra.s32 %v6867_v63, 2  ;;  %v1553_v32 = vshra.s32 %v6869_v50, 2  ;;  %v6879_v46 = vadd.s32 8, %v112_v0 }
  0x89   :  { %5546 = vmatprep.mubr.bf16.mxu0 %v6850_v11  ;;  %5706 = vmatprep.mubr.bf16.mxu1 %v6852_v36  ;;  %v6877_v59 = vpack.c.bf16 %v1679_v6, %v1678_v41  ;;  %v6881_v42 = vadd.s32 8, %v113_v10  ;;  %v115_v27 = vunpack.c.3.s8 %v69_v4  ;;  %v334_v45 = vand.u32 1, %v270_v40 }
  0x8a   :  { %9289 = vst [vmem:[#allocation48_spill] sm:$0xff] %v6879_v46  ;;  %v335_v1 = vand.u32 1, %v271_v24  ;;  %v1616_v26 = vand.u32 1, %v1552_v61  ;;  %v1617_v44 = vand.u32 1, %v1553_v32  ;;  %v272_v55 = vshra.s32 %v6879_v46, 3 }
  0x8b   :  { %9290 = vst [vmem:[#allocation49_spill] sm:$0xff] %v6881_v42  ;;  %v273_v63 = vshra.s32 %v6881_v42, 3  ;;  %v1554_v41 = vshra.s32 %v6879_v46, 2  ;;  %v1555_v0 = vshra.s32 %v6881_v42, 2  ;;  %v398_v40 = vcvt.s32.f32 %v334_v45  ;;  %v70_v42 = vld [vmem:[#allocation2 + $0x50] sm:$0xff] }
  0x8c   :  { %v399_v10 = vcvt.s32.f32 %v335_v1  ;;  %v1680_v4 = vcvt.s32.f32 %v1616_v26  ;;  %v1681_v6 = vcvt.s32.f32 %v1617_v44  ;;  %v336_v24 = vand.u32 1, %v272_v55 }
  0x8d   :  { %v337_v61 = vand.u32 1, %v273_v63  ;;  %v1618_v32 = vand.u32 1, %v1554_v41  ;;  %v1619_v50 = vand.u32 1, %v1555_v0  ;;  %v6895_v22 = vadd.s32 8, %v114_v7 }
  0x8e   :  { %v6891_v35 = vpack.c.bf16 %v399_v10, %v398_v40  ;;  %v6893_v30 = vpack.c.bf16 %v1681_v6, %v1680_v4  ;;  %v6897_v46 = vadd.s32 8, %v115_v27  ;;  %v400_v21 = vcvt.s32.f32 %v336_v24 }
  0x8f   :  { %9291 = vst [vmem:[#allocation50_spill] sm:$0xff] %v6895_v22  ;;  %v401_v20 = vcvt.s32.f32 %v337_v61  ;;  %v1682_v19 = vcvt.s32.f32 %v1618_v32  ;;  %v1683_v45 = vcvt.s32.f32 %v1619_v50  ;;  %v274_v1 = vshra.s32 %v6895_v22, 3 }
  0x90   :  { %5547 = vmatmul.mubr.bf16.gmra.mrb[28].mxu0 %v6861_v58  ;;  %5707 = vmatmul.mubr.bf16.gmra.mrb[28].mxu1 %v6865_v52  ;;  %9292 = vst [vmem:[#allocation51_spill] sm:$0xff] %v6897_v46  ;;  %v275_v26 = vshra.s32 %v6897_v46, 3  ;;  %v1556_v63 = vshra.s32 %v6895_v22, 2  ;;  %v1557_v44 = vshra.s32 %v6897_v46, 2  ;;  %v116_v7 = vunpack.c.0.s8 %v70_v42 }
  0x91   :  { %5550 = vmatprep.mubr.bf16.mxu0 %v6871_v62  ;;  %5710 = vmatprep.mubr.bf16.mxu1 %v6877_v59  ;;  %v6903_v55 = vpack.c.bf16 %v401_v20, %v400_v21  ;;  %v6905_v41 = vpack.c.bf16 %v1683_v45, %v1682_v19  ;;  %v117_v27 = vunpack.c.1.s8 %v70_v42  ;;  %v338_v0 = vand.u32 1, %v274_v1 }
  0x92   :  { %v339_v40 = vand.u32 1, %v275_v26  ;;  %v1620_v10 = vand.u32 1, %v1556_v63  ;;  %v1621_v4 = vand.u32 1, %v1557_v44  ;;  %v6909_v50 = vadd.s32 8, %v116_v7 }
  0x93   :  { %9293 = vst [vmem:[#allocation52_spill] sm:$0xff] %v6905_v41  ;;  %v6911_v6 = vadd.s32 8, %v117_v27  ;;  %v118_v24 = vunpack.c.2.s8 %v70_v42  ;;  %v119_v61 = vunpack.c.3.s8 %v70_v42  ;;  %v402_v19 = vcvt.s32.f32 %v338_v0 }
  0x94   :  { %9294 = vst [vmem:[#allocation53_spill] sm:$0xff] %v6909_v50  ;;  %v403_v20 = vcvt.s32.f32 %v339_v40  ;;  %v1684_v21 = vcvt.s32.f32 %v1620_v10  ;;  %v1685_v32 = vcvt.s32.f32 %v1621_v4  ;;  %v276_v45 = vshra.s32 %v6909_v50, 3 }
  0x95   :  { %9295 = vst [vmem:[#allocation54_spill] sm:$0xff] %v6911_v6  ;;  %v277_v1 = vshra.s32 %v6911_v6, 3  ;;  %v1558_v26 = vshra.s32 %v6909_v50, 2  ;;  %v1559_v63 = vshra.s32 %v6911_v6, 2  ;;  %v6923_v42 = vadd.s32 8, %v118_v24 }
  0x96   :  { %v6919_v44 = vpack.c.bf16 %v403_v20, %v402_v19  ;;  %v6921_v7 = vpack.c.bf16 %v1685_v32, %v1684_v21  ;;  %v6925_v27 = vadd.s32 8, %v119_v61  ;;  %v340_v0 = vand.u32 1, %v276_v45  ;;  %v71_v19 = vld [vmem:[#allocation2 + $0x58] sm:$0xff] }
  0x97   :  { %9298 = vst [vmem:[#allocation57_spill] sm:$0xff] %v6923_v42  ;;  %v341_v40 = vand.u32 1, %v277_v1  ;;  %v1622_v10 = vand.u32 1, %v1558_v26  ;;  %v1623_v4 = vand.u32 1, %v1559_v63  ;;  %v278_v46 = vshra.s32 %v6923_v42, 3 }
  0x98   :  { %5551 = vmatmul.mubr.bf16.gmra.mrb[32].mxu0 %v6891_v35  ;;  %5711 = vmatmul.mubr.bf16.gmra.mrb[32].mxu1 %v6893_v30  ;;  %9296 = vst [vmem:[#allocation55_spill] sm:$0xff] %v6919_v44  ;;  %9297 = vst [vmem:[#allocation56_spill] sm:$0xff] %v6921_v7  ;;  %v279_v22 = vshra.s32 %v6925_v27, 3  ;;  %v1560_v50 = vshra.s32 %v6923_v42, 2  ;;  %v1561_v6 = vshra.s32 %v6925_v27, 2  ;;  %v404_v20 = vcvt.s32.f32 %v340_v0 }
  0x99   :  { %5554 = vmatprep.mubr.bf16.mxu0 %v6903_v55  ;;  %5714 = vmatprep.mubr.bf16.mxu1 %v6905_v41  ;;  %9299 = vst [vmem:[#allocation58_spill] sm:$0xff] %v6925_v27  ;;  %v405_v21 = vcvt.s32.f32 %v341_v40  ;;  %v1686_v32 = vcvt.s32.f32 %v1622_v10  ;;  %v1687_v24 = vcvt.s32.f32 %v1623_v4  ;;  %v342_v18 = vand.u32 1, %v278_v46  ;;  %v6937_v27 = vld [vmem:[#allocation2 + $0x60] sm:$0xff] }
  0x9a   :  { %v343_v61 = vand.u32 1, %v279_v22  ;;  %v1624_v17 = vand.u32 1, %v1560_v50  ;;  %v1625_v45 = vand.u32 1, %v1561_v6  ;;  %v120_v63 = vunpack.c.0.s8 %v71_v19 }
  0x9b   :  { %v6933_v1 = vpack.c.bf16 %v405_v21, %v404_v20  ;;  %v6935_v26 = vpack.c.bf16 %v1687_v24, %v1686_v32  ;;  %v121_v42 = vunpack.c.1.s8 %v71_v19  ;;  %v406_v0 = vcvt.s32.f32 %v342_v18 }
  0x9c   :  { %v407_v40 = vcvt.s32.f32 %v343_v61  ;;  %v1688_v10 = vcvt.s32.f32 %v1624_v17  ;;  %v1689_v4 = vcvt.s32.f32 %v1625_v45  ;;  %v6941_v22 = vadd.s32 8, %v120_v63 }
  0x9d   :  { %9300 = vst [vmem:[#allocation59_spill] sm:$0xff] %v6933_v1  ;;  %9301 = vst [vmem:[#allocation60_spill] sm:$0xff] %v6935_v26  ;;  %v6943_v46 = vadd.s32 8, %v121_v42  ;;  %v122_v50 = vunpack.c.2.s8 %v71_v19  ;;  %v123_v6 = vunpack.c.3.s8 %v71_v19  ;;  %v124_v32 = vunpack.c.0.s8 %v6937_v27 }
  0x9e   :  { %9302 = vst [vmem:[#allocation61_spill] sm:$0xff] %v6941_v22  ;;  %v6945_v20 = vpack.c.bf16 %v407_v40, %v406_v0  ;;  %v6947_v21 = vpack.c.bf16 %v1689_v4, %v1688_v10  ;;  %v125_v18 = vunpack.c.1.s8 %v6937_v27  ;;  %v280_v17 = vshra.s32 %v6941_v22, 3 }
  0x9f   :  { %9303 = vst [vmem:[#allocation62_spill] sm:$0xff] %v6943_v46  ;;  %v281_v24 = vshra.s32 %v6943_v46, 3  ;;  %v1562_v61 = vshra.s32 %v6941_v22, 2  ;;  %v1563_v45 = vshra.s32 %v6943_v46, 2  ;;  %v6955_v42 = vadd.s32 8, %v122_v50 }
  0xa0   :  { %5555 = vmatmul.mubr.bf16.gmra.mrb[36].mxu0 %v6919_v44  ;;  %5715 = vmatmul.mubr.bf16.gmra.mrb[36].mxu1 %v6921_v7  ;;  %9304 = vst [vmem:[#allocation63_spill] sm:$0xff] %v6945_v20  ;;  %9305 = vst [vmem:[#allocation64_spill] sm:$0xff] %v6947_v21  ;;  %v6957_v63 = vadd.s32 8, %v123_v6  ;;  %v6959_v19 = vadd.s32 8, %v124_v32  ;;  %v6961_v0 = vadd.s32 8, %v125_v18  ;;  %v344_v40 = vand.u32 1, %v280_v17 }
  0xa1   :  { %5558 = vmatprep.mubr.bf16.mxu0 %v6933_v1  ;;  %5718 = vmatprep.mubr.bf16.mxu1 %v6935_v26  ;;  %9306 = vst [vmem:[#allocation65_spill] sm:$0xff] %v6955_v42  ;;  %v345_v10 = vand.u32 1, %v281_v24  ;;  %v1626_v4 = vand.u32 1, %v1562_v61  ;;  %v1627_v16 = vand.u32 1, %v1563_v45  ;;  %v282_v15 = vshra.s32 %v6955_v42, 3 }
  0xa2   :  { %9307 = vst [vmem:[#allocation66_spill] sm:$0xff] %v6957_v63  ;;  %9308 = vst [vmem:[#allocation67_spill] sm:$0xff] %v6959_v19  ;;  %v283_v26 = vshra.s32 %v6957_v63, 3  ;;  %v1564_v22 = vshra.s32 %v6955_v42, 2  ;;  %v1565_v46 = vshra.s32 %v6957_v63, 2  ;;  %v408_v50 = vcvt.s32.f32 %v344_v40 }
  0xa3   :  { %9309 = vst [vmem:[#allocation68_spill] sm:$0xff] %v6961_v0  ;;  %v409_v6 = vcvt.s32.f32 %v345_v10  ;;  %v1690_v32 = vcvt.s32.f32 %v1626_v4  ;;  %v1691_v18 = vcvt.s32.f32 %v1627_v16  ;;  %v346_v17 = vand.u32 1, %v282_v15 }
  0xa4   :  { %v347_v24 = vand.u32 1, %v283_v26  ;;  %v1628_v61 = vand.u32 1, %v1564_v22  ;;  %v1629_v45 = vand.u32 1, %v1565_v46  ;;  %v284_v42 = vshra.s32 %v6959_v19, 3  ;;  %v73_v46 = vld [vmem:[#allocation2 + $0x68] sm:$0xff] }
  0xa5   :  { %v6969_v1 = vpack.c.bf16 %v409_v6, %v408_v50  ;;  %v6971_v7 = vpack.c.bf16 %v1691_v18, %v1690_v32  ;;  %v285_v63 = vshra.s32 %v6961_v0, 3  ;;  %v410_v44 = vcvt.s32.f32 %v346_v17 }
  0xa6   :  { %v1692_v41 = vcvt.s32.f32 %v1628_v61  ;;  %v348_v15 = vand.u32 1, %v284_v42  ;;  %v1566_v26 = vshra.s32 %v6959_v19, 2  ;;  %v1567_v22 = vshra.s32 %v6961_v0, 2 }
  0xa7   :  { %9310 = vst [vmem:[#allocation69_spill] sm:$0xff] %v6971_v7  ;;  %v349_v16 = vand.u32 1, %v285_v63  ;;  %v126_v4 = vunpack.c.2.s8 %v6937_v27  ;;  %v127_v50 = vunpack.c.3.s8 %v6937_v27  ;;  %v128_v63 = vunpack.c.0.s8 %v73_v46 }
  0xa8   :  { %5559 = vmatmul.mubr.bf16.gmra.mrb[40].mxu0 %v6945_v20  ;;  %5719 = vmatmul.mubr.bf16.gmra.mrb[40].mxu1 %v6947_v21  ;;  %v411_v20 = vcvt.s32.f32 %v347_v24  ;;  %v1693_v21 = vcvt.s32.f32 %v1629_v45  ;;  %v412_v6 = vcvt.s32.f32 %v348_v15  ;;  %v1630_v18 = vand.u32 1, %v1566_v26 }
  0xa9   :  { %5562 = vmatprep.mubr.bf16.mxu0 %v6969_v1  ;;  %5722 = vmatprep.mubr.bf16.mxu1 %v6971_v7  ;;  %v413_v32 = vcvt.s32.f32 %v349_v16  ;;  %v1631_v17 = vand.u32 1, %v1567_v22  ;;  %v6985_v24 = vadd.s32 8, %v126_v4  ;;  %v6987_v42 = vadd.s32 8, %v127_v50 }
  0xaa   :  { %v6979_v40 = vpack.c.bf16 %v411_v20, %v410_v44  ;;  %v6981_v10 = vpack.c.bf16 %v1693_v21, %v1692_v41  ;;  %v129_v61 = vunpack.c.1.s8 %v73_v46  ;;  %v1694_v44 = vcvt.s32.f32 %v1630_v18 }
  0xab   :  { %9313 = vst [vmem:[#allocation72_spill] sm:$0xff] %v6985_v24  ;;  %9314 = vst [vmem:[#allocation73_spill] sm:$0xff] %v6987_v42  ;;  %v6991_v41 = vpack.c.bf16 %v413_v32, %v412_v6  ;;  %v1695_v20 = vcvt.s32.f32 %v1631_v17  ;;  %v130_v21 = vunpack.c.2.s8 %v73_v46  ;;  %v286_v27 = vshra.s32 %v6985_v24, 3 }
  0xac   :  { %9311 = vst [vmem:[#allocation70_spill] sm:$0xff] %v6979_v40  ;;  %9312 = vst [vmem:[#allocation71_spill] sm:$0xff] %v6981_v10  ;;  %v287_v45 = vshra.s32 %v6987_v42, 3  ;;  %v1568_v15 = vshra.s32 %v6985_v24, 2  ;;  %v1569_v16 = vshra.s32 %v6987_v42, 2  ;;  %v7000_v22 = vadd.s32 8, %v128_v63 }
  0xad   :  { %9315 = vst [vmem:[#allocation74_spill] sm:$0xff] %v6991_v41  ;;  %v6998_v26 = vpack.c.bf16 %v1695_v20, %v1694_v44  ;;  %v7002_v4 = vadd.s32 8, %v129_v61  ;;  %v131_v50 = vunpack.c.3.s8 %v73_v46  ;;  %v350_v6 = vand.u32 1, %v286_v27 }
  0xae   :  { %9317 = vst [vmem:[#allocation76_spill] sm:$0xff] %v7000_v22  ;;  %v351_v32 = vand.u32 1, %v287_v45  ;;  %v1632_v18 = vand.u32 1, %v1568_v15  ;;  %v1633_v17 = vand.u32 1, %v1569_v16  ;;  %v288_v0 = vshra.s32 %v7000_v22, 3 }
  0xaf   :  { %9316 = vst [vmem:[#allocation75_spill] sm:$0xff] %v6998_v26  ;;  %9318 = vst [vmem:[#allocation77_spill] sm:$0xff] %v7002_v4  ;;  %v289_v24 = vshra.s32 %v7002_v4, 3  ;;  %v1570_v42 = vshra.s32 %v7000_v22, 2  ;;  %v1571_v44 = vshra.s32 %v7002_v4, 2  ;;  %v414_v20 = vcvt.s32.f32 %v350_v6 }
  0xb0   :  { %5563 = vmatmul.mubr.bf16.gmra.mrb[44].mxu0 %v6979_v40  ;;  %5723 = vmatmul.mubr.bf16.gmra.mrb[44].mxu1 %v6981_v10  ;;  %v415_v63 = vcvt.s32.f32 %v351_v32  ;;  %v1696_v19 = vcvt.s32.f32 %v1632_v18  ;;  %v1697_v61 = vcvt.s32.f32 %v1633_v17  ;;  %v7015_v10 = vadd.s32 8, %v131_v50  ;;  %v74_v40 = vld [vmem:[#allocation2 + $0x70] sm:$0xff] }
  0xb1   :  { %5566 = vmatprep.mubr.bf16.mxu0 %v6991_v41  ;;  %5726 = vmatprep.mubr.bf16.mxu1 %v6998_v26  ;;  %v352_v41 = vand.u32 1, %v288_v0  ;;  %v353_v46 = vand.u32 1, %v289_v24  ;;  %v1634_v27 = vand.u32 1, %v1570_v42  ;;  %v1635_v45 = vand.u32 1, %v1571_v44 }
  0xb2   :  { %v7009_v15 = vpack.c.bf16 %v415_v63, %v414_v20  ;;  %v7011_v16 = vpack.c.bf16 %v1697_v61, %v1696_v19  ;;  %v7013_v26 = vadd.s32 8, %v130_v21  ;;  %9322 = vst [vmem:[#allocation81_spill] sm:$0xff] %v7015_v10  ;;  %v291_v24 = vshra.s32 %v7015_v10, 3 }
  0xb3   :  { %v416_v22 = vcvt.s32.f32 %v352_v41  ;;  %v417_v7 = vcvt.s32.f32 %v353_v46  ;;  %v1698_v4 = vcvt.s32.f32 %v1634_v27  ;;  %v1699_v6 = vcvt.s32.f32 %v1635_v45 }
  0xb4   :  { %9319 = vst [vmem:[#allocation78_spill] sm:$0xff] %v7009_v15  ;;  %9320 = vst [vmem:[#allocation79_spill] sm:$0xff] %v7011_v16  ;;  %v290_v0 = vshra.s32 %v7013_v26, 3  ;;  %v1572_v19 = vshra.s32 %v7013_v26, 2  ;;  %v1573_v42 = vshra.s32 %v7015_v10, 2  ;;  %v132_v41 = vunpack.c.0.s8 %v74_v40 }
  0xb5   :  { %9321 = vst [vmem:[#allocation80_spill] sm:$0xff] %v7013_v26  ;;  %v7023_v21 = vpack.c.bf16 %v417_v7, %v416_v22  ;;  %v7025_v50 = vpack.c.bf16 %v1699_v6, %v1698_v4  ;;  %v133_v32 = vunpack.c.1.s8 %v74_v40  ;;  %v355_v17 = vand.u32 1, %v291_v24 }
  0xb6   :  { %v354_v18 = vand.u32 1, %v290_v0  ;;  %v1636_v44 = vand.u32 1, %v1572_v19  ;;  %v1637_v20 = vand.u32 1, %v1573_v42  ;;  %v7029_v63 = vadd.s32 8, %v132_v41 }
  0xb7   :  { %9323 = vst [vmem:[#allocation82_spill] sm:$0xff] %v7023_v21  ;;  %9324 = vst [vmem:[#allocation83_spill] sm:$0xff] %v7025_v50  ;;  %v7031_v61 = vadd.s32 8, %v133_v32  ;;  %v134_v46 = vunpack.c.2.s8 %v74_v40  ;;  %v135_v27 = vunpack.c.3.s8 %v74_v40  ;;  %v419_v22 = vcvt.s32.f32 %v355_v17 }
  0xb8   :  { %5567 = vmatmul.mubr.bf16.gmra.mrb[48].mxu0 %v7009_v15  ;;  %5727 = vmatmul.mubr.bf16.gmra.mrb[48].mxu1 %v7011_v16  ;;  %9325 = vst [vmem:[#allocation84_spill] sm:$0xff] %v7029_v63  ;;  %v418_v7 = vcvt.s32.f32 %v354_v18  ;;  %v1700_v4 = vcvt.s32.f32 %v1636_v44  ;;  %v1701_v45 = vcvt.s32.f32 %v1637_v20  ;;  %v292_v6 = vshra.s32 %v7029_v63, 3 }
  0xb9   :  { %5570 = vmatprep.mubr.bf16.mxu0 %v7023_v21  ;;  %5730 = vmatprep.mubr.bf16.mxu1 %v7025_v50  ;;  %9326 = vst [vmem:[#allocation85_spill] sm:$0xff] %v7031_v61  ;;  %v293_v0 = vshra.s32 %v7031_v61, 3  ;;  %v1574_v24 = vshra.s32 %v7029_v63, 2  ;;  %v1575_v19 = vshra.s32 %v7031_v61, 2  ;;  %v7041_v32 = vadd.s32 8, %v134_v46  ;;  %v75_v46 = vld [vmem:[#allocation2 + $0x78] sm:$0xff] }
  0xba   :  { %v7037_v42 = vpack.c.bf16 %v419_v22, %v418_v7  ;;  %v7039_v41 = vpack.c.bf16 %v1701_v45, %v1700_v4  ;;  %v7043_v10 = vadd.s32 8, %v135_v27  ;;  %v356_v40 = vand.u32 1, %v292_v6 }
  0xbb   :  { %9329 = vst [vmem:[#allocation88_spill] sm:$0xff] %v7041_v32  ;;  %v357_v18 = vand.u32 1, %v293_v0  ;;  %v1638_v17 = vand.u32 1, %v1574_v24  ;;  %v1639_v44 = vand.u32 1, %v1575_v19  ;;  %v294_v20 = vshra.s32 %v7041_v32, 3 }
  0xbc   :  { %9327 = vst [vmem:[#allocation86_spill] sm:$0xff] %v7037_v42  ;;  %9328 = vst [vmem:[#allocation87_spill] sm:$0xff] %v7039_v41  ;;  %v295_v61 = vshra.s32 %v7043_v10, 3  ;;  %v1576_v7 = vshra.s32 %v7041_v32, 2  ;;  %v1577_v22 = vshra.s32 %v7043_v10, 2  ;;  %v420_v4 = vcvt.s32.f32 %v356_v40 }
  0xbd   :  { %9330 = vst [vmem:[#allocation89_spill] sm:$0xff] %v7043_v10  ;;  %v421_v27 = vcvt.s32.f32 %v357_v18  ;;  %v1702_v45 = vcvt.s32.f32 %v1638_v17  ;;  %v1703_v6 = vcvt.s32.f32 %v1639_v44  ;;  %v358_v0 = vand.u32 1, %v294_v20 }
  0xbe   :  { %v359_v24 = vand.u32 1, %v295_v61  ;;  %v1640_v19 = vand.u32 1, %v1576_v7  ;;  %v1641_v63 = vand.u32 1, %v1577_v22  ;;  %v137_v50 = vunpack.c.1.s8 %v75_v46 }
  0xbf   :  { %v7051_v26 = vpack.c.bf16 %v421_v27, %v420_v4  ;;  %v422_v21 = vcvt.s32.f32 %v358_v0  ;;  %v138_v61 = vunpack.c.2.s8 %v75_v46  ;;  %v139_v17 = vunpack.c.3.s8 %v75_v46 }
  0xc0   :  { %5571 = vmatmul.mubr.bf16.gmra.mrb[52].mxu0 %v7037_v42  ;;  %5731 = vmatmul.mubr.bf16.gmra.mrb[52].mxu1 %v7039_v41  ;;  %v7053_v41 = vpack.c.bf16 %v1703_v6, %v1702_v45  ;;  %v136_v42 = vunpack.c.0.s8 %v75_v46  ;;  %v423_v16 = vcvt.s32.f32 %v359_v24  ;;  %v1704_v32 = vcvt.s32.f32 %v1640_v19 }
  0xc1   :  { %v1705_v15 = vcvt.s32.f32 %v1641_v63  ;;  %5574 = vmatprep.mubr.bf16.mxu0 %v7051_v26  ;;  %v7059_v18 = vadd.s32 8, %v137_v50  ;;  %v7071_v50 = vadd.s32 8, %v138_v61 }
  0xc2   :  { %5734 = vmatprep.mubr.bf16.mxu1 %v7053_v41  ;;  %v7057_v40 = vadd.s32 8, %v136_v42  ;;  %v7061_v44 = vpack.c.bf16 %v423_v16, %v422_v21  ;;  %v7073_v42 = vadd.s32 8, %v139_v17 }
  0xc3   :  { %9332 = vst [vmem:[#allocation91_spill] sm:$0xff] %v7059_v18  ;;  %v7063_v20 = vpack.c.bf16 %v1705_v15, %v1704_v32  ;;  %v297_v22 = vshra.s32 %v7059_v18, 3  ;;  %v1579_v4 = vshra.s32 %v7059_v18, 2  ;;  %v298_v46 = vshra.s32 %v7071_v50, 3 }
  0xc4   :  { %9331 = vst [vmem:[#allocation90_spill] sm:$0xff] %v7057_v40  ;;  %9333 = vst [vmem:[#allocation92_spill] sm:$0xff] %v7061_v44  ;;  %v296_v7 = vshra.s32 %v7057_v40, 3  ;;  %v1578_v63 = vshra.s32 %v7057_v40, 2  ;;  %v299_v27 = vshra.s32 %v7073_v42, 3  ;;  %v1580_v45 = vshra.s32 %v7071_v50, 2 }
  0xc5   :  { %9334 = vst [vmem:[#allocation93_spill] sm:$0xff] %v7063_v20  ;;  %v361_v21 = vand.u32 1, %v297_v22  ;;  %v1643_v32 = vand.u32 1, %v1579_v4  ;;  %v1581_v6 = vshra.s32 %v7073_v42, 2  ;;  %v362_v61 = vand.u32 1, %v298_v46  ;;  %v9360_v46 = vld [vmem:[#allocation17_spill] sm:$0xff] }
  0xc6   :  { %v360_v16 = vand.u32 1, %v296_v7  ;;  %v1642_v15 = vand.u32 1, %v1578_v63  ;;  %v363_v40 = vand.u32 1, %v299_v27  ;;  %v1644_v17 = vand.u32 1, %v1580_v45 }
  0xc7   :  { %v425_v24 = vcvt.s32.f32 %v361_v21  ;;  %v1707_v18 = vcvt.s32.f32 %v1643_v32  ;;  %v1645_v10 = vand.u32 1, %v1581_v6  ;;  %v426_v63 = vcvt.s32.f32 %v362_v61 }
  0xc8   :  { %5575 = vmatmul.mubr.bf16.gmra.mrb[56].mxu0 %v7061_v44  ;;  %5735 = vmatmul.mubr.bf16.gmra.mrb[56].mxu1 %v7063_v20  ;;  %v424_v0 = vcvt.s32.f32 %v360_v16  ;;  %v1706_v19 = vcvt.s32.f32 %v1642_v15  ;;  %v427_v4 = vcvt.s32.f32 %v363_v40  ;;  %v1708_v20 = vcvt.s32.f32 %v1644_v17  ;;  %v6423_v40 = vld [vmem:[#allocation7 + $0x8] sm:$0xff]   ;;  %v9359_v15 = vld [vmem:[#allocation16_spill] sm:$0xff] }
  0xc9   :  { %v1709_v44 = vcvt.s32.f32 %v1645_v10  ;;  %v6422_v10 = vld [vmem:[#allocation7] sm:$0xff]   ;;  %v2708_v32 = vshra.s32 %v9359_v15, 1  ;;  %v2709_v27 = vshra.s32 %v9360_v46, 1 }
  0xca   :  { %v7079_v7 = vpack.c.bf16 %v425_v24, %v424_v0  ;;  %v7081_v22 = vpack.c.bf16 %v1707_v18, %v1706_v19  ;;  %v7085_v16 = vpack.c.bf16 %v427_v4, %v426_v63  ;;  %v6424_v18 = vld [vmem:[#allocation7 + $0x10] sm:$0xff]   ;;  %v3895_v63 = vand.u32 1, %v9360_v46 }
  0xcb   :  { %v7087_v21 = vpack.c.bf16 %v1709_v44, %v1708_v20  ;;  %v2772_v17 = vand.u32 1, %v2708_v32  ;;  %v9361_v4 = vld [vmem:[#allocation18_spill] sm:$0xff] }
  0xcc   :  { %5578 = vmatprep.mubr.bf16.mxu0 %v7079_v7  ;;  %5738 = vmatprep.mubr.bf16.mxu1 %v7081_v22  ;;  %v9369_v32 = vld [vmem:[#allocation26_spill] sm:$0xff] }
  0xcd   :  { %v2718_v46 = vshra.s32 %v9369_v32, 1 }
  0xd0   :  { %5579 = vmatmul.mubr.bf16.gmra.mrb[60].mxu0 %v7085_v16  ;;  %5739 = vmatmul.mubr.bf16.gmra.mrb[60].mxu1 %v7087_v21 }
  0xd1   :  { %5598 = vmatprep.mubr.bf16.mxu0 %v6641_v48  ;;  %5758 = vmatprep.mubr.bf16.mxu1 %v6643_v49  ;;  %v6425_v48 = vld [vmem:[#allocation7 + $0x18] sm:$0xff]   ;;  %v6426_v49 = vld [vmem:[#allocation7 + $0x20] sm:$0xff]  }
  0xd8   :  { %5599 = vmatmul.mubr.bf16.vlgmr.msra.gmra.mrb[0].mxu0 %v6647_v53  ;;  %5759 = vmatmul.mubr.bf16.vlgmr.msra.gmra.mrb[0].mxu1 %v6649_v54  ;;  %v6427_v53 = vld [vmem:[#allocation7 + $0x28] sm:$0xff]   ;;  %v6428_v54 = vld [vmem:[#allocation7 + $0x30] sm:$0xff]  }
  0xd9   :  { %5823 = vmatpush3.bf16.msra.mxu0 %v6422_v10  ;;  %5983 = vmatpush3.bf16.msra.mxu1 %v6422_v10  ;;  %v2710_v10 = vshra.s32 %v9361_v4, 1 }
  0xda   :  { %5602 = vmatprep.mubr.bf16.mxu0 %v6659_v12  ;;  %5762 = vmatprep.mubr.bf16.mxu1 %v6663_v25  ;;  %v6429_v12 = vld [vmem:[#allocation7 + $0x38] sm:$0xff]   ;;  %v7109_v25 = vld [vmem:[#allocation5] sm:$0xff]  }
  0xdb   :  { %5824 = vmatprep.subr.bf16.mxu0 %v6423_v40  ;;  %5984 = vmatprep.subr.bf16.mxu1 %v6423_v40 }
  0xdd   :  { %5825 = vmatpush3.bf16.msra.mxu0 %v6423_v40  ;;  %5985 = vmatpush3.bf16.msra.mxu1 %v6423_v40  ;;  %v9362_v40 = vld [vmem:[#allocation19_spill] sm:$0xff] }
  0xde   :  { %5826 = vmatprep.subr.bf16.mxu0 %v6424_v18  ;;  %5986 = vmatprep.subr.bf16.mxu1 %v6424_v18 }
  0xe0   :  { %5603 = vmatmul.mubr.bf16.gmra.mrb[4].mxu0 %v6665_v29  ;;  %5763 = vmatmul.mubr.bf16.gmra.mrb[4].mxu1 %v6669_v34  ;;  %v9335_v29 = vld [vmem:[#allocation52_spill] sm:$0xff]  ;;  %v9336_v34 = vld [vmem:[#allocation55_spill] sm:$0xff] }
  0xe1   :  { %5606 = vmatprep.mubr.bf16.mxu0 %v6697_v8  ;;  %5766 = vmatprep.mubr.bf16.mxu1 %v6699_v9  ;;  %v9337_v8 = vld [vmem:[#allocation56_spill] sm:$0xff]  ;;  %v9338_v9 = vld [vmem:[#allocation59_spill] sm:$0xff] }
  0xe2   :  { %5827 = vmatpush3.bf16.msra.mxu0 %v6424_v18  ;;  %5987 = vmatpush3.bf16.msra.mxu1 %v6424_v18  ;;  %v2711_v18 = vshra.s32 %v9362_v40, 1 }
  0xe3   :  { %5828 = vmatprep.subr.bf16.mxu0 %v6425_v48  ;;  %5988 = vmatprep.subr.bf16.mxu1 %v6425_v48 }
  0xe6   :  { %5829 = vmatpush3.bf16.msra.mxu0 %v6425_v48  ;;  %5989 = vmatpush3.bf16.msra.mxu1 %v6425_v48 }
  0xe7   :  { %5830 = vmatprep.subr.bf16.mxu0 %v6426_v49  ;;  %5990 = vmatprep.subr.bf16.mxu1 %v6426_v49 }
  0xe8   :  { %5607 = vmatmul.mubr.bf16.gmra.mrb[8].mxu0 %v6703_v23  ;;  %5767 = vmatmul.mubr.bf16.gmra.mrb[8].mxu1 %v6706_v31  ;;  %v9339_v23 = vld [vmem:[#allocation60_spill] sm:$0xff]  ;;  %v9340_v31 = vld [vmem:[#allocation63_spill] sm:$0xff] }
  0xe9   :  { %5610 = vmatprep.mubr.bf16.mxu0 %v6717_v51  ;;  %5770 = vmatprep.mubr.bf16.mxu1 %v6734_v2  ;;  %v9344_v51 = vld [vmem:[#allocation71_spill] sm:$0xff]  ;;  %v9345_v2 = vld [vmem:[#allocation74_spill] sm:$0xff] }
  0xea   :  { %5831 = vmatpush3.bf16.msra.mxu0 %v6426_v49  ;;  %5991 = vmatpush3.bf16.msra.mxu1 %v6426_v49 }
  0xeb   :  { %5832 = vmatprep.subr.bf16.mxu0 %v6427_v53  ;;  %5992 = vmatprep.subr.bf16.mxu1 %v6427_v53 }
  0xee   :  { %5833 = vmatpush3.bf16.msra.mxu0 %v6427_v53  ;;  %5993 = vmatpush3.bf16.msra.mxu1 %v6427_v53 }
  0xef   :  { %5834 = vmatprep.subr.bf16.mxu0 %v6428_v54  ;;  %5994 = vmatprep.subr.bf16.mxu1 %v6428_v54 }
  0xf0   :  { %5611 = vmatmul.mubr.bf16.gmra.mrb[12].mxu0 %v6738_v43  ;;  %5771 = vmatmul.mubr.bf16.gmra.mrb[12].mxu1 %v6743_v57  ;;  %v9346_v43 = vld [vmem:[#allocation75_spill] sm:$0xff]  ;;  %v9347_v57 = vld [vmem:[#allocation78_spill] sm:$0xff] }
  0xf1   :  { %5614 = vmatprep.mubr.bf16.mxu0 %v6753_v56  ;;  %5774 = vmatprep.mubr.bf16.mxu1 %v6755_v3  ;;  %v9348_v56 = vld [vmem:[#allocation79_spill] sm:$0xff]  ;;  %v9349_v3 = vld [vmem:[#allocation82_spill] sm:$0xff] }
  0xf2   :  { %5835 = vmatpush3.bf16.msra.mxu0 %v6428_v54  ;;  %5995 = vmatpush3.bf16.msra.mxu1 %v6428_v54 }
  0xf3   :  { %5836 = vmatprep.subr.bf16.mxu0 %v6429_v12  ;;  %5996 = vmatprep.subr.bf16.mxu1 %v6429_v12 }
  0xf6   :  { %5837 = vmatpush3.bf16.msra.mxu0 %v6429_v12  ;;  %5997 = vmatpush3.bf16.msra.mxu1 %v6429_v12  ;;  %v9363_v12 = vld [vmem:[#allocation20_spill] sm:$0xff] }
  0xf7   :  { %5902 = vmatprep.subr.bf16.mxu0 %v7109_v25  ;;  %6062 = vmatprep.subr.bf16.mxu1 %v7109_v25 }
  0xf8   :  { %5615 = vmatmul.mubr.bf16.gmra.mrb[16].mxu0 %v6773_v28  ;;  %5775 = vmatmul.mubr.bf16.gmra.mrb[16].mxu1 %v6775_v5  ;;  %v9350_v28 = vld [vmem:[#allocation83_spill] sm:$0xff]  ;;  %v9351_v5 = vld [vmem:[#allocation86_spill] sm:$0xff] }
  0xf9   :  { %5618 = vmatprep.mubr.bf16.mxu0 %v6783_v14  ;;  %5778 = vmatprep.mubr.bf16.mxu1 %v6785_v60  ;;  %v9352_v14 = vld [vmem:[#allocation87_spill] sm:$0xff]  ;;  %v9353_v60 = vld [vmem:[#allocation12_spill] sm:$0xff] }
 0x100   :  { %5619 = vmatmul.mubr.bf16.gmra.mrb[20].mxu0 %v6791_v37  ;;  %5779 = vmatmul.mubr.bf16.gmra.mrb[20].mxu1 %v6796_v38  ;;  %v2704_v37 = vshra.s32 %v9353_v60, 1  ;;  %v9354_v38 = vld [vmem:[#allocation13_spill] sm:$0xff] }
 0x101   :  { %5622 = vmatprep.mubr.bf16.mxu0 %v6813_v33  ;;  %5782 = vmatprep.mubr.bf16.mxu1 %v6819_v47  ;;  %v9341_v47 = vld [vmem:[#allocation64_spill] sm:$0xff]  ;;  %v2705_v33 = vshra.s32 %v9354_v38, 1 }
 0x108   :  { %5623 = vmatmul.mubr.bf16.gmra.mrb[24].mxu0 %v6825_v39  ;;  %5783 = vmatmul.mubr.bf16.gmra.mrb[24].mxu1 %v6830_v13  ;;  %v2768_v39 = vand.u32 1, %v2704_v37  ;;  %v2769_v13 = vand.u32 1, %v2705_v33 }
 0x109   :  { %5626 = vmatprep.mubr.bf16.mxu0 %v6850_v11  ;;  %5786 = vmatprep.mubr.bf16.mxu1 %v6852_v36  ;;  %v3891_v11 = vand.u32 1, %v9354_v38  ;;  %v9355_v36 = vld [vmem:[#allocation92_spill] sm:$0xff] }
 0x10b   :  { %v3955_v20 = vcvt.s32.f32 %v3891_v11 }
 0x110   :  { %5627 = vmatmul.mubr.bf16.gmra.mrb[28].mxu0 %v6861_v58  ;;  %5787 = vmatmul.mubr.bf16.gmra.mrb[28].mxu1 %v6865_v52  ;;  %v9356_v58 = vld [vmem:[#allocation93_spill] sm:$0xff]  ;;  %v9357_v52 = vld [vmem:[#allocation14_spill] sm:$0xff] }
 0x111   :  { %5630 = vmatprep.mubr.bf16.mxu0 %v6871_v62  ;;  %5790 = vmatprep.mubr.bf16.mxu1 %v6877_v59  ;;  %v3890_v62 = vand.u32 1, %v9353_v60  ;;  %v2706_v59 = vshra.s32 %v9357_v52, 1  ;;  %v3892_v0 = vand.u32 1, %v9357_v52 }
 0x113   :  { %v3954_v44 = vcvt.s32.f32 %v3890_v62  ;;  %v2770_v45 = vand.u32 1, %v2706_v59  ;;  %v3956_v53 = vcvt.s32.f32 %v3892_v0  ;;  %v9368_v59 = vld [vmem:[#allocation25_spill] sm:$0xff] }
 0x115   :  { %v7169_v61 = vpack.c.bf16 %v3955_v20, %v3954_v44  ;;  %v2834_v48 = vcvt.s32.f32 %v2770_v45 }
 0x118   :  { %5631 = vmatmul.mubr.bf16.gmra.mrb[32].mxu0 %v6891_v35  ;;  %5791 = vmatmul.mubr.bf16.gmra.mrb[32].mxu1 %v6893_v30  ;;  %v9342_v35 = vld [vmem:[#allocation69_spill] sm:$0xff]  ;;  %v9343_v30 = vld [vmem:[#allocation70_spill] sm:$0xff] }
 0x119   :  { %5634 = vmatprep.mubr.bf16.mxu0 %v6903_v55  ;;  %5794 = vmatprep.mubr.bf16.mxu1 %v9335_v29  ;;  %v9358_v55 = vld [vmem:[#allocation15_spill] sm:$0xff]  ;;  %v2712_v29 = vshra.s32 %v9363_v12, 1 }
 0x11a   :  { %v3893_v24 = vand.u32 1, %v9358_v55 }
 0x11c   :  { %v3957_v54 = vcvt.s32.f32 %v3893_v24 }
 0x120   :  { %5635 = vmatmul.mubr.bf16.gmra.mrb[36].mxu0 %v9336_v34  ;;  %5795 = vmatmul.mubr.bf16.gmra.mrb[36].mxu1 %v9337_v8  ;;  %v9364_v34 = vld [vmem:[#allocation21_spill] sm:$0xff] }
 0x121   :  { %5638 = vmatprep.mubr.bf16.mxu0 %v9338_v9  ;;  %5798 = vmatprep.mubr.bf16.mxu1 %v9339_v23  ;;  %v2713_v8 = vshra.s32 %v9364_v34, 1  ;;  %v2836_v9 = vcvt.s32.f32 %v2772_v17  ;;  %v3899_v60 = vand.u32 1, %v9364_v34  ;;  %v9372_v34 = vld [vmem:[#allocation29_spill] sm:$0xff] }
 0x123   :  { %v3963_v44 = vcvt.s32.f32 %v3899_v60 }
 0x128   :  { %5639 = vmatmul.mubr.bf16.gmra.mrb[40].mxu0 %v9340_v31  ;;  %5799 = vmatmul.mubr.bf16.gmra.mrb[40].mxu1 %v9341_v47  ;;  %v3959_v47 = vcvt.s32.f32 %v3895_v63 }
 0x129   :  { %5642 = vmatprep.mubr.bf16.mxu0 %v6969_v1  ;;  %5802 = vmatprep.mubr.bf16.mxu1 %v9342_v35  ;;  %v2707_v1 = vshra.s32 %v9358_v55, 1  ;;  %v2774_v35 = vand.u32 1, %v2710_v10  ;;  %v2717_v55 = vshra.s32 %v9368_v59, 1 }
 0x12b   :  { %v2771_v6 = vand.u32 1, %v2707_v1  ;;  %v2838_v33 = vcvt.s32.f32 %v2774_v35 }
 0x12d   :  { %v2835_v49 = vcvt.s32.f32 %v2771_v6 }
 0x130   :  { %5643 = vmatmul.mubr.bf16.gmra.mrb[44].mxu0 %v9343_v30  ;;  %5803 = vmatmul.mubr.bf16.gmra.mrb[44].mxu1 %v9344_v51  ;;  %v3897_v30 = vand.u32 1, %v9362_v40  ;;  %v7183_v51 = vpack.c.bf16 %v2835_v49, %v2834_v48  ;;  %v3903_v40 = vand.u32 1, %v9368_v59  ;;  %v2782_v49 = vand.u32 1, %v2718_v46  ;;  %v9382_v46 = vld [vmem:[#allocation35_spill] sm:$0xff] }
 0x131   :  { %5646 = vmatprep.mubr.bf16.mxu0 %v9345_v2  ;;  %5806 = vmatprep.mubr.bf16.mxu1 %v9346_v43  ;;  %v7185_v2 = vpack.c.bf16 %v3957_v54, %v3956_v53  ;;  %v9365_v43 = vld [vmem:[#allocation22_spill] sm:$0xff] }
 0x132   :  { %v3961_v62 = vcvt.s32.f32 %v3897_v30  ;;  %v3900_v20 = vand.u32 1, %v9365_v43  ;;  %v6432_v54 = vld [vmem:[#allocation5 + $0x10] sm:$0xff]  }
 0x138   :  { %5647 = vmatmul.mubr.bf16.gmra.mrb[48].mxu0 %v9347_v57  ;;  %5807 = vmatmul.mubr.bf16.gmra.mrb[48].mxu1 %v9348_v56  ;;  %v2714_v57 = vshra.s32 %v9365_v43, 1  ;;  %v9366_v56 = vld [vmem:[#allocation23_spill] sm:$0xff] }
 0x139   :  { %5650 = vmatprep.mubr.bf16.mxu0 %v9349_v3  ;;  %5810 = vmatprep.mubr.bf16.mxu1 %v9350_v28  ;;  %v2715_v3 = vshra.s32 %v9366_v56, 1  ;;  %v2776_v28 = vand.u32 1, %v2712_v29  ;;  %v9374_v43 = vld [vmem:[#allocation31_spill] sm:$0xff] }
 0x13a   :  { %v2778_v11 = vand.u32 1, %v2714_v57  ;;  %v2723_v57 = vshra.s32 %v9374_v43, 1 }
 0x13b   :  { %v2840_v1 = vcvt.s32.f32 %v2776_v28  ;;  %v2846_v28 = vcvt.s32.f32 %v2782_v49 }
 0x13c   :  { %v2842_v24 = vcvt.s32.f32 %v2778_v11 }
 0x140   :  { %5651 = vmatmul.mubr.bf16.gmra.mrb[52].mxu0 %v9351_v5  ;;  %5811 = vmatmul.mubr.bf16.gmra.mrb[52].mxu1 %v9352_v14  ;;  %v2777_v5 = vand.u32 1, %v2713_v8  ;;  %v3898_v14 = vand.u32 1, %v9363_v12  ;;  %v9371_v12 = vld [vmem:[#allocation28_spill] sm:$0xff]  ;;  %v2721_v8 = vshra.s32 %v9372_v34, 1 }
 0x141   :  { %5654 = vmatprep.mubr.bf16.mxu0 %v7051_v26  ;;  %5814 = vmatprep.mubr.bf16.mxu1 %v7053_v41  ;;  %v2832_v26 = vcvt.s32.f32 %v2768_v39  ;;  %v2833_v41 = vcvt.s32.f32 %v2769_v13  ;;  %v2720_v29 = vshra.s32 %v9371_v12, 1 }
 0x142   :  { %v2785_v60 = vand.u32 1, %v2721_v8 }
 0x143   :  { %v7167_v19 = vpack.c.bf16 %v2833_v41, %v2832_v26  ;;  %v2841_v26 = vcvt.s32.f32 %v2777_v5  ;;  %v3962_v41 = vcvt.s32.f32 %v3898_v14  ;;  %v2784_v14 = vand.u32 1, %v2720_v29 }
 0x145   :  { %v7211_v63 = vpack.c.bf16 %v2841_v26, %v2840_v1 }
 0x148   :  { %5655 = vmatmul.mubr.bf16.gmra.mrb[56].mxu0 %v9355_v36  ;;  %5815 = vmatmul.mubr.bf16.gmra.mrb[56].mxu1 %v9356_v58  ;;  %v2779_v36 = vand.u32 1, %v2715_v3  ;;  %v9367_v58 = vld [vmem:[#allocation24_spill] sm:$0xff] }
 0x149   :  { %5658 = vmatprep.mubr.bf16.mxu0 %v7079_v7  ;;  %5818 = vmatprep.mubr.bf16.mxu1 %v7081_v22  ;;  %v2773_v7 = vand.u32 1, %v2709_v27  ;;  %v3894_v22 = vand.u32 1, %v9359_v15  ;;  %v2716_v52 = vshra.s32 %v9367_v58, 1  ;;  %v3901_v15 = vand.u32 1, %v9366_v56  ;;  %v9370_v27 = vld [vmem:[#allocation27_spill] sm:$0xff] }
 0x14a   :  { %v2719_v45 = vshra.s32 %v9370_v27, 1  ;;  %v2843_v17 = vcvt.s32.f32 %v2779_v36  ;;  %v3902_v10 = vand.u32 1, %v9367_v58  ;;  %v9377_v36 = vld [vmem:[#allocation32_spill] sm:$0xff] }
 0x14b   :  { %v2837_v23 = vcvt.s32.f32 %v2773_v7  ;;  %v3958_v31 = vcvt.s32.f32 %v3894_v22  ;;  %v2780_v7 = vand.u32 1, %v2716_v52  ;;  %v2781_v22 = vand.u32 1, %v2717_v55  ;;  %v9378_v52 = vld [vmem:[#allocation33_spill] sm:$0xff] }
 0x14c   :  { %v3965_v48 = vcvt.s32.f32 %v3901_v15  ;;  %v2783_v53 = vand.u32 1, %v2719_v45  ;;  %v3966_v35 = vcvt.s32.f32 %v3902_v10  ;;  %v7227_v56 = vpack.c.bf16 %v2843_v17, %v2842_v24  ;;  %v9381_v15 = vld [vmem:[#allocation34_spill] sm:$0xff] }
 0x14d   :  { %v7191_v37 = vpack.c.bf16 %v2837_v23, %v2836_v9  ;;  %v7193_v38 = vpack.c.bf16 %v3959_v47, %v3958_v31  ;;  %v2844_v9 = vcvt.s32.f32 %v2780_v7  ;;  %v2845_v23 = vcvt.s32.f32 %v2781_v22  ;;  %v6434_v7 = vld [vmem:[#allocation5 + $0x20] sm:$0xff]  }
 0x14e   :  { %v3904_v31 = vand.u32 1, %v9369_v32  ;;  %v3905_v47 = vand.u32 1, %v9370_v27  ;;  %9375 = vst [vmem:[#allocation52_spill] sm:$0xff] %v7227_v56  ;;  %v2847_v5 = vcvt.s32.f32 %v2783_v53  ;;  %v2724_v58 = vshra.s32 %v9377_v36, 1 }
 0x14f   :  { %v2725_v59 = vshra.s32 %v9378_v52, 1  ;;  %v7235_v55 = vpack.c.bf16 %v2845_v23, %v2844_v9  ;;  %v2726_v32 = vshra.s32 %v9381_v15, 1  ;;  %v2727_v27 = vshra.s32 %v9382_v46, 1 }
 0x150   :  { %5659 = vmatmul.mubr.bf16.gmra.mrb[60].mxu0 %v7085_v16  ;;  %5819 = vmatmul.mubr.bf16.gmra.mrb[60].mxu1 %v7087_v21  ;;  %v2775_v16 = vand.u32 1, %v2711_v18  ;;  %v3896_v21 = vand.u32 1, %v9361_v4  ;;  %v7213_v4 = vpack.c.bf16 %v3963_v44, %v3962_v41  ;;  %v3964_v18 = vcvt.s32.f32 %v3900_v20 }
 0x151   :  { %5838 = vmatprep.mubr.bf16.mxu0 %v7167_v19  ;;  %5998 = vmatprep.mubr.bf16.mxu1 %v7169_v61  ;;  %v3969_v11 = vcvt.s32.f32 %v3905_v47  ;;  %9379 = vst [vmem:[#allocation56_spill] sm:$0xff] %v7235_v55  ;;  %v2787_v41 = vand.u32 1, %v2723_v57  ;;  %v3909_v20 = vand.u32 1, %v9374_v43  ;;  %v2848_v45 = vcvt.s32.f32 %v2784_v14 }
 0x152   :  { %v2839_v39 = vcvt.s32.f32 %v2775_v16  ;;  %v3960_v13 = vcvt.s32.f32 %v3896_v21  ;;  %v3967_v16 = vcvt.s32.f32 %v3903_v40  ;;  %v9373_v21 = vld [vmem:[#allocation30_spill] sm:$0xff]  ;;  %v7229_v3 = vpack.c.bf16 %v3965_v48, %v3964_v18 }
 0x153   :  { %v2722_v30 = vshra.s32 %v9373_v21, 1  ;;  %v3908_v44 = vand.u32 1, %v9373_v21  ;;  %v7245_v22 = vpack.c.bf16 %v2847_v5, %v2846_v28  ;;  %v2788_v40 = vand.u32 1, %v2724_v58  ;;  %v6435_v21 = vld [vmem:[#allocation5 + $0x28] sm:$0xff]  }
 0x154   :  { %v7207_v6 = vpack.c.bf16 %v2839_v39, %v2838_v33  ;;  %v7209_v0 = vpack.c.bf16 %v3961_v62, %v3960_v13  ;;  %9376 = vst [vmem:[#allocation55_spill] sm:$0xff] %v7229_v3  ;;  %v3906_v33 = vand.u32 1, %v9371_v12  ;;  %v3907_v39 = vand.u32 1, %v9372_v34  ;;  %v6433_v13 = vld [vmem:[#allocation5 + $0x18] sm:$0xff]  }
 0x155   :  { %v3968_v62 = vcvt.s32.f32 %v3904_v31  ;;  %v7237_v1 = vpack.c.bf16 %v3967_v16, %v3966_v35  ;;  %v2786_v26 = vand.u32 1, %v2722_v30  ;;  %9383 = vst [vmem:[#allocation60_spill] sm:$0xff] %v7245_v22  ;;  %v2789_v18 = vand.u32 1, %v2725_v59  ;;  %v9387_v31 = vld [vmem:[#allocation36_spill] sm:$0xff]  ;;  %v9388_v35 = vld [vmem:[#allocation37_spill] sm:$0xff] }
 0x156   :  { %v3970_v24 = vcvt.s32.f32 %v3906_v33  ;;  %v3971_v17 = vcvt.s32.f32 %v3907_v39  ;;  %v2851_v49 = vcvt.s32.f32 %v2787_v41  ;;  %v3910_v53 = vand.u32 1, %v9377_v36  ;;  %v9390_v39 = vld [vmem:[#allocation39_spill] sm:$0xff] }
 0x157   :  { %9380 = vst [vmem:[#allocation59_spill] sm:$0xff] %v7237_v1  ;;  %v7247_v10 = vpack.c.bf16 %v3969_v11, %v3968_v62  ;;  %v2850_v48 = vcvt.s32.f32 %v2786_v26  ;;  %v3972_v12 = vcvt.s32.f32 %v3908_v44  ;;  %v3973_v29 = vcvt.s32.f32 %v3909_v20  ;;  %v6436_v44 = vld [vmem:[#allocation5 + $0x30] sm:$0xff]  }
 0x158   :  { %5839 = vmatmul.mubr.bf16.vlgmr.msra.gmra.mrb[64].mxu0 %v7183_v51  ;;  %5999 = vmatmul.mubr.bf16.vlgmr.msra.gmra.mrb[64].mxu1 %v7185_v2  ;;  %v2790_v34 = vand.u32 1, %v2726_v32  ;;  %v2791_v8 = vand.u32 1, %v2727_v27  ;;  %v7255_v23 = vpack.c.bf16 %v3971_v17, %v3970_v24  ;;  %v2728_v47 = vshra.s32 %v9387_v31, 1  ;;  %v9393_v32 = vld [vmem:[#allocation40_spill] sm:$0xff]  ;;  %v9394_v27 = vld [vmem:[#allocation41_spill] sm:$0xff] }
 0x159   :  { %5903 = vmatpush3.bf16.msra.mxu0 %v7109_v25  ;;  %6063 = vmatpush3.bf16.msra.mxu1 %v7109_v25  ;;  %v6431_v25 = vld [vmem:[#allocation5 + $0x8] sm:$0xff]   ;;  %9384 = vst [vmem:[#allocation63_spill] sm:$0xff] %v7247_v10  ;;  %v2729_v16 = vshra.s32 %v9388_v35, 1  ;;  %v2852_v30 = vcvt.s32.f32 %v2788_v40  ;;  %v2853_v43 = vcvt.s32.f32 %v2789_v18  ;;  %v3912_v57 = vand.u32 1, %v9381_v15 }
 0x15a   :  { %5842 = vmatprep.mubr.bf16.mxu0 %v7191_v37  ;;  %6002 = vmatprep.mubr.bf16.mxu1 %v7193_v38  ;;  %9386 = vst [vmem:[#allocation69_spill] sm:$0xff] %v7255_v23  ;;  %v3913_v28 = vand.u32 1, %v9382_v46  ;;  %v3974_v5 = vcvt.s32.f32 %v3910_v53  ;;  %v7263_v62 = vpack.c.bf16 %v2851_v49, %v2850_v48  ;;  %v7265_v11 = vpack.c.bf16 %v3973_v29, %v3972_v12  ;;  %v9397_v48 = vld [vmem:[#allocation42_spill] sm:$0xff]  ;;  %v9398_v53 = vld [vmem:[#allocation43_spill] sm:$0xff] }
 0x15b   :  { %5904 = vmatprep.subr.bf16.mxu0 %v6431_v25  ;;  %6064 = vmatprep.subr.bf16.mxu1 %v6431_v25  ;;  %v2854_v36 = vcvt.s32.f32 %v2790_v34  ;;  %v2855_v58 = vcvt.s32.f32 %v2791_v8  ;;  %v2793_v59 = vand.u32 1, %v2729_v16  ;;  %v3914_v26 = vand.u32 1, %v9387_v31  ;;  %v6437_v31 = vld [vmem:[#allocation5 + $0x38] sm:$0xff]  }
 0x15c   :  { %9391 = vst [vmem:[#allocation70_spill] sm:$0xff] %v7263_v62  ;;  %9392 = vst [vmem:[#allocation71_spill] sm:$0xff] %v7265_v11  ;;  %v3915_v41 = vand.u32 1, %v9388_v35  ;;  %v3976_v20 = vcvt.s32.f32 %v3912_v57  ;;  %v3977_v15 = vcvt.s32.f32 %v3913_v28  ;;  %v2732_v46 = vshra.s32 %v9393_v32, 1 }
 0x15d   :  { %5905 = vmatpush3.bf16.msra.mxu0 %v6431_v25  ;;  %6065 = vmatpush3.bf16.msra.mxu1 %v6431_v25  ;;  %v2849_v25 = vcvt.s32.f32 %v2785_v60  ;;  %v9389_v60 = vld [vmem:[#allocation38_spill] sm:$0xff]  ;;  %v3917_v18 = vand.u32 1, %v9390_v39  ;;  %v2734_v49 = vshra.s32 %v9397_v48, 1  ;;  %v2857_v29 = vcvt.s32.f32 %v2793_v59 }
 0x15e   :  { %5906 = vmatprep.subr.bf16.mxu0 %v6432_v54  ;;  %6066 = vmatprep.subr.bf16.mxu1 %v6432_v54  ;;  %v2730_v33 = vshra.s32 %v9389_v60, 1  ;;  %v3916_v40 = vand.u32 1, %v9389_v60  ;;  %v3978_v34 = vcvt.s32.f32 %v3914_v26  ;;  %v3979_v8 = vcvt.s32.f32 %v3915_v41 }
 0x15f   :  { %v7253_v9 = vpack.c.bf16 %v2849_v25, %v2848_v45  ;;  %v2733_v45 = vshra.s32 %v9394_v27, 1  ;;  %v7275_v25 = vpack.c.bf16 %v2853_v43, %v2852_v30  ;;  %v7285_v35 = vpack.c.bf16 %v3977_v15, %v3976_v20 }
 0x160   :  { %5843 = vmatmul.mubr.bf16.gmra.mrb[68].mxu0 %v7207_v6  ;;  %6003 = vmatmul.mubr.bf16.gmra.mrb[68].mxu1 %v7209_v0  ;;  %v2794_v17 = vand.u32 1, %v2730_v33  ;;  %v2796_v16 = vand.u32 1, %v2732_v46  ;;  %v3918_v57 = vand.u32 1, %v9393_v32  ;;  %v3919_v28 = vand.u32 1, %v9394_v27  ;;  %v9405_v46 = vld [vmem:[#allocation46_spill] sm:$0xff] }
 0x161   :  { %5846 = vmatprep.mubr.bf16.mxu0 %v7211_v63  ;;  %6006 = vmatprep.mubr.bf16.mxu1 %v7213_v4  ;;  %9385 = vst [vmem:[#allocation64_spill] sm:$0xff] %v7253_v9  ;;  %9395 = vst [vmem:[#allocation74_spill] sm:$0xff] %v7275_v25  ;;  %v2798_v60 = vand.u32 1, %v2734_v49  ;;  %v3921_v20 = vand.u32 1, %v9398_v53  ;;  %v2738_v27 = vshra.s32 %v9405_v46, 1 }
 0x162   :  { %5907 = vmatpush3.bf16.msra.mxu0 %v6432_v54  ;;  %6067 = vmatpush3.bf16.msra.mxu1 %v6432_v54  ;;  %v3911_v54 = vand.u32 1, %v9378_v52  ;;  %v2792_v52 = vand.u32 1, %v2728_v47  ;;  %v7283_v47 = vpack.c.bf16 %v2855_v58, %v2854_v36  ;;  %9400 = vst [vmem:[#allocation79_spill] sm:$0xff] %v7285_v35  ;;  %v2858_v30 = vcvt.s32.f32 %v2794_v17  ;;  %v9403_v36 = vld [vmem:[#allocation44_spill] sm:$0xff] }
 0x163   :  { %5908 = vmatprep.subr.bf16.mxu0 %v6433_v13  ;;  %6068 = vmatprep.subr.bf16.mxu1 %v6433_v13  ;;  %v2736_v58 = vshra.s32 %v9403_v36, 1  ;;  %v2860_v26 = vcvt.s32.f32 %v2796_v16  ;;  %v3982_v15 = vcvt.s32.f32 %v3918_v57  ;;  %v3983_v32 = vcvt.s32.f32 %v3919_v28  ;;  %v9410_v16 = vld [vmem:[#allocation49_spill] sm:$0xff] }
 0x164   :  { %v3975_v14 = vcvt.s32.f32 %v3911_v54  ;;  %v2735_v54 = vshra.s32 %v9398_v53, 1  ;;  %v2856_v12 = vcvt.s32.f32 %v2792_v52  ;;  %9399 = vst [vmem:[#allocation78_spill] sm:$0xff] %v7283_v47  ;;  %v9404_v52 = vld [vmem:[#allocation45_spill] sm:$0xff]  ;;  %v3922_v53 = vand.u32 1, %v9403_v36  ;;  %v9414_v36 = vld [vmem:[#allocation51_spill] sm:$0xff] }
 0x165   :  { %v2737_v59 = vshra.s32 %v9404_v52, 1 }
 0x166   :  { %5909 = vmatpush3.bf16.msra.mxu0 %v6433_v13  ;;  %6069 = vmatpush3.bf16.msra.mxu1 %v6433_v13  ;;  %v2731_v13 = vshra.s32 %v9390_v39, 1  ;;  %v7277_v24 = vpack.c.bf16 %v3975_v14, %v3974_v5  ;;  %v3980_v5 = vcvt.s32.f32 %v3916_v40  ;;  %v3981_v14 = vcvt.s32.f32 %v3917_v18 }
 0x167   :  { %5910 = vmatprep.subr.bf16.mxu0 %v6434_v7  ;;  %6070 = vmatprep.subr.bf16.mxu1 %v6434_v7  ;;  %v2799_v33 = vand.u32 1, %v2735_v54  ;;  %v7289_v39 = vpack.c.bf16 %v2857_v29, %v2856_v12  ;;  %v2862_v18 = vcvt.s32.f32 %v2798_v60  ;;  %v2800_v54 = vand.u32 1, %v2736_v58  ;;  %v9413_v60 = vld [vmem:[#allocation50_spill] sm:$0xff] }
 0x168   :  { %5847 = vmatmul.mubr.bf16.gmra.mrb[72].mxu0 %v7227_v56  ;;  %6007 = vmatmul.mubr.bf16.gmra.mrb[72].mxu1 %v7229_v3  ;;  %9396 = vst [vmem:[#allocation75_spill] sm:$0xff] %v7277_v24  ;;  %v7305_v40 = vpack.c.bf16 %v3981_v14, %v3980_v5  ;;  %v3923_v12 = vand.u32 1, %v9404_v52  ;;  %v3924_v5 = vand.u32 1, %v9405_v46  ;;  %v2743_v58 = vshra.s32 %v9414_v36, 1 }
 0x169   :  { %5850 = vmatprep.mubr.bf16.mxu0 %v7235_v55  ;;  %6010 = vmatprep.mubr.bf16.mxu1 %v7237_v1  ;;  %9401 = vst [vmem:[#allocation82_spill] sm:$0xff] %v7289_v39  ;;  %v2863_v49 = vcvt.s32.f32 %v2799_v33  ;;  %v2742_v33 = vshra.s32 %v9413_v60, 1  ;;  %v2864_v52 = vcvt.s32.f32 %v2800_v54 }
 0x16a   :  { %5911 = vmatpush3.bf16.msra.mxu0 %v6434_v7  ;;  %6071 = vmatpush3.bf16.msra.mxu1 %v6434_v7  ;;  %v2795_v7 = vand.u32 1, %v2731_v13  ;;  %v7291_v13 = vpack.c.bf16 %v3979_v8, %v3978_v34  ;;  %9408 = vst [vmem:[#allocation87_spill] sm:$0xff] %v7305_v40  ;;  %v3985_v34 = vcvt.s32.f32 %v3921_v20  ;;  %v9409_v8 = vld [vmem:[#allocation48_spill] sm:$0xff]  ;;  %v3987_v20 = vcvt.s32.f32 %v3923_v12 }
 0x16b   :  { %5912 = vmatprep.subr.bf16.mxu0 %v6435_v21  ;;  %6072 = vmatprep.subr.bf16.mxu1 %v6435_v21  ;;  %v3988_v54 = vcvt.s32.f32 %v3924_v5  ;;  %v2807_v12 = vand.u32 1, %v2743_v58  ;;  %v9421_v5 = vld [vmem:[#allocation57_spill] sm:$0xff] }
 0x16c   :  { %v2859_v43 = vcvt.s32.f32 %v2795_v7  ;;  %9402 = vst [vmem:[#allocation83_spill] sm:$0xff] %v7291_v13 }
 0x16e   :  { %5913 = vmatpush3.bf16.msra.mxu0 %v6435_v21  ;;  %6073 = vmatpush3.bf16.msra.mxu1 %v6435_v21  ;;  %v2797_v21 = vand.u32 1, %v2733_v45  ;;  %v9406_v45 = vld [vmem:[#allocation47_spill] sm:$0xff]  ;;  %v7303_v7 = vpack.c.bf16 %v2859_v43, %v2858_v30  ;;  %v7313_v30 = vpack.c.bf16 %v3983_v32, %v3982_v15  ;;  %v2802_v43 = vand.u32 1, %v2738_v27 }
 0x16f   :  { %5914 = vmatprep.subr.bf16.mxu0 %v6436_v44  ;;  %6074 = vmatprep.subr.bf16.mxu1 %v6436_v44  ;;  %v2739_v17 = vshra.s32 %v9406_v45, 1  ;;  %v3925_v14 = vand.u32 1, %v9406_v45  ;;  %v3926_v45 = vand.u32 1, %v9409_v8 }
 0x170   :  { %5851 = vmatmul.mubr.bf16.gmra.mrb[76].mxu0 %v7245_v22  ;;  %6011 = vmatmul.mubr.bf16.gmra.mrb[76].mxu1 %v7247_v10  ;;  %v2861_v41 = vcvt.s32.f32 %v2797_v21  ;;  %9407 = vst [vmem:[#allocation86_spill] sm:$0xff] %v7303_v7  ;;  %v2741_v21 = vshra.s32 %v9410_v16, 1  ;;  %9412 = vst [vmem:[#allocation13_spill] sm:$0xff] %v7313_v30  ;;  %v2866_v46 = vcvt.s32.f32 %v2802_v43  ;;  %v3928_v43 = vand.u32 1, %v9413_v60 }
 0x171   :  { %5854 = vmatprep.mubr.bf16.mxu0 %v7253_v9  ;;  %6014 = vmatprep.mubr.bf16.mxu1 %v7255_v23  ;;  %v2803_v28 = vand.u32 1, %v2739_v17  ;;  %v3927_v17 = vand.u32 1, %v9410_v16 }
 0x172   :  { %5915 = vmatpush3.bf16.msra.mxu0 %v6436_v44  ;;  %6075 = vmatpush3.bf16.msra.mxu1 %v6436_v44  ;;  %v3920_v44 = vand.u32 1, %v9397_v48  ;;  %v2801_v48 = vand.u32 1, %v2737_v59  ;;  %v7311_v57 = vpack.c.bf16 %v2861_v41, %v2860_v26  ;;  %v7321_v26 = vpack.c.bf16 %v2863_v49, %v2862_v18 }
 0x173   :  { %5916 = vmatprep.subr.bf16.mxu0 %v6437_v31  ;;  %6076 = vmatprep.subr.bf16.mxu1 %v6437_v31  ;;  %v2805_v32 = vand.u32 1, %v2741_v21  ;;  %v2867_v27 = vcvt.s32.f32 %v2803_v28  ;;  %v3990_v28 = vcvt.s32.f32 %v3926_v45  ;;  %v3991_v16 = vcvt.s32.f32 %v3927_v17  ;;  %v9425_v45 = vld [vmem:[#allocation61_spill] sm:$0xff] }
 0x174   :  { %v3984_v29 = vcvt.s32.f32 %v3920_v44  ;;  %9411 = vst [vmem:[#allocation12_spill] sm:$0xff] %v7311_v57  ;;  %v2865_v59 = vcvt.s32.f32 %v2801_v48  ;;  %v3986_v44 = vcvt.s32.f32 %v3922_v53  ;;  %9415 = vst [vmem:[#allocation92_spill] sm:$0xff] %v7321_v26  ;;  %v3989_v48 = vcvt.s32.f32 %v3925_v14 }
 0x175   :  { %v2806_v53 = vand.u32 1, %v2742_v33  ;;  %v2746_v14 = vshra.s32 %v9421_v5, 1  ;;  %v9422_v33 = vld [vmem:[#allocation58_spill] sm:$0xff]  ;;  %v2748_v17 = vshra.s32 %v9425_v45, 1 }
 0x176   :  { %5917 = vmatpush3.bf16.msra.mxu0 %v6437_v31  ;;  %6077 = vmatpush3.bf16.msra.mxu1 %v6437_v31  ;;  %v2740_v31 = vshra.s32 %v9409_v8, 1  ;;  %v7323_v41 = vpack.c.bf16 %v3985_v34, %v3984_v29  ;;  %v7329_v18 = vpack.c.bf16 %v2865_v59, %v2864_v52  ;;  %v7331_v49 = vpack.c.bf16 %v3987_v20, %v3986_v44  ;;  %v9419_v29 = vld [vmem:[#allocation53_spill] sm:$0xff] }
 0x177   :  { %v2744_v34 = vshra.s32 %v9419_v29, 1  ;;  %v3929_v8 = vand.u32 1, %v9414_v36  ;;  %v2747_v58 = vshra.s32 %v9422_v33, 1  ;;  %v7339_v52 = vpack.c.bf16 %v2867_v27, %v2866_v46  ;;  %v9426_v46 = vld [vmem:[#allocation62_spill] sm:$0xff] }
 0x178   :  { %5855 = vmatmul.mubr.bf16.gmra.mrb[80].mxu0 %v7263_v62  ;;  %6015 = vmatmul.mubr.bf16.gmra.mrb[80].mxu1 %v7265_v11  ;;  %9416 = vst [vmem:[#allocation93_spill] sm:$0xff] %v7323_v41  ;;  %v2804_v15 = vand.u32 1, %v2740_v31  ;;  %9417 = vst [vmem:[#allocation14_spill] sm:$0xff] %v7329_v18  ;;  %v9420_v31 = vld [vmem:[#allocation54_spill] sm:$0xff]  ;;  %v7341_v59 = vpack.c.bf16 %v3989_v48, %v3988_v54  ;;  %v2870_v44 = vcvt.s32.f32 %v2806_v53  ;;  %v2871_v20 = vcvt.s32.f32 %v2807_v12 }
 0x179   :  { %5858 = vmatprep.mubr.bf16.mxu0 %v7275_v25  ;;  %6018 = vmatprep.mubr.bf16.mxu1 %v7277_v24  ;;  %9418 = vst [vmem:[#allocation15_spill] sm:$0xff] %v7331_v49  ;;  %v2745_v21 = vshra.s32 %v9420_v31, 1  ;;  %9423 = vst [vmem:[#allocation16_spill] sm:$0xff] %v7339_v52  ;;  %v3931_v60 = vand.u32 1, %v9420_v31  ;;  %v3992_v36 = vcvt.s32.f32 %v3928_v43  ;;  %v2749_v27 = vshra.s32 %v9426_v46, 1  ;;  %v9429_v31 = vld [vmem:[#allocation65_spill] sm:$0xff] }
 0x17a   :  { %9424 = vst [vmem:[#allocation17_spill] sm:$0xff] %v7341_v59  ;;  %v7353_v48 = vpack.c.bf16 %v3991_v16, %v3990_v28  ;;  %v2810_v53 = vand.u32 1, %v2746_v14  ;;  %v2811_v12 = vand.u32 1, %v2747_v58  ;;  %v9430_v43 = vld [vmem:[#allocation66_spill] sm:$0xff]  ;;  %v7359_v25 = vpack.c.bf16 %v2871_v20, %v2870_v44  ;;  %v9435_v44 = vld [vmem:[#allocation67_spill] sm:$0xff] }
 0x17b   :  { %v2813_v28 = vand.u32 1, %v2749_v27  ;;  %v2752_v20 = vshra.s32 %v9435_v44, 1 }
 0x17c   :  { %9428 = vst [vmem:[#allocation19_spill] sm:$0xff] %v7353_v48  ;;  %9431 = vst [vmem:[#allocation20_spill] sm:$0xff] %v7359_v25  ;;  %v2874_v16 = vcvt.s32.f32 %v2810_v53  ;;  %v2875_v14 = vcvt.s32.f32 %v2811_v12 }
 0x17e   :  { %v7379_v53 = vpack.c.bf16 %v2875_v14, %v2874_v16 }
 0x180   :  { %5859 = vmatmul.mubr.bf16.gmra.mrb[84].mxu0 %v7283_v47  ;;  %6019 = vmatmul.mubr.bf16.gmra.mrb[84].mxu1 %v7285_v35  ;;  %v2808_v35 = vand.u32 1, %v2744_v34  ;;  %v2809_v47 = vand.u32 1, %v2745_v21  ;;  %v3933_v34 = vand.u32 1, %v9422_v33  ;;  %v2750_v21 = vshra.s32 %v9429_v31, 1 }
 0x181   :  { %5862 = vmatprep.mubr.bf16.mxu0 %v7289_v39  ;;  %6022 = vmatprep.mubr.bf16.mxu1 %v7291_v13  ;;  %v2868_v39 = vcvt.s32.f32 %v2804_v15  ;;  %v2869_v13 = vcvt.s32.f32 %v2805_v32  ;;  %v3930_v15 = vand.u32 1, %v9419_v29  ;;  %v3993_v32 = vcvt.s32.f32 %v3929_v8 }
 0x182   :  { %v3932_v29 = vand.u32 1, %v9421_v5  ;;  %v2751_v8 = vshra.s32 %v9430_v43, 1  ;;  %v3934_v5 = vand.u32 1, %v9425_v45  ;;  %v3935_v33 = vand.u32 1, %v9426_v46  ;;  %v9438_v46 = vld [vmem:[#allocation73_spill] sm:$0xff] }
 0x183   :  { %v7351_v54 = vpack.c.bf16 %v2869_v13, %v2868_v39  ;;  %v3994_v24 = vcvt.s32.f32 %v3930_v15  ;;  %v7361_v39 = vpack.c.bf16 %v3993_v32, %v3992_v36  ;;  %v2812_v13 = vand.u32 1, %v2748_v17  ;;  %v9436_v15 = vld [vmem:[#allocation68_spill] sm:$0xff] }
 0x184   :  { %v3996_v58 = vcvt.s32.f32 %v3932_v29  ;;  %v2814_v11 = vand.u32 1, %v2750_v21  ;;  %v2815_v62 = vand.u32 1, %v2751_v8  ;;  %v2877_v32 = vcvt.s32.f32 %v2813_v28 }
 0x185   :  { %9427 = vst [vmem:[#allocation18_spill] sm:$0xff] %v7351_v54  ;;  %9432 = vst [vmem:[#allocation21_spill] sm:$0xff] %v7361_v39  ;;  %v2876_v36 = vcvt.s32.f32 %v2812_v13  ;;  %v3936_v45 = vand.u32 1, %v9429_v31  ;;  %v3937_v17 = vand.u32 1, %v9430_v43  ;;  %v2755_v27 = vshra.s32 %v9438_v46, 1 }
 0x186   :  { %v2878_v29 = vcvt.s32.f32 %v2814_v11  ;;  %v2816_v21 = vand.u32 1, %v2752_v20  ;;  %v3938_v43 = vand.u32 1, %v9435_v44  ;;  %v3939_v8 = vand.u32 1, %v9436_v15  ;;  %v9442_v20 = vld [vmem:[#allocation81_spill] sm:$0xff] }
 0x187   :  { %v4000_v13 = vcvt.s32.f32 %v3936_v45  ;;  %v4001_v28 = vcvt.s32.f32 %v3937_v17  ;;  %v7393_v11 = vand.u32 1, %v2755_v27  ;;  %v3941_v14 = vand.u32 1, %v9438_v46 }
 0x188   :  { %5863 = vmatmul.mubr.bf16.gmra.mrb[88].mxu0 %v7303_v7  ;;  %6023 = vmatmul.mubr.bf16.gmra.mrb[88].mxu1 %v7305_v40  ;;  %v2872_v40 = vcvt.s32.f32 %v2808_v35  ;;  %v2873_v7 = vcvt.s32.f32 %v2809_v47  ;;  %v4002_v17 = vcvt.s32.f32 %v3938_v43 }
 0x189   :  { %5866 = vmatprep.mubr.bf16.mxu0 %v7311_v57  ;;  %6026 = vmatprep.mubr.bf16.mxu1 %v7313_v30  ;;  %v3995_v57 = vcvt.s32.f32 %v3931_v60  ;;  %v3997_v30 = vcvt.s32.f32 %v3933_v34  ;;  %v2753_v60 = vshra.s32 %v9436_v15, 1  ;;  %v2879_v34 = vcvt.s32.f32 %v2815_v62 }
 0x18a   :  { %v7365_v35 = vpack.c.bf16 %v2873_v7, %v2872_v40  ;;  %v3999_v7 = vcvt.s32.f32 %v3935_v33  ;;  %v9437_v40 = vld [vmem:[#allocation72_spill] sm:$0xff]  ;;  %v2759_v15 = vshra.s32 %v9442_v20, 1 }
 0x18b   :  { %v7367_v47 = vpack.c.bf16 %v3995_v57, %v3994_v24  ;;  %v3998_v24 = vcvt.s32.f32 %v3934_v5  ;;  %v2754_v57 = vshra.s32 %v9437_v40, 1  ;;  %v7381_v12 = vpack.c.bf16 %v3997_v30, %v3996_v58  ;;  %v9439_v5 = vld [vmem:[#allocation76_spill] sm:$0xff] }
 0x18c   :  { %9433 = vst [vmem:[#allocation22_spill] sm:$0xff] %v7365_v35  ;;  %v2817_v31 = vand.u32 1, %v2753_v60  ;;  %v2756_v33 = vshra.s32 %v9439_v5, 1  ;;  %v3940_v62 = vand.u32 1, %v9437_v40  ;;  %v9441_v58 = vld [vmem:[#allocation80_spill] sm:$0xff]  ;;  %v2880_v60 = vcvt.s32.f32 %v2816_v21 }
 0x18d   :  { %9434 = vst [vmem:[#allocation23_spill] sm:$0xff] %v7367_v47  ;;  %v7389_v16 = vpack.c.bf16 %v3999_v7, %v3998_v24  ;;  %v7391_v30 = vand.u32 1, %v2754_v57  ;;  %v2758_v44 = vshra.s32 %v9441_v58, 1  ;;  %v3942_v46 = vand.u32 1, %v9439_v5 }
 0x18e   :  { %v2881_v45 = vcvt.s32.f32 %v2817_v31  ;;  %v7405_v24 = vand.u32 1, %v2756_v33  ;;  %v7419_v31 = vand.u32 1, %v2759_v15  ;;  %v9445_v15 = vld [vmem:[#allocation88_spill] sm:$0xff] }
 0x18f   :  { %v7417_v21 = vand.u32 1, %v2758_v44  ;;  %v4006_v44 = vcvt.s32.f32 %v3942_v46  ;;  %v2762_v40 = vshra.s32 %v9445_v15, 1  ;;  %v3948_v23 = vand.u32 1, %v9445_v15 }
 0x190   :  { %5867 = vmatmul.mubr.bf16.gmra.mrb[92].mxu0 %v7321_v26  ;;  %6027 = vmatmul.mubr.bf16.gmra.mrb[92].mxu1 %v7323_v41  ;;  %v7387_v41 = vpack.c.bf16 %v2877_v32, %v2876_v36  ;;  %v4003_v26 = vcvt.s32.f32 %v3939_v8  ;;  %v7401_v36 = vpack.c.bf16 %v2879_v34, %v2878_v29  ;;  %v7403_v32 = vpack.c.bf16 %v4001_v28, %v4000_v13 }
 0x191   :  { %5870 = vmatprep.mubr.bf16.mxu0 %v7329_v18  ;;  %6030 = vmatprep.mubr.bf16.mxu1 %v7331_v49  ;;  %v9440_v49 = vld [vmem:[#allocation77_spill] sm:$0xff]  ;;  %v7415_v29 = vcvt.s32.f32 %v3940_v62  ;;  %v4005_v34 = vcvt.s32.f32 %v3941_v14  ;;  %v3944_v8 = vand.u32 1, %v9441_v58  ;;  %v3945_v13 = vand.u32 1, %v9442_v20 }
 0x192   :  { %v2757_v18 = vshra.s32 %v9440_v49, 1  ;;  %v3943_v27 = vand.u32 1, %v9440_v49  ;;  %v7423_v43 = vpack.c.bf16 %v4003_v26, %v4002_v17  ;;  %v2884_v28 = vcvt.s32.f32 %v7405_v24  ;;  %v9443_v49 = vld [vmem:[#allocation84_spill] sm:$0xff]  ;;  %v9444_v62 = vld [vmem:[#allocation85_spill] sm:$0xff]  ;;  %v9447_v17 = vld [vmem:[#allocation90_spill] sm:$0xff] }
 0x193   :  { %v2760_v33 = vshra.s32 %v9443_v49, 1  ;;  %v2761_v14 = vshra.s32 %v9444_v62, 1  ;;  %v2886_v26 = vcvt.s32.f32 %v7417_v21  ;;  %v2887_v58 = vcvt.s32.f32 %v7419_v31 }
 0x194   :  { %v7407_v7 = vand.u32 1, %v2757_v18  ;;  %v7421_v18 = vpack.c.bf16 %v2881_v45, %v2880_v60  ;;  %v4007_v57 = vcvt.s32.f32 %v3943_v27  ;;  %v9446_v60 = vld [vmem:[#allocation89_spill] sm:$0xff]  ;;  %v2764_v20 = vshra.s32 %v9447_v17, 1 }
 0x195   :  { %v2763_v45 = vshra.s32 %v9446_v60, 1  ;;  %v2824_v46 = vand.u32 1, %v2760_v33  ;;  %v2825_v27 = vand.u32 1, %v2761_v14  ;;  %v3946_v21 = vand.u32 1, %v9443_v49 }
 0x196   :  { %v2885_v5 = vcvt.s32.f32 %v7407_v7  ;;  %v4009_v7 = vcvt.s32.f32 %v3945_v13  ;;  %v3947_v31 = vand.u32 1, %v9444_v62  ;;  %v3949_v9 = vand.u32 1, %v9446_v60 }
 0x197   :  { %v2827_v13 = vand.u32 1, %v2763_v45  ;;  %v2828_v10 = vand.u32 1, %v2764_v20  ;;  %v3952_v62 = vand.u32 1, %v7071_v50  ;;  %v2888_v22 = vcvt.s32.f32 %v2824_v46 }
 0x198   :  { %5871 = vmatmul.mubr.bf16.gmra.mrb[96].mxu0 %v7339_v52  ;;  %6031 = vmatmul.mubr.bf16.gmra.mrb[96].mxu1 %v7341_v59  ;;  %v2766_v59 = vshra.s32 %v7071_v50, 1  ;;  %v2767_v52 = vshra.s32 %v7073_v42, 1  ;;  %v4011_v45 = vcvt.s32.f32 %v3947_v31  ;;  %v4012_v55 = vcvt.s32.f32 %v3948_v23 }
 0x199   :  { %5874 = vmatprep.mubr.bf16.mxu0 %v7351_v54  ;;  %6034 = vmatprep.mubr.bf16.mxu1 %v7353_v48  ;;  %v9448_v48 = vld [vmem:[#allocation91_spill] sm:$0xff]  ;;  %v4008_v54 = vcvt.s32.f32 %v3944_v8  ;;  %v2826_v8 = vand.u32 1, %v2762_v40  ;;  %v4010_v40 = vcvt.s32.f32 %v3946_v21  ;;  %v2891_v15 = vcvt.s32.f32 %v2827_v13 }
 0x19a   :  { %v2765_v24 = vshra.s32 %v9448_v48, 1  ;;  %v3951_v33 = vand.u32 1, %v9448_v48  ;;  %v2830_v14 = vand.u32 1, %v2766_v59  ;;  %v2831_v49 = vand.u32 1, %v2767_v52 }
 0x19b   :  { %v2890_v1 = vcvt.s32.f32 %v2826_v8  ;;  %v4013_v60 = vcvt.s32.f32 %v3949_v9  ;;  %v2892_v20 = vcvt.s32.f32 %v2828_v10  ;;  %v4016_v59 = vcvt.s32.f32 %v3952_v62 }
 0x19c   :  { %v2894_v56 = vcvt.s32.f32 %v2830_v14  ;;  %v2895_v48 = vcvt.s32.f32 %v2831_v49  ;;  %v9449_v50 = vcvt.s32.f32 %v7391_v30  ;;  %v7460_v9 = vpack.c.bf16 %v4005_v34, %v7415_v29 }
 0x19d   :  { %v7462_v10 = vpack.c.bf16 %v2885_v5, %v2884_v28  ;;  %v7466_v23 = vpack.c.bf16 %v4007_v57, %v4006_v44  ;;  %v7474_v30 = vpack.c.bf16 %v4011_v45, %v4010_v40  ;;  %v7478_v29 = vpack.c.bf16 %v4013_v60, %v4012_v55 }
 0x19e   :  { %v7484_v57 = vpack.c.bf16 %v2895_v48, %v2894_v56 }
 0x19f   :  { %9451 = vst [vmem:[#allocation24_spill] sm:$0xff] %v7474_v30  ;;  %9453 = vst [vmem:[#allocation26_spill] sm:$0xff] %v7478_v29 }
 0x1a0   :  { %5875 = vmatmul.mubr.bf16.gmra.mrb[100].mxu0 %v7359_v25  ;;  %6035 = vmatmul.mubr.bf16.gmra.mrb[100].mxu1 %v7361_v39  ;;  %v2829_v25 = vand.u32 1, %v2765_v24  ;;  %v3950_v39 = vand.u32 1, %v9447_v17  ;;  %v4015_v17 = vcvt.s32.f32 %v3951_v33  ;;  %9456 = vst [vmem:[#allocation29_spill] sm:$0xff] %v7484_v57 }
 0x1a1   :  { %5878 = vmatprep.mubr.bf16.mxu0 %v7365_v35  ;;  %6038 = vmatprep.mubr.bf16.mxu1 %v7367_v47  ;;  %v3953_v35 = vand.u32 1, %v7073_v42  ;;  %v2889_v47 = vcvt.s32.f32 %v2825_v27  ;;  %v9450_v42 = vcvt.s32.f32 %v7393_v11  ;;  %v7476_v11 = vpack.c.bf16 %v2891_v15, %v2890_v1 }
 0x1a2   :  { %v2893_v24 = vcvt.s32.f32 %v2829_v25  ;;  %v4014_v3 = vcvt.s32.f32 %v3950_v39  ;;  %v7468_v25 = vpack.c.bf16 %v2887_v58, %v2886_v26  ;;  %v7470_v39 = vpack.c.bf16 %v4009_v7, %v4008_v54 }
 0x1a3   :  { %v4017_v52 = vcvt.s32.f32 %v3953_v35  ;;  %v7457_v46 = vpack.c.bf16 %v9450_v42, %v9449_v50  ;;  %v7472_v35 = vpack.c.bf16 %v2889_v47, %v2888_v22  ;;  %9452 = vst [vmem:[#allocation25_spill] sm:$0xff] %v7476_v11 }
 0x1a4   :  { %v7480_v5 = vpack.c.bf16 %v2893_v24, %v2892_v20  ;;  %v7482_v27 = vpack.c.bf16 %v4015_v17, %v4014_v3 }
 0x1a5   :  { %v7486_v44 = vpack.c.bf16 %v4017_v52, %v4016_v59 }
 0x1a6   :  { %9454 = vst [vmem:[#allocation27_spill] sm:$0xff] %v7480_v5  ;;  %9455 = vst [vmem:[#allocation28_spill] sm:$0xff] %v7482_v27 }
 0x1a7   :  { %9457 = vst [vmem:[#allocation30_spill] sm:$0xff] %v7486_v44 }
 0x1a8   :  { %5879 = vmatmul.mubr.bf16.gmra.mrb[104].mxu0 %v7379_v53  ;;  %6039 = vmatmul.mubr.bf16.gmra.mrb[104].mxu1 %v7381_v12 }
 0x1a9   :  { %5882 = vmatprep.mubr.bf16.mxu0 %v7387_v41  ;;  %6042 = vmatprep.mubr.bf16.mxu1 %v7389_v16 }
 0x1ab   :  { %v5600_v34 = vpop.f32.mrb[0].mxu0  ;;  %v5760_v28 = vpop.f32.mrb[0].mxu1 }
 0x1ac   :  { %vm1136_vm0 = vcmp.lt.f32.partialorder %v5600_v34, 0.0  ;;  %v1200_v54 = vceil.f32 %v5600_v34  ;;  %v1264_v22 = vfloor.f32 %v5600_v34  ;;  %vm2322_vm1 = vcmp.lt.f32.partialorder %v5760_v28, 0.0  ;;  %v879_v47 = vpop.f32.mrb[1].mxu0  ;;  %v2065_v26 = vpop.f32.mrb[1].mxu1 }
 0x1ad   :  { %v2386_v1 = vceil.f32 %v5760_v28  ;;  %v2450_v58 = vfloor.f32 %v5760_v28  ;;  %vm1134_vm2 = vcmp.lt.f32.partialorder %v879_v47, 0.0  ;;  %v1198_v55 = vceil.f32 %v879_v47  ;;  %v5601_v7 = vpop.f32.mrb[2].mxu0  ;;  %v5761_v21 = vpop.f32.mrb[2].mxu1 }
 0x1ae   :  { %v1328_v31 = vsel %vm1136_vm0, %v1200_v54, %v1264_v22  ;;  %v1262_v8 = vfloor.f32 %v879_v47  ;;  %vm2320_vm3 = vcmp.lt.f32.partialorder %v2065_v26, 0.0  ;;  %v2384_v3 = vceil.f32 %v2065_v26  ;;  %v882_v56 = vpop.f32.mrb[3].mxu0  ;;  %v2068_v13 = vpop.f32.mrb[3].mxu1 }
 0x1af   :  { %v1392_v33 = vmul.f32 16.0, %v1328_v31  ;;  %v2514_v14 = vsel %vm2322_vm1, %v2386_v1, %v2450_v58  ;;  %v2448_v49 = vfloor.f32 %v2065_v26  ;;  %vm1137_vm4 = vcmp.lt.f32.partialorder %v5601_v7, 0.0 }
 0x1b0   :  { %v2578_v62 = vmul.f32 8.0, %v2514_v14  ;;  %v1326_v40 = vsel %vm1134_vm2, %v1198_v55, %v1262_v8  ;;  %v1201_v45 = vceil.f32 %v5601_v7  ;;  %v1265_v15 = vfloor.f32 %v5601_v7  ;;  %5883 = vmatmul.mubr.bf16.gmra.mrb[108].mxu0 %v7401_v36  ;;  %6043 = vmatmul.mubr.bf16.gmra.mrb[108].mxu1 %v7403_v32 }
 0x1b1   :  { %v1390_v60 = vmul.f32 16.0, %v1326_v40  ;;  %v2512_v20 = vsel %vm2320_vm3, %v2384_v3, %v2448_v49  ;;  %vm2323_vm5 = vcmp.lt.f32.partialorder %v5761_v21, 0.0  ;;  %v2387_v24 = vceil.f32 %v5761_v21  ;;  %5886 = vmatprep.mubr.bf16.mxu0 %v7421_v18  ;;  %6046 = vmatprep.mubr.bf16.mxu1 %v7423_v43 }
 0x1b2   :  { %v7493_v17 = vadd.f32 %v2578_v62, %v1392_v33  ;;  %v2576_v48 = vmul.f32 8.0, %v2512_v20  ;;  %v1329_v59 = vsel %vm1137_vm4, %v1201_v45, %v1265_v15  ;;  %v2451_v52 = vfloor.f32 %v5761_v21 }
 0x1b3   :  { %v1393_v50 = vmul.f32 16.0, %v1329_v59  ;;  %vm1135_vm6 = vcmp.lt.f32.partialorder %v882_v56, 0.0  ;;  %v1199_v42 = vceil.f32 %v882_v56  ;;  %v1263_v34 = vfloor.f32 %v882_v56  ;;  %v5604_v28 = vpop.f32.mrb[4].mxu0  ;;  %v5764_v54 = vpop.f32.mrb[4].mxu1 }
 0x1b4   :  { %9458 = vst [vmem:[#allocation31_spill] sm:$0xff] %v7493_v17  ;;  %v7495_v22 = vadd.f32 %v2576_v48, %v1390_v60  ;;  %v2515_v47 = vsel %vm2323_vm5, %v2387_v24, %v2451_v52  ;;  %vm2321_vm7 = vcmp.lt.f32.partialorder %v2068_v13, 0.0  ;;  %v2385_v26 = vceil.f32 %v2068_v13  ;;  %v895_v1 = vpop.f32.mrb[5].mxu0  ;;  %v2081_v58 = vpop.f32.mrb[5].mxu1 }
 0x1b5   :  { %v2579_v55 = vmul.f32 8.0, %v2515_v47  ;;  %v1327_v7 = vsel %vm1135_vm6, %v1199_v42, %v1263_v34  ;;  %v2449_v31 = vfloor.f32 %v2068_v13  ;;  %vm1140_vm8 = vcmp.lt.f32.partialorder %v5604_v28, 0.0  ;;  %v5605_v8 = vpop.f32.mrb[6].mxu0  ;;  %v5765_v3 = vpop.f32.mrb[6].mxu1 }
 0x1b6   :  { %9459 = vst [vmem:[#allocation32_spill] sm:$0xff] %v7495_v22  ;;  %v1391_v21 = vmul.f32 16.0, %v1327_v7  ;;  %v1204_v33 = vceil.f32 %v5604_v28  ;;  %v1268_v14 = vfloor.f32 %v5604_v28  ;;  %vm2326_vm9 = vcmp.lt.f32.partialorder %v5764_v54, 0.0  ;;  %v898_v56 = vpop.f32.mrb[7].mxu0  ;;  %v7497_v49 = vpop.f32.mrb[7].mxu1 }
 0x1b7   :  { %v7499_v62 = vadd.f32 %v2579_v55, %v1393_v50  ;;  %v2513_v40 = vsel %vm2321_vm7, %v2385_v26, %v2449_v31  ;;  %v2390_v45 = vceil.f32 %v5764_v54  ;;  %v2454_v15 = vfloor.f32 %v5764_v54 }
 0x1b8   :  { %v2577_v60 = vmul.f32 8.0, %v2513_v40  ;;  %v1332_v20 = vsel %vm1140_vm8, %v1204_v33, %v1268_v14  ;;  %vm1138_vm10 = vcmp.lt.f32.partialorder %v895_v1, 0.0  ;;  %v1202_v24 = vceil.f32 %v895_v1  ;;  %5887 = vmatmul.mubr.bf16.gmra.mrb[112].mxu0 %v7457_v46  ;;  %6047 = vmatmul.mubr.bf16.gmra.mrb[112].mxu1 %v7460_v9 }
 0x1b9   :  { %9460 = vst [vmem:[#allocation33_spill] sm:$0xff] %v7499_v62  ;;  %v1396_v48 = vmul.f32 16.0, %v1332_v20  ;;  %v2518_v59 = vsel %vm2326_vm9, %v2390_v45, %v2454_v15  ;;  %v1266_v52 = vfloor.f32 %v895_v1  ;;  %vm2324_vm11 = vcmp.lt.f32.partialorder %v2081_v58, 0.0  ;;  %5890 = vmatprep.mubr.bf16.mxu0 %v7462_v10  ;;  %6050 = vmatprep.mubr.bf16.mxu1 %v7466_v23 }
 0x1ba   :  { %v7506_v13 = vadd.f32 %v2577_v60, %v1391_v21  ;;  %v2582_v50 = vmul.f32 8.0, %v2518_v59  ;;  %v2388_v42 = vceil.f32 %v2081_v58  ;;  %v2452_v34 = vfloor.f32 %v2081_v58 }
 0x1bb   :  { %v1330_v28 = vsel %vm1138_vm10, %v1202_v24, %v1266_v52  ;;  %vm1141_vm12 = vcmp.lt.f32.partialorder %v5605_v8, 0.0  ;;  %v1205_v54 = vceil.f32 %v5605_v8  ;;  %v1269_v47 = vfloor.f32 %v5605_v8  ;;  %v5608_v26 = vpop.f32.mrb[8].mxu0  ;;  %v5768_v55 = vpop.f32.mrb[8].mxu1 }
 0x1bc   :  { %9461 = vst [vmem:[#allocation34_spill] sm:$0xff] %v7506_v13  ;;  %v7508_v7 = vadd.f32 %v2582_v50, %v1396_v48  ;;  %v1394_v31 = vmul.f32 16.0, %v1330_v28  ;;  %v2516_v1 = vsel %vm2324_vm11, %v2388_v42, %v2452_v34  ;;  %vm2327_vm13 = vcmp.lt.f32.partialorder %v5765_v3, 0.0  ;;  %v911_v33 = vpop.f32.mrb[9].mxu0  ;;  %v2097_v14 = vpop.f32.mrb[9].mxu1 }
 0x1bd   :  { %v2580_v40 = vmul.f32 8.0, %v2516_v1  ;;  %v1333_v45 = vsel %vm1141_vm12, %v1205_v54, %v1269_v47  ;;  %v2391_v21 = vceil.f32 %v5765_v3  ;;  %v2455_v15 = vfloor.f32 %v5765_v3  ;;  %v5609_v60 = vpop.f32.mrb[10].mxu0  ;;  %v7510_v20 = vpop.f32.mrb[10].mxu1 }
 0x1be   :  { %9462 = vst [vmem:[#allocation35_spill] sm:$0xff] %v7508_v7  ;;  %v1397_v58 = vmul.f32 16.0, %v1333_v45  ;;  %vm1139_vm14 = vcmp.lt.f32.partialorder %v898_v56, 0.0  ;;  %v1203_v24 = vceil.f32 %v898_v56  ;;  %v1267_v8 = vfloor.f32 %v898_v56  ;;  %v7512_v59 = vpop.f32.mrb[11].mxu0  ;;  %v7514_v48 = vpop.f32.mrb[11].mxu1 }
 0x1bf   :  { %v7516_v52 = vadd.f32 %v2580_v40, %v1394_v31  ;;  %v2519_v50 = vsel %vm2327_vm13, %v2391_v21, %v2455_v15  ;;  %vm2325_vm15 = vcmp.lt.f32.partialorder %v7497_v49, 0.0  ;;  %v2389_v42 = vceil.f32 %v7497_v49 }
 0x1c0   :  { %v2583_v34 = vmul.f32 8.0, %v2519_v50  ;;  %v1331_v28 = vsel %vm1139_vm14, %v1203_v24, %v1267_v8  ;;  %v2453_v54 = vfloor.f32 %v7497_v49  ;;  %vm1144_vm0 = vcmp.lt.f32.partialorder %v5608_v26, 0.0  ;;  %5891 = vmatmul.mubr.bf16.gmra.mrb[116].mxu0 %v7468_v25  ;;  %6051 = vmatmul.mubr.bf16.gmra.mrb[116].mxu1 %v7470_v39 }
 0x1c1   :  { %9463 = vst [vmem:[#allocation36_spill] sm:$0xff] %v7516_v52  ;;  %v1395_v56 = vmul.f32 16.0, %v1331_v28  ;;  %v1208_v47 = vceil.f32 %v5608_v26  ;;  %v1272_v1 = vfloor.f32 %v5608_v26  ;;  %vm2330_vm1 = vcmp.lt.f32.partialorder %v5768_v55, 0.0  ;;  %5894 = vmatprep.mubr.bf16.mxu0 %v7472_v35  ;;  %6054 = vmatprep.mubr.bf16.mxu1 %v7474_v30 }
 0x1c2   :  { %v7526_v3 = vadd.f32 %v2583_v34, %v1397_v58  ;;  %v2517_v31 = vsel %vm2325_vm15, %v2389_v42, %v2453_v54  ;;  %v2394_v40 = vceil.f32 %v5768_v55  ;;  %v2458_v45 = vfloor.f32 %v5768_v55 }
 0x1c3   :  { %v2581_v21 = vmul.f32 8.0, %v2517_v31  ;;  %v1336_v49 = vsel %vm1144_vm0, %v1208_v47, %v1272_v1  ;;  %vm1142_vm2 = vcmp.lt.f32.partialorder %v911_v33, 0.0  ;;  %v1206_v15 = vceil.f32 %v911_v33  ;;  %v5612_v24 = vpop.f32.mrb[12].mxu0  ;;  %v7528_v8 = vpop.f32.mrb[12].mxu1 }
 0x1c4   :  { %9464 = vst [vmem:[#allocation37_spill] sm:$0xff] %v7526_v3  ;;  %v1400_v50 = vmul.f32 16.0, %v1336_v49  ;;  %v2522_v28 = vsel %vm2330_vm1, %v2394_v40, %v2458_v45  ;;  %v1270_v26 = vfloor.f32 %v911_v33  ;;  %vm2328_vm3 = vcmp.lt.f32.partialorder %v2097_v14, 0.0  ;;  %v7530_v52 = vpop.f32.mrb[13].mxu0  ;;  %v7532_v7 = vpop.f32.mrb[13].mxu1 }
 0x1c5   :  { %v7534_v58 = vadd.f32 %v2581_v21, %v1395_v56  ;;  %v2586_v42 = vmul.f32 8.0, %v2522_v28  ;;  %v2392_v34 = vceil.f32 %v2097_v14  ;;  %v2456_v55 = vfloor.f32 %v2097_v14  ;;  %v7536_v54 = vpop.f32.mrb[14].mxu0  ;;  %v7538_v47 = vpop.f32.mrb[14].mxu1 }
 0x1c6   :  { %v1334_v1 = vsel %vm1142_vm2, %v1206_v15, %v1270_v26  ;;  %vm1145_vm4 = vcmp.lt.f32.partialorder %v5609_v60, 0.0  ;;  %v1209_v31 = vceil.f32 %v5609_v60  ;;  %v1273_v40 = vfloor.f32 %v5609_v60  ;;  %v7541_v45 = vpop.f32.mrb[15].mxu0  ;;  %v7543_v49 = vpop.f32.mrb[15].mxu1 }
 0x1c7   :  { %9465 = vst [vmem:[#allocation38_spill] sm:$0xff] %v7534_v58  ;;  %v7545_v3 = vadd.f32 %v2586_v42, %v1400_v50  ;;  %v1398_v56 = vmul.f32 16.0, %v1334_v1  ;;  %v2520_v21 = vsel %vm2328_vm3, %v2392_v34, %v2456_v55  ;;  %vm2331_vm5 = vcmp.lt.f32.partialorder %v7510_v20, 0.0 }
 0x1c8   :  { %v2584_v28 = vmul.f32 8.0, %v2520_v21  ;;  %v1337_v58 = vsel %vm1145_vm4, %v1209_v31, %v1273_v40  ;;  %v2395_v13 = vceil.f32 %v7510_v20  ;;  %v2459_v33 = vfloor.f32 %v7510_v20  ;;  %5895 = vmatmul.mubr.bf16.gmra.mrb[120].mxu0 %v7476_v11  ;;  %6055 = vmatmul.mubr.bf16.gmra.mrb[120].mxu1 %v7478_v29  ;;  %v9513_v29 = vld [vmem:[#allocation92_spill] sm:$0xff]  ;;  %v9514_v11 = vld [vmem:[#allocation93_spill] sm:$0xff] }
 0x1c9   :  { %9466 = vst [vmem:[#allocation39_spill] sm:$0xff] %v7545_v3  ;;  %v1401_v60 = vmul.f32 16.0, %v1337_v58  ;;  %vm1143_vm6 = vcmp.lt.f32.partialorder %v7512_v59, 0.0  ;;  %v1207_v15 = vceil.f32 %v7512_v59  ;;  %v1271_v14 = vfloor.f32 %v7512_v59  ;;  %5898 = vmatprep.mubr.bf16.mxu0 %v7480_v5  ;;  %6058 = vmatprep.mubr.bf16.mxu1 %v7482_v27 }
 0x1ca   :  { %v7558_v50 = vadd.f32 %v2584_v28, %v1398_v56  ;;  %v2523_v26 = vsel %vm2331_vm5, %v2395_v13, %v2459_v33  ;;  %vm2329_vm7 = vcmp.lt.f32.partialorder %v7514_v48, 0.0  ;;  %v2393_v20 = vceil.f32 %v7514_v48 }
 0x1cb   :  { %v2587_v42 = vmul.f32 8.0, %v2523_v26  ;;  %v1335_v34 = vsel %vm1143_vm6, %v1207_v15, %v1271_v14  ;;  %v2457_v58 = vfloor.f32 %v7514_v48  ;;  %vm1148_vm8 = vcmp.lt.f32.partialorder %v5612_v24, 0.0  ;;  %v7563_v55 = vpop.f32.mrb[16].mxu0  ;;  %v7565_v1 = vpop.f32.mrb[16].mxu1 }
 0x1cc   :  { %9467 = vst [vmem:[#allocation40_spill] sm:$0xff] %v7558_v50  ;;  %v1399_v59 = vmul.f32 16.0, %v1335_v34  ;;  %v1212_v31 = vceil.f32 %v5612_v24  ;;  %v1276_v40 = vfloor.f32 %v5612_v24  ;;  %vm2334_vm9 = vcmp.lt.f32.partialorder %v7528_v8, 0.0  ;;  %v7568_v56 = vpop.f32.mrb[17].mxu0  ;;  %v7570_v13 = vpop.f32.mrb[17].mxu1 }
 0x1cd   :  { %v7572_v21 = vadd.f32 %v2587_v42, %v1401_v60  ;;  %v2521_v28 = vsel %vm2329_vm7, %v2393_v20, %v2457_v58  ;;  %v2398_v33 = vceil.f32 %v7528_v8  ;;  %v2462_v48 = vfloor.f32 %v7528_v8  ;;  %v7576_v15 = vpop.f32.mrb[18].mxu0  ;;  %v7578_v14 = vpop.f32.mrb[18].mxu1 }
 0x1ce   :  { %v2585_v26 = vmul.f32 8.0, %v2521_v28  ;;  %v1340_v34 = vsel %vm1148_vm8, %v1212_v31, %v1276_v40  ;;  %vm1146_vm10 = vcmp.lt.f32.partialorder %v7530_v52, 0.0  ;;  %v1210_v50 = vceil.f32 %v7530_v52  ;;  %v7583_v3 = vpop.f32.mrb[19].mxu0  ;;  %v7585_v60 = vpop.f32.mrb[19].mxu1 }
 0x1cf   :  { %9468 = vst [vmem:[#allocation41_spill] sm:$0xff] %v7572_v21  ;;  %v1404_v20 = vmul.f32 16.0, %v1340_v34  ;;  %v2526_v42 = vsel %vm2334_vm9, %v2398_v33, %v2462_v48  ;;  %v1274_v58 = vfloor.f32 %v7530_v52  ;;  %vm2332_vm11 = vcmp.lt.f32.partialorder %v7532_v7, 0.0 }
 0x1d0   :  { %v7591_v21 = vadd.f32 %v2585_v26, %v1399_v59  ;;  %v2590_v24 = vmul.f32 8.0, %v2526_v42  ;;  %v2396_v31 = vceil.f32 %v7532_v7  ;;  %v2460_v40 = vfloor.f32 %v7532_v7  ;;  %5899 = vmatmul.mubr.bf16.gmra.mrb[124].mxu0 %v7484_v57  ;;  %6059 = vmatmul.mubr.bf16.gmra.mrb[124].mxu1 %v7486_v44 }
 0x1d1   :  { %v1338_v28 = vsel %vm1146_vm10, %v1210_v50, %v1274_v58  ;;  %vm1149_vm12 = vcmp.lt.f32.partialorder %v7536_v54, 0.0  ;;  %v1213_v8 = vceil.f32 %v7536_v54  ;;  %v1277_v52 = vfloor.f32 %v7536_v54  ;;  %5918 = vmatprep.mubr.bf16.mxu0 %v7167_v19  ;;  %6078 = vmatprep.mubr.bf16.mxu1 %v7169_v61 }
 0x1d2   :  { %9469 = vst [vmem:[#allocation42_spill] sm:$0xff] %v7591_v21  ;;  %v7602_v59 = vadd.f32 %v2590_v24, %v1404_v20  ;;  %v1402_v33 = vmul.f32 16.0, %v1338_v28  ;;  %v2524_v48 = vsel %vm2332_vm11, %v2396_v31, %v2460_v40  ;;  %vm2335_vm13 = vcmp.lt.f32.partialorder %v7538_v47, 0.0  ;;  %v9489_v21 = vld [vmem:[#allocation69_spill] sm:$0xff] }
 0x1d3   :  { %v2588_v7 = vmul.f32 8.0, %v2524_v48  ;;  %v1341_v26 = vsel %vm1149_vm12, %v1213_v8, %v1277_v52  ;;  %v2399_v50 = vceil.f32 %v7538_v47  ;;  %v2463_v34 = vfloor.f32 %v7538_v47  ;;  %v7607_v42 = vpop.f32.mrb[20].mxu0  ;;  %v7609_v58 = vpop.f32.mrb[20].mxu1 }
 0x1d4   :  { %9470 = vst [vmem:[#allocation43_spill] sm:$0xff] %v7602_v59  ;;  %v1405_v54 = vmul.f32 16.0, %v1341_v26  ;;  %vm1147_vm14 = vcmp.lt.f32.partialorder %v7541_v45, 0.0  ;;  %v1211_v19 = vceil.f32 %v7541_v45  ;;  %v1275_v61 = vfloor.f32 %v7541_v45  ;;  %v7614_v20 = vpop.f32.mrb[21].mxu0  ;;  %v7616_v24 = vpop.f32.mrb[21].mxu1 }
 0x1d5   :  { %v7618_v31 = vadd.f32 %v2588_v7, %v1402_v33  ;;  %v2527_v40 = vsel %vm2335_vm13, %v2399_v50, %v2463_v34  ;;  %vm2333_vm15 = vcmp.lt.f32.partialorder %v7543_v49, 0.0  ;;  %v2397_v47 = vceil.f32 %v7543_v49  ;;  %v7622_v28 = vpop.f32.mrb[22].mxu0  ;;  %v7624_v8 = vpop.f32.mrb[22].mxu1 }
 0x1d6   :  { %v2591_v52 = vmul.f32 8.0, %v2527_v40  ;;  %v1339_v48 = vsel %vm1147_vm14, %v1211_v19, %v1275_v61  ;;  %v2461_v26 = vfloor.f32 %v7543_v49  ;;  %vm1152_vm0 = vcmp.lt.f32.partialorder %v7563_v55, 0.0  ;;  %v7628_v45 = vpop.f32.mrb[23].mxu0  ;;  %v7630_v59 = vpop.f32.mrb[23].mxu1 }
 0x1d7   :  { %9471 = vst [vmem:[#allocation44_spill] sm:$0xff] %v7618_v31  ;;  %v1403_v33 = vmul.f32 16.0, %v1339_v48  ;;  %v1216_v7 = vceil.f32 %v7563_v55  ;;  %v1280_v50 = vfloor.f32 %v7563_v55  ;;  %vm2338_vm1 = vcmp.lt.f32.partialorder %v7565_v1, 0.0 }
 0x1d8   :  { %v7635_v34 = vadd.f32 %v2591_v52, %v1405_v54  ;;  %v2525_v31 = vsel %vm2333_vm15, %v2397_v47, %v2461_v26  ;;  %v2402_v19 = vceil.f32 %v7565_v1  ;;  %v2466_v49 = vfloor.f32 %v7565_v1  ;;  %5919 = vmatmul.mubr.bf16.vlgmr.msra.gmra.mrb[64].mxu0 %v7183_v51  ;;  %6079 = vmatmul.mubr.bf16.vlgmr.msra.gmra.mrb[64].mxu1 %v7185_v2 }
 0x1d9   :  { %v2589_v61 = vmul.f32 8.0, %v2525_v31  ;;  %v1344_v40 = vsel %vm1152_vm0, %v1216_v7, %v1280_v50  ;;  %vm1150_vm2 = vcmp.lt.f32.partialorder %v7568_v56, 0.0  ;;  %v1214_v48 = vceil.f32 %v7568_v56  ;;  %5922 = vmatprep.mubr.bf16.mxu0 %v7191_v37  ;;  %6082 = vmatprep.mubr.bf16.mxu1 %v7193_v38 }
 0x1da   :  { %9472 = vst [vmem:[#allocation45_spill] sm:$0xff] %v7635_v34  ;;  %v1408_v55 = vmul.f32 16.0, %v1344_v40  ;;  %v2530_v54 = vsel %vm2338_vm1, %v2402_v19, %v2466_v49  ;;  %v1278_v47 = vfloor.f32 %v7568_v56  ;;  %vm2336_vm3 = vcmp.lt.f32.partialorder %v7570_v13, 0.0  ;;  %v9482_v34 = vld [vmem:[#allocation59_spill] sm:$0xff] }
 0x1db   :  { %v7647_v1 = vadd.f32 %v2589_v61, %v1403_v33  ;;  %v2594_v51 = vmul.f32 8.0, %v2530_v54  ;;  %v2400_v2 = vceil.f32 %v7570_v13  ;;  %v2464_v31 = vfloor.f32 %v7570_v13  ;;  %v7651_v52 = vpop.f32.mrb[24].mxu0  ;;  %v7653_v26 = vpop.f32.mrb[24].mxu1 }
 0x1dc   :  { %v1342_v37 = vsel %vm1150_vm2, %v1214_v48, %v1278_v47  ;;  %vm1153_vm4 = vcmp.lt.f32.partialorder %v7576_v15, 0.0  ;;  %v1217_v38 = vceil.f32 %v7576_v15  ;;  %v1281_v56 = vfloor.f32 %v7576_v15  ;;  %v7658_v7 = vpop.f32.mrb[25].mxu0  ;;  %v7660_v33 = vpop.f32.mrb[25].mxu1 }
 0x1dd   :  { %9473 = vst [vmem:[#allocation46_spill] sm:$0xff] %v7647_v1  ;;  %v7662_v50 = vadd.f32 %v2594_v51, %v1408_v55  ;;  %v1406_v19 = vmul.f32 16.0, %v1342_v37  ;;  %v2528_v49 = vsel %vm2336_vm3, %v2400_v2, %v2464_v31  ;;  %vm2339_vm5 = vcmp.lt.f32.partialorder %v7578_v14, 0.0  ;;  %v7665_v13 = vpop.f32.mrb[26].mxu0  ;;  %v7667_v61 = vpop.f32.mrb[26].mxu1 }
 0x1de   :  { %v2592_v40 = vmul.f32 8.0, %v2528_v49  ;;  %v1345_v48 = vsel %vm1153_vm4, %v1217_v38, %v1281_v56  ;;  %v2403_v54 = vceil.f32 %v7578_v14  ;;  %v2467_v15 = vfloor.f32 %v7578_v14  ;;  %v7671_v47 = vpop.f32.mrb[27].mxu0  ;;  %v7673_v1 = vpop.f32.mrb[27].mxu1 }
 0x1df   :  { %9474 = vst [vmem:[#allocation47_spill] sm:$0xff] %v7662_v50  ;;  %v1409_v55 = vmul.f32 16.0, %v1345_v48  ;;  %vm1151_vm6 = vcmp.lt.f32.partialorder %v7583_v3, 0.0  ;;  %v1215_v51 = vceil.f32 %v7583_v3  ;;  %v1279_v2 = vfloor.f32 %v7583_v3 }
 0x1e0   :  { %v7678_v31 = vadd.f32 %v2592_v40, %v1406_v19  ;;  %v2531_v37 = vsel %vm2339_vm5, %v2403_v54, %v2467_v15  ;;  %vm2337_vm7 = vcmp.lt.f32.partialorder %v7585_v60, 0.0  ;;  %v2401_v38 = vceil.f32 %v7585_v60  ;;  %5923 = vmatmul.mubr.bf16.gmra.mrb[68].mxu0 %v7207_v6  ;;  %6083 = vmatmul.mubr.bf16.gmra.mrb[68].mxu1 %v7209_v0 }
 0x1e1   :  { %v2595_v14 = vmul.f32 8.0, %v2531_v37  ;;  %v1343_v56 = vsel %vm1151_vm6, %v1215_v51, %v1279_v2  ;;  %v2465_v49 = vfloor.f32 %v7585_v60  ;;  %vm1156_vm8 = vcmp.lt.f32.partialorder %v7607_v42, 0.0  ;;  %5926 = vmatprep.mubr.bf16.mxu0 %v7211_v63  ;;  %6086 = vmatprep.mubr.bf16.mxu1 %v7213_v4 }
 0x1e2   :  { %9475 = vst [vmem:[#allocation48_spill] sm:$0xff] %v7678_v31  ;;  %v1407_v3 = vmul.f32 16.0, %v1343_v56  ;;  %v1220_v19 = vceil.f32 %v7607_v42  ;;  %v1284_v40 = vfloor.f32 %v7607_v42  ;;  %vm2342_vm9 = vcmp.lt.f32.partialorder %v7609_v58, 0.0 }
 0x1e3   :  { %v7691_v6 = vadd.f32 %v2595_v14, %v1409_v55  ;;  %v2529_v0 = vsel %vm2337_vm7, %v2401_v38, %v2465_v49  ;;  %v2406_v48 = vceil.f32 %v7609_v58  ;;  %v2470_v60 = vfloor.f32 %v7609_v58  ;;  %v7695_v54 = vpop.f32.mrb[28].mxu0  ;;  %v7697_v15 = vpop.f32.mrb[28].mxu1 }
 0x1e4   :  { %v2593_v63 = vmul.f32 8.0, %v2529_v0  ;;  %v1348_v4 = vsel %vm1156_vm8, %v1220_v19, %v1284_v40  ;;  %vm1154_vm10 = vcmp.lt.f32.partialorder %v7614_v20, 0.0  ;;  %v1218_v51 = vceil.f32 %v7614_v20  ;;  %v7701_v42 = vpop.f32.mrb[29].mxu0  ;;  %v7703_v2 = vpop.f32.mrb[29].mxu1 }
 0x1e5   :  { %9476 = vst [vmem:[#allocation49_spill] sm:$0xff] %v7691_v6  ;;  %v1412_v55 = vmul.f32 16.0, %v1348_v4  ;;  %v2534_v37 = vsel %vm2342_vm9, %v2406_v48, %v2470_v60  ;;  %v1282_v38 = vfloor.f32 %v7614_v20  ;;  %vm2340_vm11 = vcmp.lt.f32.partialorder %v7616_v24, 0.0  ;;  %v7707_v58 = vpop.f32.mrb[30].mxu0  ;;  %v7709_v14 = vpop.f32.mrb[30].mxu1 }
 0x1e6   :  { %v7711_v56 = vadd.f32 %v2593_v63, %v1407_v3  ;;  %v2598_v49 = vmul.f32 8.0, %v2534_v37  ;;  %v2404_v19 = vceil.f32 %v7616_v24  ;;  %v2468_v40 = vfloor.f32 %v7616_v24  ;;  %v7715_v0 = vpop.f32.mrb[31].mxu0  ;;  %v7717_v6 = vpop.f32.mrb[31].mxu1  ;;  %v9479_v24 = vld [vmem:[#allocation52_spill] sm:$0xff] }
 0x1e7   :  { %v1346_v48 = vsel %vm1154_vm10, %v1218_v51, %v1282_v38  ;;  %vm1157_vm12 = vcmp.lt.f32.partialorder %v7622_v28, 0.0  ;;  %v1221_v60 = vceil.f32 %v7622_v28  ;;  %v1285_v4 = vfloor.f32 %v7622_v28  ;;  %v9481_v38 = vld [vmem:[#allocation56_spill] sm:$0xff] }
 0x1e8   :  { %9477 = vst [vmem:[#allocation50_spill] sm:$0xff] %v7711_v56  ;;  %v7724_v3 = vadd.f32 %v2598_v49, %v1412_v55  ;;  %v1410_v63 = vmul.f32 16.0, %v1346_v48  ;;  %v2532_v37 = vsel %vm2340_vm11, %v2404_v19, %v2468_v40  ;;  %vm2343_vm13 = vcmp.lt.f32.partialorder %v7624_v8, 0.0  ;;  %5927 = vmatmul.mubr.bf16.gmra.mrb[72].mxu0 %v9479_v24  ;;  %v9480_v56 = vld [vmem:[#allocation55_spill] sm:$0xff] }
 0x1e9   :  { %6087 = vmatmul.mubr.bf16.gmra.mrb[72].mxu1 %v9480_v56  ;;  %v2596_v31 = vmul.f32 8.0, %v2532_v37  ;;  %v1349_v50 = vsel %vm1157_vm12, %v1221_v60, %v1285_v4  ;;  %v2407_v20 = vceil.f32 %v7624_v8  ;;  %v2471_v51 = vfloor.f32 %v7624_v8  ;;  %5930 = vmatprep.mubr.bf16.mxu0 %v9481_v38 }
 0x1ea   :  { %9478 = vst [vmem:[#allocation51_spill] sm:$0xff] %v7724_v3  ;;  %6090 = vmatprep.mubr.bf16.mxu1 %v9482_v34  ;;  %v1413_v28 = vmul.f32 16.0, %v1349_v50  ;;  %vm1155_vm14 = vcmp.lt.f32.partialorder %v7628_v45, 0.0  ;;  %v1219_v55 = vceil.f32 %v7628_v45  ;;  %v1283_v49 = vfloor.f32 %v7628_v45 }
 0x1eb   :  { %v7736_v19 = vadd.f32 %v2596_v31, %v1410_v63  ;;  %v2535_v56 = vsel %vm2343_vm13, %v2407_v20, %v2471_v51  ;;  %vm2341_vm15 = vcmp.lt.f32.partialorder %v7630_v59, 0.0  ;;  %v2405_v40 = vceil.f32 %v7630_v59  ;;  %v7740_v48 = vpop.f32.mrb[32].mxu0  ;;  %v7742_v8 = vpop.f32.mrb[32].mxu1 }
 0x1ec   :  { %v2599_v60 = vmul.f32 8.0, %v2535_v56  ;;  %v1347_v34 = vsel %vm1155_vm14, %v1219_v55, %v1283_v49  ;;  %v2469_v50 = vfloor.f32 %v7630_v59  ;;  %vm1160_vm0 = vcmp.lt.f32.partialorder %v7651_v52, 0.0  ;;  %v7746_v4 = vpop.f32.mrb[33].mxu0  ;;  %v7748_v45 = vpop.f32.mrb[33].mxu1 }
 0x1ed   :  { %9483 = vst [vmem:[#allocation53_spill] sm:$0xff] %v7736_v19  ;;  %v1411_v31 = vmul.f32 16.0, %v1347_v34  ;;  %v1224_v63 = vceil.f32 %v7651_v52  ;;  %v1288_v37 = vfloor.f32 %v7651_v52  ;;  %vm2346_vm1 = vcmp.lt.f32.partialorder %v7653_v26, 0.0  ;;  %v7753_v24 = vpop.f32.mrb[34].mxu0  ;;  %v7755_v20 = vpop.f32.mrb[34].mxu1 }
 0x1ee   :  { %v7757_v51 = vadd.f32 %v2599_v60, %v1413_v28  ;;  %v2533_v38 = vsel %vm2341_vm15, %v2405_v40, %v2469_v50  ;;  %v2410_v55 = vceil.f32 %v7653_v26  ;;  %v2474_v49 = vfloor.f32 %v7653_v26  ;;  %v7763_v56 = vpop.f32.mrb[35].mxu0  ;;  %v7765_v34 = vpop.f32.mrb[35].mxu1  ;;  %v9485_v40 = vld [vmem:[#allocation60_spill] sm:$0xff]  ;;  %v9486_v26 = vld [vmem:[#allocation63_spill] sm:$0xff] }
 0x1ef   :  { %v2597_v19 = vmul.f32 8.0, %v2533_v38  ;;  %v1352_v3 = vsel %vm1160_vm0, %v1224_v63, %v1288_v37  ;;  %vm1158_vm2 = vcmp.lt.f32.partialorder %v7658_v7, 0.0  ;;  %v1222_v28 = vceil.f32 %v7658_v7  ;;  %v9488_v37 = vld [vmem:[#allocation64_spill] sm:$0xff] }
 0x1f0   :  { %9484 = vst [vmem:[#allocation54_spill] sm:$0xff] %v7757_v51  ;;  %v1416_v60 = vmul.f32 16.0, %v1352_v3  ;;  %v2538_v51 = vsel %vm2346_vm1, %v2410_v55, %v2474_v49  ;;  %v1286_v59 = vfloor.f32 %v7658_v7  ;;  %vm2344_vm3 = vcmp.lt.f32.partialorder %v7660_v33, 0.0  ;;  %5931 = vmatmul.mubr.bf16.gmra.mrb[76].mxu0 %v9485_v40 }
 0x1f1   :  { %6091 = vmatmul.mubr.bf16.gmra.mrb[76].mxu1 %v9486_v26  ;;  %v7775_v50 = vadd.f32 %v2597_v19, %v1411_v31  ;;  %v2602_v38 = vmul.f32 8.0, %v2538_v51  ;;  %v2408_v52 = vceil.f32 %v7660_v33  ;;  %v2472_v63 = vfloor.f32 %v7660_v33  ;;  %5934 = vmatprep.mubr.bf16.mxu0 %v9488_v37 }
 0x1f2   :  { %6094 = vmatprep.mubr.bf16.mxu1 %v9489_v21  ;;  %v1350_v3 = vsel %vm1158_vm2, %v1222_v28, %v1286_v59  ;;  %vm1161_vm4 = vcmp.lt.f32.partialorder %v7665_v13, 0.0  ;;  %v1225_v7 = vceil.f32 %v7665_v13  ;;  %v1289_v55 = vfloor.f32 %v7665_v13 }
 0x1f3   :  { %9487 = vst [vmem:[#allocation57_spill] sm:$0xff] %v7775_v50  ;;  %v7784_v49 = vadd.f32 %v2602_v38, %v1416_v60  ;;  %v1414_v19 = vmul.f32 16.0, %v1350_v3  ;;  %v2536_v31 = vsel %vm2344_vm3, %v2408_v52, %v2472_v63  ;;  %vm2347_vm5 = vcmp.lt.f32.partialorder %v7667_v61, 0.0  ;;  %v7787_v51 = vpop.f32.mrb[36].mxu0  ;;  %v7789_v33 = vpop.f32.mrb[36].mxu1 }
 0x1f4   :  { %v2600_v40 = vmul.f32 8.0, %v2536_v31  ;;  %v1353_v26 = vsel %vm1161_vm4, %v1225_v7, %v1289_v55  ;;  %v2411_v21 = vceil.f32 %v7667_v61  ;;  %v2475_v28 = vfloor.f32 %v7667_v61  ;;  %v7793_v59 = vpop.f32.mrb[37].mxu0  ;;  %v7795_v37 = vpop.f32.mrb[37].mxu1 }
 0x1f5   :  { %9490 = vst [vmem:[#allocation58_spill] sm:$0xff] %v7784_v49  ;;  %v1417_v13 = vmul.f32 16.0, %v1353_v26  ;;  %vm1159_vm6 = vcmp.lt.f32.partialorder %v7671_v47, 0.0  ;;  %v1223_v60 = vceil.f32 %v7671_v47  ;;  %v1287_v38 = vfloor.f32 %v7671_v47  ;;  %v7800_v52 = vpop.f32.mrb[38].mxu0  ;;  %v7802_v63 = vpop.f32.mrb[38].mxu1 }
 0x1f6   :  { %v7804_v3 = vadd.f32 %v2600_v40, %v1414_v19  ;;  %v2539_v7 = vsel %vm2347_vm5, %v2411_v21, %v2475_v28  ;;  %vm2345_vm7 = vcmp.lt.f32.partialorder %v7673_v1, 0.0  ;;  %v2409_v55 = vceil.f32 %v7673_v1  ;;  %v7810_v31 = vpop.f32.mrb[39].mxu0  ;;  %v7812_v26 = vpop.f32.mrb[39].mxu1  ;;  %v9492_v40 = vld [vmem:[#allocation70_spill] sm:$0xff]  ;;  %v9493_v21 = vld [vmem:[#allocation71_spill] sm:$0xff] }
 0x1f7   :  { %v2603_v49 = vmul.f32 8.0, %v2539_v7  ;;  %v1351_v50 = vsel %vm1159_vm6, %v1223_v60, %v1287_v38  ;;  %v2473_v47 = vfloor.f32 %v7673_v1  ;;  %vm1164_vm8 = vcmp.lt.f32.partialorder %v7695_v54, 0.0  ;;  %v9495_v38 = vld [vmem:[#allocation74_spill] sm:$0xff] }
 0x1f8   :  { %9491 = vst [vmem:[#allocation61_spill] sm:$0xff] %v7804_v3  ;;  %v1415_v62 = vmul.f32 16.0, %v1351_v50  ;;  %v1228_v19 = vceil.f32 %v7695_v54  ;;  %v1292_v61 = vfloor.f32 %v7695_v54  ;;  %vm2350_vm9 = vcmp.lt.f32.partialorder %v7697_v15, 0.0  ;;  %5935 = vmatmul.mubr.bf16.gmra.mrb[80].mxu0 %v9492_v40  ;;  %v9496_v50 = vld [vmem:[#allocation75_spill] sm:$0xff] }
 0x1f9   :  { %6095 = vmatmul.mubr.bf16.gmra.mrb[80].mxu1 %v9493_v21  ;;  %v7821_v28 = vadd.f32 %v2603_v49, %v1417_v13  ;;  %v2537_v3 = vsel %vm2345_vm7, %v2409_v55, %v2473_v47  ;;  %v2414_v60 = vceil.f32 %v7697_v15  ;;  %v2478_v1 = vfloor.f32 %v7697_v15  ;;  %5938 = vmatprep.mubr.bf16.mxu0 %v9495_v38 }
 0x1fa   :  { %6098 = vmatprep.mubr.bf16.mxu1 %v9496_v50  ;;  %v2601_v7 = vmul.f32 8.0, %v2537_v3  ;;  %v1356_v22 = vsel %vm1164_vm8, %v1228_v19, %v1292_v61  ;;  %vm1162_vm10 = vcmp.lt.f32.partialorder %v7701_v42, 0.0  ;;  %v1226_v54 = vceil.f32 %v7701_v42 }
 0x1fb   :  { %9494 = vst [vmem:[#allocation62_spill] sm:$0xff] %v7821_v28  ;;  %v1420_v40 = vmul.f32 16.0, %v1356_v22  ;;  %v2542_v17 = vsel %vm2350_vm9, %v2414_v60, %v2478_v1  ;;  %v1290_v49 = vfloor.f32 %v7701_v42  ;;  %vm2348_vm11 = vcmp.lt.f32.partialorder %v7703_v2, 0.0  ;;  %v7831_v13 = vpop.f32.mrb[40].mxu0  ;;  %v7833_v55 = vpop.f32.mrb[40].mxu1 }
 0x1fc   :  { %v7835_v15 = vadd.f32 %v2601_v7, %v1415_v62  ;;  %v2606_v47 = vmul.f32 8.0, %v2542_v17  ;;  %v2412_v3 = vceil.f32 %v7703_v2  ;;  %v2476_v19 = vfloor.f32 %v7703_v2  ;;  %v7839_v61 = vpop.f32.mrb[41].mxu0  ;;  %v7841_v21 = vpop.f32.mrb[41].mxu1 }
 0x1fd   :  { %v1354_v22 = vsel %vm1162_vm10, %v1226_v54, %v1290_v49  ;;  %vm1165_vm12 = vcmp.lt.f32.partialorder %v7707_v58, 0.0  ;;  %v1229_v42 = vceil.f32 %v7707_v58  ;;  %v1293_v60 = vfloor.f32 %v7707_v58  ;;  %v7846_v1 = vpop.f32.mrb[42].mxu0  ;;  %v7848_v62 = vpop.f32.mrb[42].mxu1 }
 0x1fe   :  { %9497 = vst [vmem:[#allocation65_spill] sm:$0xff] %v7835_v15  ;;  %v7850_v17 = vadd.f32 %v2606_v47, %v1420_v40  ;;  %v1418_v38 = vmul.f32 16.0, %v1354_v22  ;;  %v2540_v50 = vsel %vm2348_vm11, %v2412_v3, %v2476_v19  ;;  %vm2351_vm13 = vcmp.lt.f32.partialorder %v7709_v14, 0.0  ;;  %v7855_v7 = vpop.f32.mrb[43].mxu0  ;;  %v7857_v54 = vpop.f32.mrb[43].mxu1  ;;  %v9499_v47 = vld [vmem:[#allocation78_spill] sm:$0xff] }
 0x1ff   :  { %v2604_v49 = vmul.f32 8.0, %v2540_v50  ;;  %v1357_v15 = vsel %vm1165_vm12, %v1229_v42, %v1293_v60  ;;  %v2415_v58 = vceil.f32 %v7709_v14  ;;  %v2479_v28 = vfloor.f32 %v7709_v14  ;;  %v9500_v3 = vld [vmem:[#allocation79_spill] sm:$0xff]  ;;  %v9502_v60 = vld [vmem:[#allocation82_spill] sm:$0xff] }
 0x200   :  { %9498 = vst [vmem:[#allocation66_spill] sm:$0xff] %v7850_v17  ;;  %v1421_v44 = vmul.f32 16.0, %v1357_v15  ;;  %vm1163_vm14 = vcmp.lt.f32.partialorder %v7715_v0, 0.0  ;;  %v1227_v40 = vceil.f32 %v7715_v0  ;;  %v1291_v2 = vfloor.f32 %v7715_v0  ;;  %5939 = vmatmul.mubr.bf16.gmra.mrb[84].mxu0 %v9499_v47  ;;  %v9503_v14 = vld [vmem:[#allocation83_spill] sm:$0xff] }
 0x201   :  { %6099 = vmatmul.mubr.bf16.gmra.mrb[84].mxu1 %v9500_v3  ;;  %v7866_v19 = vadd.f32 %v2604_v49, %v1418_v38  ;;  %v2543_v22 = vsel %vm2351_vm13, %v2415_v58, %v2479_v28  ;;  %vm2349_vm15 = vcmp.lt.f32.partialorder %v7717_v6, 0.0  ;;  %v2413_v42 = vceil.f32 %v7717_v6  ;;  %5942 = vmatprep.mubr.bf16.mxu0 %v9502_v60 }
 0x202   :  { %6102 = vmatprep.mubr.bf16.mxu1 %v9503_v14  ;;  %v2607_v15 = vmul.f32 8.0, %v2543_v22  ;;  %v1355_v50 = vsel %vm1163_vm14, %v1227_v40, %v1291_v2  ;;  %v2477_v17 = vfloor.f32 %v7717_v6  ;;  %vm1168_vm0 = vcmp.lt.f32.partialorder %v7740_v48, 0.0 }
 0x203   :  { %9501 = vst [vmem:[#allocation67_spill] sm:$0xff] %v7866_v19  ;;  %v1419_v0 = vmul.f32 16.0, %v1355_v50  ;;  %v1232_v47 = vceil.f32 %v7740_v48  ;;  %v1296_v38 = vfloor.f32 %v7740_v48  ;;  %vm2354_vm1 = vcmp.lt.f32.partialorder %v7742_v8, 0.0  ;;  %v7877_v28 = vpop.f32.mrb[44].mxu0  ;;  %v7879_v49 = vpop.f32.mrb[44].mxu1 }
 0x204   :  { %v7881_v58 = vadd.f32 %v2607_v15, %v1421_v44  ;;  %v2541_v3 = vsel %vm2349_vm15, %v2413_v42, %v2477_v17  ;;  %v2418_v40 = vceil.f32 %v7742_v8  ;;  %v2482_v6 = vfloor.f32 %v7742_v8  ;;  %v7885_v2 = vpop.f32.mrb[45].mxu0  ;;  %v7887_v22 = vpop.f32.mrb[45].mxu1 }
 0x205   :  { %v2605_v60 = vmul.f32 8.0, %v2541_v3  ;;  %v1360_v14 = vsel %vm1168_vm0, %v1232_v47, %v1296_v38  ;;  %vm1166_vm2 = vcmp.lt.f32.partialorder %v7746_v4, 0.0  ;;  %v1230_v48 = vceil.f32 %v7746_v4  ;;  %v7891_v50 = vpop.f32.mrb[46].mxu0  ;;  %v7893_v19 = vpop.f32.mrb[46].mxu1 }
 0x206   :  { %9504 = vst [vmem:[#allocation68_spill] sm:$0xff] %v7881_v58  ;;  %v1424_v44 = vmul.f32 16.0, %v1360_v14  ;;  %v2546_v17 = vsel %vm2354_vm1, %v2418_v40, %v2482_v6  ;;  %v1294_v42 = vfloor.f32 %v7746_v4  ;;  %vm2352_vm3 = vcmp.lt.f32.partialorder %v7748_v45, 0.0  ;;  %v7899_v15 = vpop.f32.mrb[47].mxu0  ;;  %v7901_v3 = vpop.f32.mrb[47].mxu1  ;;  %v9506_v40 = vld [vmem:[#allocation86_spill] sm:$0xff] }
 0x207   :  { %v7903_v47 = vadd.f32 %v2605_v60, %v1419_v0  ;;  %v2610_v38 = vmul.f32 8.0, %v2546_v17  ;;  %v2416_v58 = vceil.f32 %v7748_v45  ;;  %v2480_v57 = vfloor.f32 %v7748_v45  ;;  %v9507_v6 = vld [vmem:[#allocation87_spill] sm:$0xff]  ;;  %v9509_v17 = vld [vmem:[#allocation12_spill] sm:$0xff]  ;;  %v9510_v45 = vld [vmem:[#allocation13_spill] sm:$0xff] }
 0x208   :  { %v1358_v27 = vsel %vm1166_vm2, %v1230_v48, %v1294_v42  ;;  %vm1169_vm4 = vcmp.lt.f32.partialorder %v7753_v24, 0.0  ;;  %v1233_v8 = vceil.f32 %v7753_v24  ;;  %v1297_v4 = vfloor.f32 %v7753_v24  ;;  %5943 = vmatmul.mubr.bf16.gmra.mrb[88].mxu0 %v9506_v40 }
 0x209   :  { %9505 = vst [vmem:[#allocation72_spill] sm:$0xff] %v7903_v47  ;;  %6103 = vmatmul.mubr.bf16.gmra.mrb[88].mxu1 %v9507_v6  ;;  %v7912_v14 = vadd.f32 %v2610_v38, %v1424_v44  ;;  %v1422_v0 = vmul.f32 16.0, %v1358_v27  ;;  %v2544_v60 = vsel %vm2352_vm3, %v2416_v58, %v2480_v57  ;;  %vm2355_vm5 = vcmp.lt.f32.partialorder %v7755_v20, 0.0  ;;  %5946 = vmatprep.mubr.bf16.mxu0 %v9509_v17 }
 0x20a   :  { %6106 = vmatprep.mubr.bf16.mxu1 %v9510_v45  ;;  %v2608_v48 = vmul.f32 8.0, %v2544_v60  ;;  %v1361_v42 = vsel %vm1169_vm4, %v1233_v8, %v1297_v4  ;;  %v2419_v47 = vceil.f32 %v7755_v20  ;;  %v2483_v24 = vfloor.f32 %v7755_v20 }
 0x20b   :  { %9508 = vst [vmem:[#allocation73_spill] sm:$0xff] %v7912_v14  ;;  %v1425_v5 = vmul.f32 16.0, %v1361_v42  ;;  %vm1167_vm6 = vcmp.lt.f32.partialorder %v7763_v56, 0.0  ;;  %v1231_v44 = vceil.f32 %v7763_v56  ;;  %v1295_v27 = vfloor.f32 %v7763_v56  ;;  %v7922_v57 = vpop.f32.mrb[48].mxu0  ;;  %v7924_v58 = vpop.f32.mrb[48].mxu1 }
 0x20c   :  { %v7926_v38 = vadd.f32 %v2608_v48, %v1422_v0  ;;  %v2547_v40 = vsel %vm2355_vm5, %v2419_v47, %v2483_v24  ;;  %vm2353_vm7 = vcmp.lt.f32.partialorder %v7765_v34, 0.0  ;;  %v2417_v8 = vceil.f32 %v7765_v34  ;;  %v7930_v4 = vpop.f32.mrb[49].mxu0  ;;  %v7932_v20 = vpop.f32.mrb[49].mxu1 }
 0x20d   :  { %v2611_v6 = vmul.f32 8.0, %v2547_v40  ;;  %v1359_v60 = vsel %vm1167_vm6, %v1231_v44, %v1295_v27  ;;  %v2481_v17 = vfloor.f32 %v7765_v34  ;;  %vm1172_vm8 = vcmp.lt.f32.partialorder %v7787_v51, 0.0  ;;  %v7936_v56 = vpop.f32.mrb[50].mxu0  ;;  %v7938_v45 = vpop.f32.mrb[50].mxu1  ;;  %v9515_v34 = vld [vmem:[#allocation14_spill] sm:$0xff] }
 0x20e   :  { %9511 = vst [vmem:[#allocation76_spill] sm:$0xff] %v7926_v38  ;;  %v1423_v0 = vmul.f32 16.0, %v1359_v60  ;;  %v1236_v47 = vceil.f32 %v7787_v51  ;;  %v1300_v48 = vfloor.f32 %v7787_v51  ;;  %vm2358_vm9 = vcmp.lt.f32.partialorder %v7789_v33, 0.0  ;;  %v7943_v42 = vpop.f32.mrb[51].mxu0  ;;  %v7945_v24 = vpop.f32.mrb[51].mxu1 }
 0x20f   :  { %v7947_v44 = vadd.f32 %v2611_v6, %v1425_v5  ;;  %v2545_v27 = vsel %vm2353_vm7, %v2417_v8, %v2481_v17  ;;  %v2422_v40 = vceil.f32 %v7789_v33  ;;  %v2486_v38 = vfloor.f32 %v7789_v33  ;;  %v9516_v8 = vld [vmem:[#allocation15_spill] sm:$0xff] }
 0x210   :  { %v2609_v60 = vmul.f32 8.0, %v2545_v27  ;;  %v1364_v14 = vsel %vm1172_vm8, %v1236_v47, %v1300_v48  ;;  %vm1170_vm10 = vcmp.lt.f32.partialorder %v7793_v59, 0.0  ;;  %v1234_v51 = vceil.f32 %v7793_v59  ;;  %5947 = vmatmul.mubr.bf16.gmra.mrb[92].mxu0 %v9513_v29 }
 0x211   :  { %9512 = vst [vmem:[#allocation77_spill] sm:$0xff] %v7947_v44  ;;  %6107 = vmatmul.mubr.bf16.gmra.mrb[92].mxu1 %v9514_v11  ;;  %v1428_v30 = vmul.f32 16.0, %v1364_v14  ;;  %v2550_v5 = vsel %vm2358_vm9, %v2422_v40, %v2486_v38  ;;  %v1298_v6 = vfloor.f32 %v7793_v59  ;;  %vm2356_vm11 = vcmp.lt.f32.partialorder %v7795_v37, 0.0  ;;  %5950 = vmatprep.mubr.bf16.mxu0 %v9515_v34  ;;  %v9522_v44 = vld [vmem:[#allocation17_spill] sm:$0xff] }
 0x212   :  { %6110 = vmatprep.mubr.bf16.mxu1 %v9516_v8  ;;  %v7961_v33 = vadd.f32 %v2609_v60, %v1423_v0  ;;  %v2614_v17 = vmul.f32 8.0, %v2550_v5  ;;  %v2420_v47 = vceil.f32 %v7795_v37  ;;  %v2484_v48 = vfloor.f32 %v7795_v37 }
 0x213   :  { %v1362_v29 = vsel %vm1170_vm10, %v1234_v51, %v1298_v6  ;;  %vm1173_vm12 = vcmp.lt.f32.partialorder %v7800_v52, 0.0  ;;  %v1237_v11 = vceil.f32 %v7800_v52  ;;  %v1301_v59 = vfloor.f32 %v7800_v52  ;;  %v7968_v14 = vpop.f32.mrb[52].mxu0  ;;  %v7970_v38 = vpop.f32.mrb[52].mxu1 }
 0x214   :  { %9517 = vst [vmem:[#allocation80_spill] sm:$0xff] %v7961_v33  ;;  %v7972_v27 = vadd.f32 %v2614_v17, %v1428_v30  ;;  %v1426_v0 = vmul.f32 16.0, %v1362_v29  ;;  %v2548_v40 = vsel %vm2356_vm11, %v2420_v47, %v2484_v48  ;;  %vm2359_vm13 = vcmp.lt.f32.partialorder %v7802_v63, 0.0  ;;  %v7975_v60 = vpop.f32.mrb[53].mxu0  ;;  %v7977_v37 = vpop.f32.mrb[53].mxu1 }
 0x215   :  { %v2612_v51 = vmul.f32 8.0, %v2548_v40  ;;  %v1365_v5 = vsel %vm1173_vm12, %v1237_v11, %v1301_v59  ;;  %v2423_v6 = vceil.f32 %v7802_v63  ;;  %v2487_v52 = vfloor.f32 %v7802_v63  ;;  %v7981_v34 = vpop.f32.mrb[54].mxu0  ;;  %v7983_v8 = vpop.f32.mrb[54].mxu1 }
 0x216   :  { %9518 = vst [vmem:[#allocation81_spill] sm:$0xff] %v7972_v27  ;;  %v1429_v30 = vmul.f32 16.0, %v1365_v5  ;;  %vm1171_vm14 = vcmp.lt.f32.partialorder %v7810_v31, 0.0  ;;  %v1235_v17 = vceil.f32 %v7810_v31  ;;  %v1299_v47 = vfloor.f32 %v7810_v31  ;;  %v7988_v48 = vpop.f32.mrb[55].mxu0  ;;  %v7990_v29 = vpop.f32.mrb[55].mxu1  ;;  %v9521_v31 = vld [vmem:[#allocation16_spill] sm:$0xff] }
 0x217   :  { %9519 = vst [vmem:[#allocation84_spill] sm:$0xff] %v7990_v29  ;;  %v7992_v11 = vadd.f32 %v2612_v51, %v1426_v0  ;;  %v2551_v59 = vsel %vm2359_vm13, %v2423_v6, %v2487_v52  ;;  %vm2357_vm15 = vcmp.lt.f32.partialorder %v7812_v26, 0.0  ;;  %v2421_v40 = vceil.f32 %v7812_v26  ;;  %v9523_v51 = vld [vmem:[#allocation18_spill] sm:$0xff]  ;;  %v9524_v6 = vld [vmem:[#allocation19_spill] sm:$0xff] }
 0x218   :  { %v2615_v5 = vmul.f32 8.0, %v2551_v59  ;;  %v1363_v27 = vsel %vm1171_vm14, %v1235_v17, %v1299_v47  ;;  %v2485_v33 = vfloor.f32 %v7812_v26  ;;  %vm1176_vm0 = vcmp.lt.f32.partialorder %v7831_v13, 0.0  ;;  %5951 = vmatmul.mubr.bf16.gmra.mrb[96].mxu0 %v9521_v31 }
 0x219   :  { %9520 = vst [vmem:[#allocation85_spill] sm:$0xff] %v7992_v11  ;;  %6111 = vmatmul.mubr.bf16.gmra.mrb[96].mxu1 %v9522_v44  ;;  %v1427_v29 = vmul.f32 16.0, %v1363_v27  ;;  %v1240_v0 = vceil.f32 %v7831_v13  ;;  %v1304_v63 = vfloor.f32 %v7831_v13  ;;  %vm2362_vm1 = vcmp.lt.f32.partialorder %v7833_v55, 0.0  ;;  %5954 = vmatprep.mubr.bf16.mxu0 %v9523_v51 }
 0x21a   :  { %6114 = vmatprep.mubr.bf16.mxu1 %v9524_v6  ;;  %v8007_v52 = vadd.f32 %v2615_v5, %v1429_v30  ;;  %v2549_v26 = vsel %vm2357_vm15, %v2421_v40, %v2485_v33  ;;  %v2426_v17 = vceil.f32 %v7833_v55  ;;  %v2490_v47 = vfloor.f32 %v7833_v55 }
 0x21b   :  { %v2613_v59 = vmul.f32 8.0, %v2549_v26  ;;  %v1368_v44 = vsel %vm1176_vm0, %v1240_v0, %v1304_v63  ;;  %vm1174_vm2 = vcmp.lt.f32.partialorder %v7839_v61, 0.0  ;;  %v1238_v27 = vceil.f32 %v7839_v61  ;;  %v8013_v13 = vpop.f32.mrb[56].mxu0  ;;  %v8015_v31 = vpop.f32.mrb[56].mxu1 }
 0x21c   :  { %9525 = vst [vmem:[#allocation88_spill] sm:$0xff] %v8007_v52  ;;  %v1432_v51 = vmul.f32 16.0, %v1368_v44  ;;  %v2554_v11 = vsel %vm2362_vm1, %v2426_v17, %v2490_v47  ;;  %v1302_v30 = vfloor.f32 %v7839_v61  ;;  %vm2360_vm3 = vcmp.lt.f32.partialorder %v7841_v21, 0.0  ;;  %v8019_v33 = vpop.f32.mrb[57].mxu0  ;;  %v8021_v40 = vpop.f32.mrb[57].mxu1 }
 0x21d   :  { %v8023_v55 = vadd.f32 %v2613_v59, %v1427_v29  ;;  %v2618_v5 = vmul.f32 8.0, %v2554_v11  ;;  %v2424_v0 = vceil.f32 %v7841_v21  ;;  %v2488_v63 = vfloor.f32 %v7841_v21  ;;  %v8027_v6 = vpop.f32.mrb[58].mxu0  ;;  %v8029_v26 = vpop.f32.mrb[58].mxu1 }
 0x21e   :  { %9527 = vst [vmem:[#allocation90_spill] sm:$0xff] %v8027_v6  ;;  %9528 = vst [vmem:[#allocation91_spill] sm:$0xff] %v8029_v26  ;;  %v1366_v17 = vsel %vm1174_vm2, %v1238_v27, %v1302_v30  ;;  %vm1177_vm4 = vcmp.lt.f32.partialorder %v7846_v1, 0.0  ;;  %v1241_v47 = vceil.f32 %v7846_v1  ;;  %v1305_v44 = vfloor.f32 %v7846_v1  ;;  %v8036_v29 = vpop.f32.mrb[59].mxu0  ;;  %v8038_v11 = vpop.f32.mrb[59].mxu1  ;;  %v9531_v6 = vld [vmem:[#allocation20_spill] sm:$0xff] }
 0x21f   :  { %9526 = vst [vmem:[#allocation89_spill] sm:$0xff] %v8023_v55  ;;  %9529 = vst [vmem:[#allocation52_spill] sm:$0xff] %v8036_v29  ;;  %v8040_v59 = vadd.f32 %v2618_v5, %v1432_v51  ;;  %v1430_v55 = vmul.f32 16.0, %v1366_v17  ;;  %v2552_v52 = vsel %vm2360_vm3, %v2424_v0, %v2488_v63  ;;  %vm2363_vm5 = vcmp.lt.f32.partialorder %v7848_v62, 0.0  ;;  %v9532_v1 = vld [vmem:[#allocation21_spill] sm:$0xff]  ;;  %v9533_v5 = vld [vmem:[#allocation22_spill] sm:$0xff] }
 0x220   :  { %v2616_v61 = vmul.f32 8.0, %v2552_v52  ;;  %v1369_v27 = vsel %vm1177_vm4, %v1241_v47, %v1305_v44  ;;  %v2427_v30 = vceil.f32 %v7848_v62  ;;  %v2491_v26 = vfloor.f32 %v7848_v62  ;;  %5955 = vmatmul.mubr.bf16.gmra.mrb[100].mxu0 %v9531_v6  ;;  %v9534_v0 = vld [vmem:[#allocation23_spill] sm:$0xff] }
 0x221   :  { %9530 = vst [vmem:[#allocation55_spill] sm:$0xff] %v8040_v59  ;;  %6115 = vmatmul.mubr.bf16.gmra.mrb[100].mxu1 %v9532_v1  ;;  %v1433_v29 = vmul.f32 16.0, %v1369_v27  ;;  %vm1175_vm6 = vcmp.lt.f32.partialorder %v7855_v7, 0.0  ;;  %v1239_v51 = vceil.f32 %v7855_v7  ;;  %v1303_v21 = vfloor.f32 %v7855_v7  ;;  %5958 = vmatprep.mubr.bf16.mxu0 %v9533_v5 }
 0x222   :  { %6118 = vmatprep.mubr.bf16.mxu1 %v9534_v0  ;;  %v8054_v52 = vadd.f32 %v2616_v61, %v1430_v55  ;;  %v2555_v63 = vsel %vm2363_vm5, %v2427_v30, %v2491_v26  ;;  %vm2361_vm7 = vcmp.lt.f32.partialorder %v7857_v54, 0.0  ;;  %v2425_v62 = vceil.f32 %v7857_v54 }
 0x223   :  { %v2619_v6 = vmul.f32 8.0, %v2555_v63  ;;  %v1367_v17 = vsel %vm1175_vm6, %v1239_v51, %v1303_v21  ;;  %v2489_v47 = vfloor.f32 %v7857_v54  ;;  %vm1180_vm8 = vcmp.lt.f32.partialorder %v7877_v28, 0.0  ;;  %v8060_v44 = vpop.f32.mrb[60].mxu0  ;;  %v8062_v7 = vpop.f32.mrb[60].mxu1 }
 0x224   :  { %9535 = vst [vmem:[#allocation56_spill] sm:$0xff] %v8054_v52  ;;  %v1431_v27 = vmul.f32 16.0, %v1367_v17  ;;  %v1244_v1 = vceil.f32 %v7877_v28  ;;  %v1308_v55 = vfloor.f32 %v7877_v28  ;;  %vm2366_vm9 = vcmp.lt.f32.partialorder %v7879_v49, 0.0  ;;  %v8067_v26 = vpop.f32.mrb[61].mxu0  ;;  %v8069_v61 = vpop.f32.mrb[61].mxu1 }
 0x225   :  { %v8071_v30 = vadd.f32 %v2619_v6, %v1433_v29  ;;  %v2553_v54 = vsel %vm2361_vm7, %v2425_v62, %v2489_v47  ;;  %v2430_v51 = vceil.f32 %v7879_v49  ;;  %v2494_v21 = vfloor.f32 %v7879_v49  ;;  %v8075_v5 = vpop.f32.mrb[62].mxu0  ;;  %v8077_v0 = vpop.f32.mrb[62].mxu1 }
 0x226   :  { %v2617_v63 = vmul.f32 8.0, %v2553_v54  ;;  %v1372_v17 = vsel %vm1180_vm8, %v1244_v1, %v1308_v55  ;;  %vm1178_vm10 = vcmp.lt.f32.partialorder %v7885_v2, 0.0  ;;  %v1242_v52 = vceil.f32 %v7885_v2  ;;  %v8083_v59 = vpop.f32.mrb[63].mxu0  ;;  %v8085_v29 = vpop.f32.mrb[63].mxu1 }
 0x227   :  { %9536 = vst [vmem:[#allocation59_spill] sm:$0xff] %v8071_v30  ;;  %v1436_v62 = vmul.f32 16.0, %v1372_v17  ;;  %v2558_v6 = vsel %vm2366_vm9, %v2430_v51, %v2494_v21  ;;  %v1306_v47 = vfloor.f32 %v7885_v2  ;;  %vm2364_vm11 = vcmp.lt.f32.partialorder %v7887_v22, 0.0 }
 0x228   :  { %v8091_v54 = vadd.f32 %v2617_v63, %v1431_v27  ;;  %v2622_v28 = vmul.f32 8.0, %v2558_v6  ;;  %v2428_v1 = vceil.f32 %v7887_v22  ;;  %v2492_v55 = vfloor.f32 %v7887_v22  ;;  %5959 = vmatmul.mubr.bf16.gmra.mrb[104].mxu0 %v7379_v53 }
 0x229   :  { %6119 = vmatmul.mubr.bf16.gmra.mrb[104].mxu1 %v7381_v12  ;;  %v1370_v30 = vsel %vm1178_vm10, %v1242_v52, %v1306_v47  ;;  %vm1181_vm12 = vcmp.lt.f32.partialorder %v7891_v50, 0.0  ;;  %v1245_v49 = vceil.f32 %v7891_v50  ;;  %v1309_v2 = vfloor.f32 %v7891_v50  ;;  %5962 = vmatprep.mubr.bf16.mxu0 %v7387_v41 }
 0x22a   :  { %6122 = vmatprep.mubr.bf16.mxu1 %v7389_v16  ;;  %v8102_v27 = vadd.f32 %v2622_v28, %v1436_v62  ;;  %v1434_v51 = vmul.f32 16.0, %v1370_v30  ;;  %v2556_v21 = vsel %vm2364_vm11, %v2428_v1, %v2492_v55  ;;  %vm2367_vm13 = vcmp.lt.f32.partialorder %v7893_v19, 0.0 }
 0x22b   :  { %v2620_v53 = vmul.f32 8.0, %v2556_v21  ;;  %v1373_v22 = vsel %vm1181_vm12, %v1245_v49, %v1309_v2  ;;  %v2431_v12 = vceil.f32 %v7893_v19  ;;  %v2495_v52 = vfloor.f32 %v7893_v19 }
 0x22c   :  { %v1437_v63 = vmul.f32 16.0, %v1373_v22  ;;  %vm1179_vm14 = vcmp.lt.f32.partialorder %v7899_v15, 0.0  ;;  %v1243_v50 = vceil.f32 %v7899_v15  ;;  %v1307_v41 = vfloor.f32 %v7899_v15 }
 0x22d   :  { %v8110_v16 = vadd.f32 %v2620_v53, %v1434_v51  ;;  %v2559_v17 = vsel %vm2367_vm13, %v2431_v12, %v2495_v52  ;;  %vm2365_vm15 = vcmp.lt.f32.partialorder %v7901_v3, 0.0  ;;  %v2429_v30 = vceil.f32 %v7901_v3 }
 0x22e   :  { %v2623_v62 = vmul.f32 8.0, %v2559_v17  ;;  %v1371_v6 = vsel %vm1179_vm14, %v1243_v50, %v1307_v41  ;;  %v2493_v47 = vfloor.f32 %v7901_v3  ;;  %vm1184_vm0 = vcmp.lt.f32.partialorder %v7922_v57, 0.0 }
 0x22f   :  { %v1435_v19 = vmul.f32 16.0, %v1371_v6  ;;  %v1248_v28 = vceil.f32 %v7922_v57  ;;  %v1312_v1 = vfloor.f32 %v7922_v57  ;;  %vm2370_vm1 = vcmp.lt.f32.partialorder %v7924_v58, 0.0 }
 0x230   :  { %v8119_v15 = vadd.f32 %v2623_v62, %v1437_v63  ;;  %v2557_v55 = vsel %vm2365_vm15, %v2429_v30, %v2493_v47  ;;  %v2434_v49 = vceil.f32 %v7924_v58  ;;  %v2498_v2 = vfloor.f32 %v7924_v58  ;;  %5963 = vmatmul.mubr.bf16.gmra.mrb[108].mxu0 %v7401_v36 }
 0x231   :  { %6123 = vmatmul.mubr.bf16.gmra.mrb[108].mxu1 %v7403_v32  ;;  %v2621_v3 = vmul.f32 8.0, %v2557_v55  ;;  %v1376_v51 = vsel %vm1184_vm0, %v1248_v28, %v1312_v1  ;;  %vm1182_vm2 = vcmp.lt.f32.partialorder %v7930_v4, 0.0  ;;  %v1246_v21 = vceil.f32 %v7930_v4  ;;  %5966 = vmatprep.mubr.bf16.mxu0 %v7421_v18 }
 0x232   :  { %6126 = vmatprep.mubr.bf16.mxu1 %v7423_v43  ;;  %v1440_v57 = vmul.f32 16.0, %v1376_v51  ;;  %v2562_v53 = vsel %vm2370_vm1, %v2434_v49, %v2498_v2  ;;  %v1310_v22 = vfloor.f32 %v7930_v4  ;;  %vm2368_vm3 = vcmp.lt.f32.partialorder %v7932_v20, 0.0 }
 0x233   :  { %v8131_v58 = vadd.f32 %v2621_v3, %v1435_v19  ;;  %v2626_v36 = vmul.f32 8.0, %v2562_v53  ;;  %v2432_v32 = vceil.f32 %v7932_v20  ;;  %v2496_v12 = vfloor.f32 %v7932_v20 }
 0x234   :  { %v1374_v52 = vsel %vm1182_vm2, %v1246_v21, %v1310_v22  ;;  %vm1185_vm4 = vcmp.lt.f32.partialorder %v7936_v56, 0.0  ;;  %v1249_v18 = vceil.f32 %v7936_v56  ;;  %v1313_v43 = vfloor.f32 %v7936_v56 }
 0x235   :  { %v8138_v63 = vadd.f32 %v2626_v36, %v1440_v57  ;;  %v1438_v50 = vmul.f32 16.0, %v1374_v52  ;;  %v2560_v4 = vsel %vm2368_vm3, %v2432_v32, %v2496_v12  ;;  %vm2371_vm5 = vcmp.lt.f32.partialorder %v7938_v45, 0.0 }
 0x236   :  { %v2624_v41 = vmul.f32 8.0, %v2560_v4  ;;  %v1377_v17 = vsel %vm1185_vm4, %v1249_v18, %v1313_v43  ;;  %v2435_v30 = vceil.f32 %v7938_v45  ;;  %v2499_v62 = vfloor.f32 %v7938_v45 }
 0x237   :  { %v1441_v20 = vmul.f32 16.0, %v1377_v17  ;;  %vm1183_vm6 = vcmp.lt.f32.partialorder %v7943_v42, 0.0  ;;  %v1247_v6 = vceil.f32 %v7943_v42  ;;  %v1311_v47 = vfloor.f32 %v7943_v42  ;;  %v9541_v17 = vld [vmem:[#allocation24_spill] sm:$0xff] }
 0x238   :  { %v8146_v56 = vadd.f32 %v2624_v41, %v1438_v50  ;;  %v2563_v19 = vsel %vm2371_vm5, %v2435_v30, %v2499_v62  ;;  %vm2369_vm7 = vcmp.lt.f32.partialorder %v7945_v24, 0.0  ;;  %v2433_v28 = vceil.f32 %v7945_v24  ;;  %5967 = vmatmul.mubr.bf16.gmra.mrb[112].mxu0 %v7457_v46 }
 0x239   :  { %6127 = vmatmul.mubr.bf16.gmra.mrb[112].mxu1 %v7460_v9  ;;  %v2627_v1 = vmul.f32 8.0, %v2563_v19  ;;  %v1375_v45 = vsel %vm1183_vm6, %v1247_v6, %v1311_v47  ;;  %v2497_v55 = vfloor.f32 %v7945_v24  ;;  %vm1188_vm8 = vcmp.lt.f32.partialorder %v7968_v14, 0.0  ;;  %5970 = vmatprep.mubr.bf16.mxu0 %v7462_v10 }
 0x23a   :  { %9537 = vst [vmem:[#allocation60_spill] sm:$0xff] %v8146_v56  ;;  %6130 = vmatprep.mubr.bf16.mxu1 %v7466_v23  ;;  %v1439_v42 = vmul.f32 16.0, %v1375_v45  ;;  %v1252_v49 = vceil.f32 %v7968_v14  ;;  %v1316_v2 = vfloor.f32 %v7968_v14  ;;  %vm2374_vm9 = vcmp.lt.f32.partialorder %v7970_v38, 0.0 }
 0x23b   :  { %v8159_v46 = vadd.f32 %v2627_v1, %v1441_v20  ;;  %v2561_v9 = vsel %vm2369_vm7, %v2433_v28, %v2497_v55  ;;  %v2438_v3 = vceil.f32 %v7970_v38  ;;  %v2502_v24 = vfloor.f32 %v7970_v38  ;;  %v9543_v20 = vld [vmem:[#allocation84_spill] sm:$0xff] }
 0x23c   :  { %v2625_v51 = vmul.f32 8.0, %v2561_v9  ;;  %v1380_v21 = vsel %vm1188_vm8, %v1252_v49, %v1316_v2  ;;  %vm1186_vm10 = vcmp.lt.f32.partialorder %v7975_v60, 0.0  ;;  %v1250_v10 = vceil.f32 %v7975_v60 }
 0x23d   :  { %9538 = vst [vmem:[#allocation63_spill] sm:$0xff] %v8159_v46  ;;  %v1444_v23 = vmul.f32 16.0, %v1380_v21  ;;  %v2566_v57 = vsel %vm2374_vm9, %v2438_v3, %v2502_v24  ;;  %v1314_v53 = vfloor.f32 %v7975_v60  ;;  %vm2372_vm11 = vcmp.lt.f32.partialorder %v7977_v37, 0.0  ;;  %v9546_v21 = vld [vmem:[#allocation26_spill] sm:$0xff] }
 0x23e   :  { %v8167_v14 = vadd.f32 %v2625_v51, %v1439_v42  ;;  %v2630_v22 = vmul.f32 8.0, %v2566_v57  ;;  %v2436_v36 = vceil.f32 %v7977_v37  ;;  %v2500_v32 = vfloor.f32 %v7977_v37 }
 0x23f   :  { %v1378_v38 = vsel %vm1186_vm10, %v1250_v10, %v1314_v53  ;;  %vm1189_vm12 = vcmp.lt.f32.partialorder %v7981_v34, 0.0  ;;  %v1253_v12 = vceil.f32 %v7981_v34  ;;  %v1317_v52 = vfloor.f32 %v7981_v34  ;;  %v9548_v53 = vld [vmem:[#allocation27_spill] sm:$0xff] }
 0x240   :  { %9539 = vst [vmem:[#allocation64_spill] sm:$0xff] %v8167_v14  ;;  %v8174_v18 = vadd.f32 %v2630_v22, %v1444_v23  ;;  %v1442_v43 = vmul.f32 16.0, %v1378_v38  ;;  %v2564_v60 = vsel %vm2372_vm11, %v2436_v36, %v2500_v32  ;;  %vm2375_vm13 = vcmp.lt.f32.partialorder %v7983_v8, 0.0  ;;  %5971 = vmatmul.mubr.bf16.gmra.mrb[116].mxu0 %v7468_v25  ;;  %v9549_v22 = vld [vmem:[#allocation28_spill] sm:$0xff]  ;;  %v9550_v32 = vld [vmem:[#allocation90_spill] sm:$0xff] }
 0x241   :  { %6131 = vmatmul.mubr.bf16.gmra.mrb[116].mxu1 %v7470_v39  ;;  %v2628_v50 = vmul.f32 8.0, %v2564_v60  ;;  %v1381_v4 = vsel %vm1189_vm12, %v1253_v12, %v1317_v52  ;;  %v2439_v37 = vceil.f32 %v7983_v8  ;;  %v2503_v41 = vfloor.f32 %v7983_v8  ;;  %5974 = vmatprep.mubr.bf16.mxu0 %v7472_v35  ;;  %v9552_v60 = vld [vmem:[#allocation91_spill] sm:$0xff] }
 0x242   :  { %9540 = vst [vmem:[#allocation69_spill] sm:$0xff] %v8174_v18  ;;  %6134 = vmatprep.mubr.bf16.mxu1 %v9541_v17  ;;  %v1445_v34 = vmul.f32 16.0, %v1381_v4  ;;  %vm1187_vm14 = vcmp.lt.f32.partialorder %v7988_v48, 0.0  ;;  %v1251_v30 = vceil.f32 %v7988_v48  ;;  %v1315_v62 = vfloor.f32 %v7988_v48  ;;  %v9553_v17 = vld [vmem:[#allocation52_spill] sm:$0xff] }
 0x243   :  { %v8186_v25 = vadd.f32 %v2628_v50, %v1442_v43  ;;  %v2567_v39 = vsel %vm2375_vm13, %v2439_v37, %v2503_v41  ;;  %vm2373_vm15 = vcmp.lt.f32.partialorder %v9543_v20, 0.0  ;;  %v2437_v6 = vceil.f32 %v9543_v20 }
 0x244   :  { %v2631_v47 = vmul.f32 8.0, %v2567_v39  ;;  %v1379_v8 = vsel %vm1187_vm14, %v1251_v30, %v1315_v62  ;;  %v2501_v35 = vfloor.f32 %v9543_v20  ;;  %vm1192_vm0 = vcmp.lt.f32.partialorder %v8013_v13, 0.0 }
 0x245   :  { %9542 = vst [vmem:[#allocation70_spill] sm:$0xff] %v8186_v25  ;;  %v1443_v19 = vmul.f32 16.0, %v1379_v8  ;;  %v1256_v28 = vceil.f32 %v8013_v13  ;;  %v1320_v1 = vfloor.f32 %v8013_v13  ;;  %vm2378_vm1 = vcmp.lt.f32.partialorder %v8015_v31, 0.0  ;;  %v9545_v13 = vld [vmem:[#allocation25_spill] sm:$0xff] }
 0x246   :  { %v8195_v48 = vadd.f32 %v2631_v47, %v1445_v34  ;;  %v2565_v45 = vsel %vm2373_vm15, %v2437_v6, %v2501_v35  ;;  %v2442_v55 = vceil.f32 %v8015_v31  ;;  %v2506_v42 = vfloor.f32 %v8015_v31 }
 0x247   :  { %v2629_v49 = vmul.f32 8.0, %v2565_v45  ;;  %v1384_v2 = vsel %vm1192_vm0, %v1256_v28, %v1320_v1  ;;  %vm1190_vm2 = vcmp.lt.f32.partialorder %v8019_v33, 0.0  ;;  %v1254_v9 = vceil.f32 %v8019_v33  ;;  %v9555_v1 = vld [vmem:[#allocation29_spill] sm:$0xff]  ;;  %v9556_v45 = vld [vmem:[#allocation30_spill] sm:$0xff] }
 0x248   :  { %9544 = vst [vmem:[#allocation71_spill] sm:$0xff] %v8195_v48  ;;  %v1448_v3 = vmul.f32 16.0, %v1384_v2  ;;  %v2570_v24 = vsel %vm2378_vm1, %v2442_v55, %v2506_v42  ;;  %v1318_v51 = vfloor.f32 %v8019_v33  ;;  %vm2376_vm3 = vcmp.lt.f32.partialorder %v8021_v40, 0.0  ;;  %5975 = vmatmul.mubr.bf16.gmra.mrb[120].mxu0 %v9545_v13 }
 0x249   :  { %6135 = vmatmul.mubr.bf16.gmra.mrb[120].mxu1 %v9546_v21  ;;  %v8205_v10 = vadd.f32 %v2629_v49, %v1443_v19  ;;  %v2634_v23 = vmul.f32 8.0, %v2570_v24  ;;  %v2440_v31 = vceil.f32 %v8021_v40  ;;  %v2504_v57 = vfloor.f32 %v8021_v40  ;;  %5978 = vmatprep.mubr.bf16.mxu0 %v9548_v53 }
 0x24a   :  { %6138 = vmatprep.mubr.bf16.mxu1 %v9549_v22  ;;  %v1382_v36 = vsel %vm1190_vm2, %v1254_v9, %v1318_v51  ;;  %vm1193_vm4 = vcmp.lt.f32.partialorder %v9550_v32, 0.0  ;;  %v1257_v33 = vceil.f32 %v9550_v32  ;;  %v1321_v38 = vfloor.f32 %v9550_v32 }
 0x24b   :  { %9547 = vst [vmem:[#allocation74_spill] sm:$0xff] %v8205_v10  ;;  %v8214_v12 = vadd.f32 %v2634_v23, %v1448_v3  ;;  %v1446_v52 = vmul.f32 16.0, %v1382_v36  ;;  %v2568_v43 = vsel %vm2376_vm3, %v2440_v31, %v2504_v57  ;;  %vm2379_vm5 = vcmp.lt.f32.partialorder %v9552_v60, 0.0 }
 0x24c   :  { %v2632_v50 = vmul.f32 8.0, %v2568_v43  ;;  %v1385_v4 = vsel %vm1193_vm4, %v1257_v33, %v1321_v38  ;;  %v2443_v40 = vceil.f32 %v9552_v60  ;;  %v2507_v37 = vfloor.f32 %v9552_v60 }
 0x24d   :  { %9551 = vst [vmem:[#allocation75_spill] sm:$0xff] %v8214_v12  ;;  %v1449_v41 = vmul.f32 16.0, %v1385_v4  ;;  %vm1191_vm6 = vcmp.lt.f32.partialorder %v9553_v17, 0.0  ;;  %v1255_v34 = vceil.f32 %v9553_v17  ;;  %v1319_v30 = vfloor.f32 %v9553_v17 }
 0x24e   :  { %v8222_v62 = vadd.f32 %v2632_v50, %v1446_v52  ;;  %v2571_v39 = vsel %vm2379_vm5, %v2443_v40, %v2507_v37  ;;  %vm2377_vm7 = vcmp.lt.f32.partialorder %v8038_v11, 0.0  ;;  %v2441_v20 = vceil.f32 %v8038_v11 }
 0x24f   :  { %v2635_v6 = vmul.f32 8.0, %v2571_v39  ;;  %v1383_v47 = vsel %vm1191_vm6, %v1255_v34, %v1319_v30  ;;  %v2505_v8 = vfloor.f32 %v8038_v11  ;;  %vm1196_vm8 = vcmp.lt.f32.partialorder %v8060_v44, 0.0 }
 0x250   :  { %9554 = vst [vmem:[#allocation78_spill] sm:$0xff] %v8222_v62  ;;  %v1447_v35 = vmul.f32 16.0, %v1383_v47  ;;  %v1260_v19 = vceil.f32 %v8060_v44  ;;  %v1324_v28 = vfloor.f32 %v8060_v44  ;;  %vm2382_vm9 = vcmp.lt.f32.partialorder %v8062_v7, 0.0  ;;  %5979 = vmatmul.mubr.bf16.gmra.mrb[124].mxu0 %v9555_v1 }
 0x251   :  { %6139 = vmatmul.mubr.bf16.gmra.mrb[124].mxu1 %v9556_v45  ;;  %v8233_v55 = vadd.f32 %v2635_v6, %v1449_v41  ;;  %v2569_v42 = vsel %vm2377_vm7, %v2441_v20, %v2505_v8  ;;  %v2446_v49 = vceil.f32 %v8062_v7  ;;  %v2510_v11 = vfloor.f32 %v8062_v7 }
 0x252   :  { %v2633_v2 = vmul.f32 8.0, %v2569_v42  ;;  %v1388_v9 = vsel %vm1196_vm8, %v1260_v19, %v1324_v28  ;;  %vm1194_vm10 = vcmp.lt.f32.partialorder %v8067_v26, 0.0  ;;  %v1258_v3 = vceil.f32 %v8067_v26 }
 0x253   :  { %9557 = vst [vmem:[#allocation79_spill] sm:$0xff] %v8233_v55  ;;  %v1452_v44 = vmul.f32 16.0, %v1388_v9  ;;  %v2574_v24 = vsel %vm2382_vm9, %v2446_v49, %v2510_v11  ;;  %v1322_v51 = vfloor.f32 %v8067_v26  ;;  %vm2380_vm11 = vcmp.lt.f32.partialorder %v8069_v61, 0.0 }
 0x254   :  { %v8241_v13 = vadd.f32 %v2633_v2, %v1447_v35  ;;  %v2638_v21 = vmul.f32 8.0, %v2574_v24  ;;  %v2444_v23 = vceil.f32 %v8069_v61  ;;  %v2508_v31 = vfloor.f32 %v8069_v61 }
 0x255   :  { %v1386_v7 = vsel %vm1194_vm10, %v1258_v3, %v1322_v51  ;;  %vm1197_vm12 = vcmp.lt.f32.partialorder %v8075_v5, 0.0  ;;  %v1261_v57 = vceil.f32 %v8075_v5  ;;  %v1325_v53 = vfloor.f32 %v8075_v5 }
 0x256   :  { %9558 = vst [vmem:[#allocation82_spill] sm:$0xff] %v8241_v13  ;;  %v8248_v22 = vadd.f32 %v2638_v21, %v1452_v44  ;;  %v1450_v36 = vmul.f32 16.0, %v1386_v7  ;;  %v2572_v26 = vsel %vm2380_vm11, %v2444_v23, %v2508_v31  ;;  %vm2383_vm13 = vcmp.lt.f32.partialorder %v8077_v0, 0.0  ;;  %v9563_v7 = vld [vmem:[#allocation31_spill] sm:$0xff] }
 0x257   :  { %v2636_v32 = vmul.f32 8.0, %v2572_v26  ;;  %v1389_v33 = vsel %vm1197_vm12, %v1261_v57, %v1325_v53  ;;  %v2447_v38 = vceil.f32 %v8077_v0  ;;  %v2511_v52 = vfloor.f32 %v8077_v0  ;;  %v8270_v26 = vld [vmem:[%s9051_s3] ss:$0 sm:$0xff] }
 0x258   :  { %9559 = vst [vmem:[#allocation83_spill] sm:$0xff] %v8248_v22  ;;  %v1453_v61 = vmul.f32 16.0, %v1389_v33  ;;  %vm1195_vm14 = vcmp.lt.f32.partialorder %v8083_v59, 0.0  ;;  %v1259_v43 = vceil.f32 %v8083_v59  ;;  %v1323_v60 = vfloor.f32 %v8083_v59 }
 0x259   :  { %v8256_v5 = vadd.f32 %v2636_v32, %v1450_v36  ;;  %v2575_v50 = vsel %vm2383_vm13, %v2447_v38, %v2511_v52  ;;  %vm2381_vm15 = vcmp.lt.f32.partialorder %v8085_v29, 0.0  ;;  %v2445_v4 = vceil.f32 %v8085_v29 }
 0x25a   :  { %v2639_v40 = vmul.f32 8.0, %v2575_v50  ;;  %v1387_v37 = vsel %vm1195_vm14, %v1259_v43, %v1323_v60  ;;  %v2509_v41 = vfloor.f32 %v8085_v29  ;;  %v9564_v43 = vld [vmem:[#allocation32_spill] sm:$0xff] }
 0x25b   :  { %9560 = vst [vmem:[#allocation86_spill] sm:$0xff] %v8256_v5  ;;  %v1451_v17 = vmul.f32 16.0, %v1387_v37 }
 0x25c   :  { %v8261_v0 = vadd.f32 %v2639_v40, %v1453_v61  ;;  %v2573_v34 = vsel %vm2381_vm15, %v2445_v4, %v2509_v41 }
 0x25d   :  { %v2637_v30 = vmul.f32 8.0, %v2573_v34 }
 0x25e   :  { %9561 = vst [vmem:[#allocation87_spill] sm:$0xff] %v8261_v0 }
 0x25f   :  { %v8263_v39 = vadd.f32 %v2637_v30, %v1451_v17 }
 0x261   :  { %9562 = vst [vmem:[#allocation12_spill] sm:$0xff] %v8263_v39 }
 0x2ab   :  { %v5920_v20 = vpop.f32.mrb[64].mxu0  ;;  %v6080_v59 = vpop.f32.mrb[64].mxu1 }
 0x2ac   :  { %vm3508_vm0 = vcmp.lt.f32.partialorder %v5920_v20, 0.0  ;;  %v3572_v6 = vceil.f32 %v5920_v20  ;;  %v3636_v47 = vfloor.f32 %v5920_v20  ;;  %vm4630_vm1 = vcmp.lt.f32.partialorder %v6080_v59, 0.0  ;;  %v3251_v8 = vpop.f32.mrb[65].mxu0  ;;  %v4373_v35 = vpop.f32.mrb[65].mxu1 }
 0x2ad   :  { %v4694_v19 = vceil.f32 %v6080_v59  ;;  %v4758_v28 = vfloor.f32 %v6080_v59  ;;  %vm3506_vm2 = vcmp.lt.f32.partialorder %v3251_v8, 0.0  ;;  %v3570_v1 = vceil.f32 %v3251_v8  ;;  %v5921_v29 = vpop.f32.mrb[66].mxu0  ;;  %v6081_v45 = vpop.f32.mrb[66].mxu1 }
 0x2ae   :  { %v3700_v42 = vsel %vm3508_vm0, %v3572_v6, %v3636_v47  ;;  %v3634_v49 = vfloor.f32 %v3251_v8  ;;  %vm4628_vm3 = vcmp.lt.f32.partialorder %v4373_v35, 0.0  ;;  %v4692_v11 = vceil.f32 %v4373_v35  ;;  %v3254_v2 = vpop.f32.mrb[67].mxu0  ;;  %v4376_v9 = vpop.f32.mrb[67].mxu1  ;;  %v9565_v6 = vld [vmem:[#allocation33_spill] sm:$0xff] }
 0x2af   :  { %v3764_v3 = vmul.f32 4.0, %v3700_v42  ;;  %v4822_v44 = vsel %vm4630_vm1, %v4694_v19, %v4758_v28  ;;  %v4756_v24 = vfloor.f32 %v4373_v35  ;;  %vm3509_vm4 = vcmp.lt.f32.partialorder %v5921_v29, 0.0 }
 0x2b0   :  { %v4886_v51 = vmul.f32 2.0, %v4822_v44  ;;  %v3698_v21 = vsel %vm3506_vm2, %v3570_v1, %v3634_v49  ;;  %v3573_v23 = vceil.f32 %v5921_v29  ;;  %v3637_v31 = vfloor.f32 %v5921_v29 }
 0x2b1   :  { %v3828_v57 = vadd.f32 %v3764_v3, %v9563_v7  ;;  %v3762_v53 = vmul.f32 4.0, %v3698_v21  ;;  %v4820_v36 = vsel %vm4628_vm3, %v4692_v11, %v4756_v24  ;;  %vm4631_vm5 = vcmp.lt.f32.partialorder %v6081_v45, 0.0 }
 0x2b2   :  { %v4884_v32 = vmul.f32 2.0, %v4820_v36  ;;  %v3701_v33 = vsel %vm3509_vm4, %v3573_v23, %v3637_v31  ;;  %v4695_v38 = vceil.f32 %v6081_v45  ;;  %v4759_v52 = vfloor.f32 %v6081_v45  ;;  %v9566_v23 = vld [vmem:[#allocation34_spill] sm:$0xff] }
 0x2b3   :  { %v4950_v61 = vadd.f32 %v4886_v51, %v3828_v57  ;;  %v3826_v60 = vadd.f32 %v3762_v53, %v9564_v43  ;;  %v3765_v50 = vmul.f32 4.0, %v3701_v33  ;;  %vm3507_vm6 = vcmp.lt.f32.partialorder %v3254_v2, 0.0  ;;  %v5924_v4 = vpop.f32.mrb[68].mxu0  ;;  %v6084_v40 = vpop.f32.mrb[68].mxu1 }
 0x2b4   :  { %v4823_v37 = vsel %vm4631_vm5, %v4695_v38, %v4759_v52  ;;  %v3571_v41 = vceil.f32 %v3254_v2  ;;  %v3635_v17 = vfloor.f32 %v3254_v2  ;;  %vm4629_vm7 = vcmp.lt.f32.partialorder %v4376_v9, 0.0  ;;  %v3267_v34 = vpop.f32.mrb[69].mxu0  ;;  %v4389_v30 = vpop.f32.mrb[69].mxu1 }
 0x2b5   :  { %v5021_v20 = vadd.f32 %v8270_v26, %v4950_v61  ;;  %v4948_v59 = vadd.f32 %v4884_v32, %v3826_v60  ;;  %v3829_v47 = vadd.f32 %v3765_v50, %v9565_v6  ;;  %v4887_v8 = vmul.f32 2.0, %v4823_v37  ;;  %v5925_v35 = vpop.f32.mrb[70].mxu0  ;;  %v8275_v19 = vpop.f32.mrb[70].mxu1 }
 0x2b6   :  { %v3699_v28 = vsel %vm3507_vm6, %v3571_v41, %v3635_v17  ;;  %v4693_v1 = vceil.f32 %v4376_v9  ;;  %v4757_v29 = vfloor.f32 %v4376_v9  ;;  %vm3512_vm8 = vcmp.lt.f32.partialorder %v5924_v4, 0.0  ;;  %v8277_v45 = vpop.f32.mrb[71].mxu0  ;;  %v8279_v42 = vpop.f32.mrb[71].mxu1  ;;  %v9567_v17 = vld [vmem:[#allocation35_spill] sm:$0xff] }
 0x2b7   :  { %5085 = vst [vmem:[#allocation8 + $0x10] sm:$0xff] %v5021_v20  ;;  %v5019_v49 = vadd.f32 %v8270_v26, %v4948_v59  ;;  %v4951_v11 = vadd.f32 %v4887_v8, %v3829_v47  ;;  %v3763_v2 = vmul.f32 4.0, %v3699_v28  ;;  %v3576_v3 = vceil.f32 %v5924_v4 }
 0x2b8   :  { %v4821_v44 = vsel %vm4629_vm7, %v4693_v1, %v4757_v29  ;;  %v3640_v24 = vfloor.f32 %v5924_v4  ;;  %vm4634_vm9 = vcmp.lt.f32.partialorder %v6084_v40, 0.0  ;;  %v4698_v51 = vceil.f32 %v6084_v40 }
 0x2b9   :  { %5083 = vst [vmem:[#allocation8] sm:$0xff] %v5019_v49  ;;  %v5022_v21 = vadd.f32 %v8270_v26, %v4951_v11  ;;  %v3827_v31 = vadd.f32 %v3763_v2, %v9566_v23  ;;  %v4885_v7 = vmul.f32 2.0, %v4821_v44  ;;  %v4762_v57 = vfloor.f32 %v6084_v40  ;;  %v9568_v49 = vld [vmem:[#allocation36_spill] sm:$0xff] }
 0x2ba   :  { %v3704_v53 = vsel %vm3512_vm8, %v3576_v3, %v3640_v24  ;;  %vm3510_vm10 = vcmp.lt.f32.partialorder %v3267_v34, 0.0  ;;  %v3574_v36 = vceil.f32 %v3267_v34  ;;  %v3638_v32 = vfloor.f32 %v3267_v34 }
 0x2bb   :  { %5086 = vst [vmem:[#allocation8 + $0x18] sm:$0xff] %v5022_v21  ;;  %v4949_v33 = vadd.f32 %v4885_v7, %v3827_v31  ;;  %v3768_v38 = vmul.f32 4.0, %v3704_v53  ;;  %v4826_v9 = vsel %vm4634_vm9, %v4698_v51, %v4762_v57  ;;  %vm4632_vm11 = vcmp.lt.f32.partialorder %v4389_v30, 0.0  ;;  %v8286_v52 = vpop.f32.mrb[72].mxu0 }
 0x2bc   :  { %v8288_v61 = vpop.f32.mrb[72].mxu1  ;;  %v4890_v43 = vmul.f32 2.0, %v4826_v9  ;;  %v3702_v60 = vsel %vm3510_vm10, %v3574_v36, %v3638_v32  ;;  %v4696_v50 = vceil.f32 %v4389_v30  ;;  %v4760_v37 = vfloor.f32 %v4389_v30  ;;  %v8290_v41 = vpop.f32.mrb[73].mxu0  ;;  %v9569_v32 = vld [vmem:[#allocation37_spill] sm:$0xff] }
 0x2bd   :  { %v8292_v4 = vpop.f32.mrb[73].mxu1  ;;  %v5020_v40 = vadd.f32 %v8270_v26, %v4949_v33  ;;  %v3832_v34 = vadd.f32 %v3768_v38, %v9567_v17  ;;  %v3766_v20 = vmul.f32 4.0, %v3702_v60  ;;  %vm3513_vm12 = vcmp.lt.f32.partialorder %v5925_v35, 0.0  ;;  %v8296_v59 = vpop.f32.mrb[74].mxu0 }
 0x2be   :  { %v8298_v6 = vpop.f32.mrb[74].mxu1  ;;  %v4824_v47 = vsel %vm4632_vm11, %v4696_v50, %v4760_v37  ;;  %v3577_v8 = vceil.f32 %v5925_v35  ;;  %v3641_v28 = vfloor.f32 %v5925_v35  ;;  %vm4635_vm13 = vcmp.lt.f32.partialorder %v8275_v19, 0.0  ;;  %v8301_v30 = vpop.f32.mrb[75].mxu0 }
 0x2bf   :  { %v8303_v1 = vpop.f32.mrb[75].mxu1  ;;  %5084 = vst [vmem:[#allocation8 + $0x8] sm:$0xff] %v5020_v40  ;;  %v4954_v29 = vadd.f32 %v4890_v43, %v3832_v34  ;;  %v3830_v11 = vadd.f32 %v3766_v20, %v9568_v49  ;;  %v4888_v2 = vmul.f32 2.0, %v4824_v47  ;;  %v4699_v3 = vceil.f32 %v8275_v19 }
 0x2c0   :  { %v3705_v44 = vsel %vm3513_vm12, %v3577_v8, %v3641_v28  ;;  %v4763_v24 = vfloor.f32 %v8275_v19  ;;  %vm3511_vm14 = vcmp.lt.f32.partialorder %v8277_v45, 0.0  ;;  %v3575_v35 = vceil.f32 %v8277_v45  ;;  %v9570_v8 = vld [vmem:[#allocation38_spill] sm:$0xff] }
 0x2c1   :  { %v5025_v51 = vadd.f32 %v8270_v26, %v4954_v29  ;;  %v4952_v21 = vadd.f32 %v4888_v2, %v3830_v11  ;;  %v3769_v23 = vmul.f32 4.0, %v3705_v44  ;;  %v3639_v31 = vfloor.f32 %v8277_v45 }
 0x2c2   :  { %v4827_v7 = vsel %vm4635_vm13, %v4699_v3, %v4763_v24  ;;  %vm4633_vm15 = vcmp.lt.f32.partialorder %v8279_v42, 0.0  ;;  %v4697_v57 = vceil.f32 %v8279_v42  ;;  %v4761_v53 = vfloor.f32 %v8279_v42 }
 0x2c3   :  { %5089 = vst [vmem:[#allocation8 + $0x30] sm:$0xff] %v5025_v51  ;;  %v5023_v36 = vadd.f32 %v8270_v26, %v4952_v21  ;;  %v3833_v33 = vadd.f32 %v3769_v23, %v9569_v32  ;;  %v4891_v38 = vmul.f32 2.0, %v4827_v7  ;;  %v3703_v9 = vsel %vm3511_vm14, %v3575_v35, %v3639_v31  ;;  %v8319_v43 = vpop.f32.mrb[76].mxu0 }
 0x2c4   :  { %v8321_v60 = vpop.f32.mrb[76].mxu1  ;;  %v3767_v45 = vmul.f32 4.0, %v3703_v9  ;;  %v4825_v19 = vsel %vm4633_vm15, %v4697_v57, %v4761_v53  ;;  %vm3516_vm0 = vcmp.lt.f32.partialorder %v8286_v52, 0.0  ;;  %v3580_v50 = vceil.f32 %v8286_v52  ;;  %v8325_v37 = vpop.f32.mrb[77].mxu0 }
 0x2c5   :  { %v8327_v42 = vpop.f32.mrb[77].mxu1  ;;  %5087 = vst [vmem:[#allocation8 + $0x20] sm:$0xff] %v5023_v36  ;;  %v4955_v40 = vadd.f32 %v4891_v38, %v3833_v33  ;;  %v4889_v17 = vmul.f32 2.0, %v4825_v19  ;;  %v3644_v34 = vfloor.f32 %v8286_v52  ;;  %vm4638_vm1 = vcmp.lt.f32.partialorder %v8288_v61, 0.0  ;;  %v8331_v20 = vpop.f32.mrb[78].mxu0  ;;  %v9571_v52 = vld [vmem:[#allocation39_spill] sm:$0xff] }
 0x2c6   :  { %v8333_v47 = vpop.f32.mrb[78].mxu1  ;;  %v3831_v28 = vadd.f32 %v3767_v45, %v9570_v8  ;;  %v4702_v29 = vceil.f32 %v8288_v61  ;;  %v4766_v49 = vfloor.f32 %v8288_v61  ;;  %vm3514_vm2 = vcmp.lt.f32.partialorder %v8290_v41, 0.0  ;;  %v8339_v11 = vpop.f32.mrb[79].mxu0  ;;  %v9572_v19 = vld [vmem:[#allocation40_spill] sm:$0xff] }
 0x2c7   :  { %v8341_v2 = vpop.f32.mrb[79].mxu1  ;;  %v5026_v3 = vadd.f32 %v8270_v26, %v4955_v40  ;;  %v3708_v44 = vsel %vm3516_vm0, %v3580_v50, %v3644_v34  ;;  %v3578_v24 = vceil.f32 %v8290_v41  ;;  %v3642_v35 = vfloor.f32 %v8290_v41 }
 0x2c8   :  { %v4953_v51 = vadd.f32 %v4889_v17, %v3831_v28  ;;  %v3772_v21 = vmul.f32 4.0, %v3708_v44  ;;  %v4830_v23 = vsel %vm4638_vm1, %v4702_v29, %v4766_v49  ;;  %vm4636_vm3 = vcmp.lt.f32.partialorder %v8292_v4, 0.0 }
 0x2c9   :  { %5090 = vst [vmem:[#allocation8 + $0x38] sm:$0xff] %v5026_v3  ;;  %v4894_v61 = vmul.f32 2.0, %v4830_v23  ;;  %v3706_v31 = vsel %vm3514_vm2, %v3578_v24, %v3642_v35  ;;  %v4700_v7 = vceil.f32 %v8292_v4  ;;  %v4764_v57 = vfloor.f32 %v8292_v4 }
 0x2ca   :  { %v5024_v53 = vadd.f32 %v8270_v26, %v4953_v51  ;;  %v3836_v36 = vadd.f32 %v3772_v21, %v9571_v52  ;;  %v3770_v32 = vmul.f32 4.0, %v3706_v31  ;;  %vm3517_vm4 = vcmp.lt.f32.partialorder %v8296_v59, 0.0 }
 0x2cb   :  { %v4828_v41 = vsel %vm4636_vm3, %v4700_v7, %v4764_v57  ;;  %v3581_v33 = vceil.f32 %v8296_v59  ;;  %v3645_v38 = vfloor.f32 %v8296_v59  ;;  %vm4639_vm5 = vcmp.lt.f32.partialorder %v8298_v6, 0.0  ;;  %v8357_v9 = vpop.f32.mrb[80].mxu0 }
 0x2cc   :  { %v8359_v45 = vpop.f32.mrb[80].mxu1  ;;  %5088 = vst [vmem:[#allocation8 + $0x28] sm:$0xff] %v5024_v53  ;;  %v4958_v4 = vadd.f32 %v4894_v61, %v3836_v36  ;;  %v3834_v50 = vadd.f32 %v3770_v32, %v9572_v19  ;;  %v4892_v40 = vmul.f32 2.0, %v4828_v41  ;;  %v4703_v17 = vceil.f32 %v8298_v6  ;;  %v8363_v34 = vpop.f32.mrb[81].mxu0  ;;  %v9573_v53 = vld [vmem:[#allocation41_spill] sm:$0xff]  ;;  %v9574_v19 = vld [vmem:[#allocation42_spill] sm:$0xff] }
 0x2cd   :  { %v8365_v8 = vpop.f32.mrb[81].mxu1  ;;  %v3709_v28 = vsel %vm3517_vm4, %v3581_v33, %v3645_v38  ;;  %v4767_v59 = vfloor.f32 %v8298_v6  ;;  %vm3515_vm6 = vcmp.lt.f32.partialorder %v8301_v30, 0.0  ;;  %v3579_v29 = vceil.f32 %v8301_v30  ;;  %v8370_v49 = vpop.f32.mrb[82].mxu0 }
 0x2ce   :  { %v8372_v3 = vpop.f32.mrb[82].mxu1  ;;  %v5029_v44 = vadd.f32 %v8270_v26, %v4958_v4  ;;  %v4956_v24 = vadd.f32 %v4892_v40, %v3834_v50  ;;  %v3773_v35 = vmul.f32 4.0, %v3709_v28  ;;  %v3643_v51 = vfloor.f32 %v8301_v30  ;;  %v8376_v21 = vpop.f32.mrb[83].mxu0 }
 0x2cf   :  { %v8378_v23 = vpop.f32.mrb[83].mxu1  ;;  %v4831_v61 = vsel %vm4639_vm5, %v4703_v17, %v4767_v59  ;;  %vm4637_vm7 = vcmp.lt.f32.partialorder %v8303_v1, 0.0  ;;  %v4701_v31 = vceil.f32 %v8303_v1  ;;  %v4765_v7 = vfloor.f32 %v8303_v1 }
 0x2d0   :  { %5093 = vst [vmem:[#allocation8 + $0x50] sm:$0xff] %v5029_v44  ;;  %v5027_v57 = vadd.f32 %v8270_v26, %v4956_v24  ;;  %v3837_v52 = vadd.f32 %v3773_v35, %v9573_v53  ;;  %v4895_v36 = vmul.f32 2.0, %v4831_v61  ;;  %v3707_v32 = vsel %vm3515_vm6, %v3579_v29, %v3643_v51 }
 0x2d1   :  { %v3771_v41 = vmul.f32 4.0, %v3707_v32  ;;  %v4829_v33 = vsel %vm4637_vm7, %v4701_v31, %v4765_v7  ;;  %vm3520_vm8 = vcmp.lt.f32.partialorder %v8319_v43, 0.0  ;;  %v3584_v6 = vceil.f32 %v8319_v43 }
 0x2d2   :  { %5091 = vst [vmem:[#allocation8 + $0x40] sm:$0xff] %v5027_v57  ;;  %v4959_v38 = vadd.f32 %v4895_v36, %v3837_v52  ;;  %v4893_v4 = vmul.f32 2.0, %v4829_v33  ;;  %v3648_v1 = vfloor.f32 %v8319_v43  ;;  %vm4642_vm9 = vcmp.lt.f32.partialorder %v8321_v60, 0.0 }
 0x2d3   :  { %v3835_v50 = vadd.f32 %v3771_v41, %v9574_v19  ;;  %v4706_v40 = vceil.f32 %v8321_v60  ;;  %v4770_v30 = vfloor.f32 %v8321_v60  ;;  %vm3518_vm10 = vcmp.lt.f32.partialorder %v8325_v37, 0.0  ;;  %v8397_v17 = vpop.f32.mrb[84].mxu0 }
 0x2d4   :  { %v8399_v28 = vpop.f32.mrb[84].mxu1  ;;  %v5030_v59 = vadd.f32 %v8270_v26, %v4959_v38  ;;  %v3712_v29 = vsel %vm3520_vm8, %v3584_v6, %v3648_v1  ;;  %v3582_v44 = vceil.f32 %v8325_v37  ;;  %v3646_v43 = vfloor.f32 %v8325_v37  ;;  %v8404_v24 = vpop.f32.mrb[85].mxu0  ;;  %v9575_v6 = vld [vmem:[#allocation43_spill] sm:$0xff] }
 0x2d5   :  { %v8406_v35 = vpop.f32.mrb[85].mxu1  ;;  %v4957_v51 = vadd.f32 %v4893_v4, %v3835_v50  ;;  %v3776_v61 = vmul.f32 4.0, %v3712_v29  ;;  %v4834_v60 = vsel %vm4642_vm9, %v4706_v40, %v4770_v30  ;;  %vm4640_vm11 = vcmp.lt.f32.partialorder %v8327_v42, 0.0  ;;  %v8409_v31 = vpop.f32.mrb[86].mxu0  ;;  %v9576_v50 = vld [vmem:[#allocation44_spill] sm:$0xff] }
 0x2d6   :  { %v8411_v7 = vpop.f32.mrb[86].mxu1  ;;  %5094 = vst [vmem:[#allocation8 + $0x58] sm:$0xff] %v5030_v59  ;;  %v4898_v57 = vmul.f32 2.0, %v4834_v60  ;;  %v3710_v53 = vsel %vm3518_vm10, %v3582_v44, %v3646_v43  ;;  %v4704_v52 = vceil.f32 %v8327_v42  ;;  %v4768_v36 = vfloor.f32 %v8327_v42  ;;  %v8417_v32 = vpop.f32.mrb[87].mxu0 }
 0x2d7   :  { %v8419_v41 = vpop.f32.mrb[87].mxu1  ;;  %v5028_v33 = vadd.f32 %v8270_v26, %v4957_v51  ;;  %v3840_v38 = vadd.f32 %v3776_v61, %v9575_v6  ;;  %v3774_v4 = vmul.f32 4.0, %v3710_v53  ;;  %vm3521_vm12 = vcmp.lt.f32.partialorder %v8331_v20, 0.0 }
 0x2d8   :  { %v4832_v1 = vsel %vm4640_vm11, %v4704_v52, %v4768_v36  ;;  %v3585_v19 = vceil.f32 %v8331_v20  ;;  %v3649_v37 = vfloor.f32 %v8331_v20  ;;  %vm4643_vm13 = vcmp.lt.f32.partialorder %v8333_v47, 0.0 }
 0x2d9   :  { %5092 = vst [vmem:[#allocation8 + $0x48] sm:$0xff] %v5028_v33  ;;  %v4962_v42 = vadd.f32 %v4898_v57, %v3840_v38  ;;  %v3838_v40 = vadd.f32 %v3774_v4, %v9576_v50  ;;  %v4896_v30 = vmul.f32 2.0, %v4832_v1  ;;  %v4707_v59 = vceil.f32 %v8333_v47  ;;  %v9577_v1 = vld [vmem:[#allocation45_spill] sm:$0xff] }
 0x2da   :  { %v3713_v29 = vsel %vm3521_vm12, %v3585_v19, %v3649_v37  ;;  %v4771_v44 = vfloor.f32 %v8333_v47  ;;  %vm3519_vm14 = vcmp.lt.f32.partialorder %v8339_v11, 0.0  ;;  %v3583_v43 = vceil.f32 %v8339_v11 }
 0x2db   :  { %v5033_v51 = vadd.f32 %v8270_v26, %v4962_v42  ;;  %v4960_v61 = vadd.f32 %v4896_v30, %v3838_v40  ;;  %v3777_v20 = vmul.f32 4.0, %v3713_v29  ;;  %v3647_v60 = vfloor.f32 %v8339_v11  ;;  %v8434_v53 = vpop.f32.mrb[88].mxu0 }
 0x2dc   :  { %v8436_v57 = vpop.f32.mrb[88].mxu1  ;;  %v4835_v52 = vsel %vm4643_vm13, %v4707_v59, %v4771_v44  ;;  %vm4641_vm15 = vcmp.lt.f32.partialorder %v8341_v2, 0.0  ;;  %v4705_v36 = vceil.f32 %v8341_v2  ;;  %v4769_v33 = vfloor.f32 %v8341_v2  ;;  %v8443_v6 = vpop.f32.mrb[89].mxu0 }
 0x2dd   :  { %v8445_v38 = vpop.f32.mrb[89].mxu1  ;;  %5097 = vst [vmem:[#allocation8 + $0x70] sm:$0xff] %v5033_v51  ;;  %v5031_v4 = vadd.f32 %v8270_v26, %v4960_v61  ;;  %v3841_v19 = vadd.f32 %v3777_v20, %v9577_v1  ;;  %v4899_v37 = vmul.f32 2.0, %v4835_v52  ;;  %v3711_v47 = vsel %vm3519_vm14, %v3583_v43, %v3647_v60  ;;  %v8451_v42 = vpop.f32.mrb[90].mxu0  ;;  %v9578_v43 = vld [vmem:[#allocation46_spill] sm:$0xff] }
 0x2de   :  { %v8453_v50 = vpop.f32.mrb[90].mxu1  ;;  %v3775_v40 = vmul.f32 4.0, %v3711_v47  ;;  %v4833_v30 = vsel %vm4641_vm15, %v4705_v36, %v4769_v33  ;;  %vm3524_vm0 = vcmp.lt.f32.partialorder %v8357_v9, 0.0  ;;  %v3588_v2 = vceil.f32 %v8357_v9  ;;  %v8457_v59 = vpop.f32.mrb[91].mxu0 }
 0x2df   :  { %v8459_v29 = vpop.f32.mrb[91].mxu1  ;;  %5095 = vst [vmem:[#allocation8 + $0x60] sm:$0xff] %v5031_v4  ;;  %v4963_v44 = vadd.f32 %v4899_v37, %v3841_v19  ;;  %v4897_v51 = vmul.f32 2.0, %v4833_v30  ;;  %v3652_v11 = vfloor.f32 %v8357_v9  ;;  %vm4646_vm1 = vcmp.lt.f32.partialorder %v8359_v45, 0.0 }
 0x2e0   :  { %v3839_v61 = vadd.f32 %v3775_v40, %v9578_v43  ;;  %v4710_v20 = vceil.f32 %v8359_v45  ;;  %v4774_v60 = vfloor.f32 %v8359_v45  ;;  %vm3522_vm2 = vcmp.lt.f32.partialorder %v8363_v34, 0.0 }
 0x2e1   :  { %v5034_v52 = vadd.f32 %v8270_v26, %v4963_v44  ;;  %v3716_v36 = vsel %vm3524_vm0, %v3588_v2, %v3652_v11  ;;  %v3586_v33 = vceil.f32 %v8363_v34  ;;  %v3650_v4 = vfloor.f32 %v8363_v34  ;;  %v9579_v11 = vld [vmem:[#allocation47_spill] sm:$0xff] }
 0x2e2   :  { %v4961_v1 = vadd.f32 %v4897_v51, %v3839_v61  ;;  %v3780_v19 = vmul.f32 4.0, %v3716_v36  ;;  %v4838_v9 = vsel %vm4646_vm1, %v4710_v20, %v4774_v60  ;;  %vm4644_vm3 = vcmp.lt.f32.partialorder %v8365_v8, 0.0 }
 0x2e3   :  { %5098 = vst [vmem:[#allocation8 + $0x78] sm:$0xff] %v5034_v52  ;;  %v4902_v37 = vmul.f32 2.0, %v4838_v9  ;;  %v3714_v47 = vsel %vm3522_vm2, %v3586_v33, %v3650_v4  ;;  %v4708_v40 = vceil.f32 %v8365_v8  ;;  %v4772_v45 = vfloor.f32 %v8365_v8  ;;  %v8473_v30 = vpop.f32.mrb[92].mxu0  ;;  %v9580_v4 = vld [vmem:[#allocation48_spill] sm:$0xff] }
 0x2e4   :  { %v8475_v44 = vpop.f32.mrb[92].mxu1  ;;  %v5032_v2 = vadd.f32 %v8270_v26, %v4961_v1  ;;  %v3844_v34 = vadd.f32 %v3780_v19, %v9579_v11  ;;  %v3778_v51 = vmul.f32 4.0, %v3714_v47  ;;  %vm3525_vm4 = vcmp.lt.f32.partialorder %v8370_v49, 0.0  ;;  %v8480_v43 = vpop.f32.mrb[93].mxu0 }
 0x2e5   :  { %v8482_v61 = vpop.f32.mrb[93].mxu1  ;;  %v4836_v20 = vsel %vm4644_vm3, %v4708_v40, %v4772_v45  ;;  %v3589_v60 = vceil.f32 %v8370_v49  ;;  %v3653_v8 = vfloor.f32 %v8370_v49  ;;  %vm4647_vm5 = vcmp.lt.f32.partialorder %v8372_v3, 0.0  ;;  %v8487_v52 = vpop.f32.mrb[94].mxu0 }
 0x2e6   :  { %v8489_v36 = vpop.f32.mrb[94].mxu1  ;;  %5096 = vst [vmem:[#allocation8 + $0x68] sm:$0xff] %v5032_v2  ;;  %v4966_v33 = vadd.f32 %v4902_v37, %v3844_v34  ;;  %v3842_v1 = vadd.f32 %v3778_v51, %v9580_v4  ;;  %v4900_v19 = vmul.f32 2.0, %v4836_v20  ;;  %v4711_v9 = vceil.f32 %v8372_v3  ;;  %v8493_v47 = vpop.f32.mrb[95].mxu0  ;;  %v9581_v4 = vld [vmem:[#allocation49_spill] sm:$0xff] }
 0x2e7   :  { %v8495_v40 = vpop.f32.mrb[95].mxu1  ;;  %v3717_v45 = vsel %vm3525_vm4, %v3589_v60, %v3653_v8  ;;  %v4775_v11 = vfloor.f32 %v8372_v3  ;;  %vm3523_vm6 = vcmp.lt.f32.partialorder %v8376_v21, 0.0  ;;  %v3587_v39 = vceil.f32 %v8376_v21 }
 0x2e8   :  { %v5037_v37 = vadd.f32 %v8270_v26, %v4966_v33  ;;  %v4964_v2 = vadd.f32 %v4900_v19, %v3842_v1  ;;  %v3781_v34 = vmul.f32 4.0, %v3717_v45  ;;  %v3651_v51 = vfloor.f32 %v8376_v21 }
 0x2e9   :  { %v4839_v20 = vsel %vm4647_vm5, %v4711_v9, %v4775_v11  ;;  %vm4645_vm7 = vcmp.lt.f32.partialorder %v8378_v23, 0.0  ;;  %v4709_v49 = vceil.f32 %v8378_v23  ;;  %v4773_v60 = vfloor.f32 %v8378_v23 }
 0x2ea   :  { %5101 = vst [vmem:[#allocation8 + $0x90] sm:$0xff] %v5037_v37  ;;  %v5035_v8 = vadd.f32 %v8270_v26, %v4964_v2  ;;  %v3845_v0 = vadd.f32 %v3781_v34, %v9581_v4  ;;  %v4903_v5 = vmul.f32 2.0, %v4839_v20  ;;  %v3715_v33 = vsel %vm3523_vm6, %v3587_v39, %v3651_v51  ;;  %v9582_v2 = vld [vmem:[#allocation50_spill] sm:$0xff] }
 0x2eb   :  { %v3779_v1 = vmul.f32 4.0, %v3715_v33  ;;  %v4837_v19 = vsel %vm4645_vm7, %v4709_v49, %v4773_v60  ;;  %vm3528_vm8 = vcmp.lt.f32.partialorder %v8397_v17, 0.0  ;;  %v3592_v3 = vceil.f32 %v8397_v17  ;;  %v8513_v21 = vpop.f32.mrb[96].mxu0 }
 0x2ec   :  { %v8515_v9 = vpop.f32.mrb[96].mxu1  ;;  %5099 = vst [vmem:[#allocation8 + $0x80] sm:$0xff] %v5035_v8  ;;  %v4967_v45 = vadd.f32 %v4903_v5, %v3845_v0  ;;  %v4901_v23 = vmul.f32 2.0, %v4837_v19  ;;  %v3656_v11 = vfloor.f32 %v8397_v17  ;;  %vm4650_vm9 = vcmp.lt.f32.partialorder %v8399_v28, 0.0  ;;  %v8519_v37 = vpop.f32.mrb[97].mxu0 }
 0x2ed   :  { %v8521_v39 = vpop.f32.mrb[97].mxu1  ;;  %v3843_v34 = vadd.f32 %v3779_v1, %v9582_v2  ;;  %v4714_v51 = vceil.f32 %v8399_v28  ;;  %v4778_v20 = vfloor.f32 %v8399_v28  ;;  %vm3526_vm10 = vcmp.lt.f32.partialorder %v8404_v24, 0.0  ;;  %v8527_v49 = vpop.f32.mrb[98].mxu0 }
 0x2ee   :  { %v8529_v5 = vpop.f32.mrb[98].mxu1  ;;  %v5038_v0 = vadd.f32 %v8270_v26, %v4967_v45  ;;  %v3720_v60 = vsel %vm3528_vm8, %v3592_v3, %v3656_v11  ;;  %v3590_v8 = vceil.f32 %v8404_v24  ;;  %v3654_v4 = vfloor.f32 %v8404_v24  ;;  %v8536_v33 = vpop.f32.mrb[99].mxu0  ;;  %v9583_v11 = vld [vmem:[#allocation51_spill] sm:$0xff] }
 0x2ef   :  { %v8538_v1 = vpop.f32.mrb[99].mxu1  ;;  %v4965_v19 = vadd.f32 %v4901_v23, %v3843_v34  ;;  %v3784_v2 = vmul.f32 4.0, %v3720_v60  ;;  %v4842_v22 = vsel %vm4650_vm9, %v4714_v51, %v4778_v20  ;;  %vm4648_vm11 = vcmp.lt.f32.partialorder %v8406_v35, 0.0  ;;  %v9584_v51 = vld [vmem:[#allocation53_spill] sm:$0xff] }
 0x2f0   :  { %5102 = vst [vmem:[#allocation8 + $0x98] sm:$0xff] %v5038_v0  ;;  %v4906_v45 = vmul.f32 2.0, %v4842_v22  ;;  %v3718_v13 = vsel %vm3526_vm10, %v3590_v8, %v3654_v4  ;;  %v4712_v17 = vceil.f32 %v8406_v35  ;;  %v4776_v3 = vfloor.f32 %v8406_v35 }
 0x2f1   :  { %v5036_v24 = vadd.f32 %v8270_v26, %v4965_v19  ;;  %v3848_v55 = vadd.f32 %v3784_v2, %v9583_v11  ;;  %v3782_v62 = vmul.f32 4.0, %v3718_v13  ;;  %vm3529_vm12 = vcmp.lt.f32.partialorder %v8409_v31, 0.0 }
 0x2f2   :  { %v4840_v23 = vsel %vm4648_vm11, %v4712_v17, %v4776_v3  ;;  %v3593_v28 = vceil.f32 %v8409_v31  ;;  %v3657_v34 = vfloor.f32 %v8409_v31  ;;  %vm4651_vm13 = vcmp.lt.f32.partialorder %v8411_v7, 0.0 }
 0x2f3   :  { %5100 = vst [vmem:[#allocation8 + $0x88] sm:$0xff] %v5036_v24  ;;  %v4970_v22 = vadd.f32 %v4906_v45, %v3848_v55  ;;  %v3846_v20 = vadd.f32 %v3782_v62, %v9584_v51  ;;  %v4904_v0 = vmul.f32 2.0, %v4840_v23  ;;  %v4715_v35 = vceil.f32 %v8411_v7  ;;  %v8553_v60 = vpop.f32.mrb[100].mxu0 }
 0x2f4   :  { %v8555_v8 = vpop.f32.mrb[100].mxu1  ;;  %v3721_v13 = vsel %vm3529_vm12, %v3593_v28, %v3657_v34  ;;  %v4779_v4 = vfloor.f32 %v8411_v7  ;;  %vm3527_vm14 = vcmp.lt.f32.partialorder %v8417_v32, 0.0  ;;  %v3591_v31 = vceil.f32 %v8417_v32  ;;  %v8560_v19 = vpop.f32.mrb[101].mxu0 }
 0x2f5   :  { %v8562_v2 = vpop.f32.mrb[101].mxu1  ;;  %v5041_v62 = vadd.f32 %v8270_v26, %v4970_v22  ;;  %v4968_v55 = vadd.f32 %v4904_v0, %v3846_v20  ;;  %v3785_v45 = vmul.f32 4.0, %v3721_v13  ;;  %v3655_v17 = vfloor.f32 %v8417_v32  ;;  %v8566_v3 = vpop.f32.mrb[102].mxu0  ;;  %v9585_v20 = vld [vmem:[#allocation54_spill] sm:$0xff] }
 0x2f6   :  { %v8568_v24 = vpop.f32.mrb[102].mxu1  ;;  %v4843_v11 = vsel %vm4651_vm13, %v4715_v35, %v4779_v4  ;;  %vm4649_vm15 = vcmp.lt.f32.partialorder %v8419_v41, 0.0  ;;  %v4713_v23 = vceil.f32 %v8419_v41  ;;  %v4777_v28 = vfloor.f32 %v8419_v41  ;;  %v8575_v34 = vpop.f32.mrb[103].mxu0 }
 0x2f7   :  { %v8577_v22 = vpop.f32.mrb[103].mxu1  ;;  %5105 = vst [vmem:[#allocation8 + $0xb0] sm:$0xff] %v5041_v62  ;;  %v5039_v51 = vadd.f32 %v8270_v26, %v4968_v55  ;;  %v3849_v0 = vadd.f32 %v3785_v45, %v9585_v20  ;;  %v4907_v13 = vmul.f32 2.0, %v4843_v11  ;;  %v3719_v7 = vsel %vm3527_vm14, %v3591_v31, %v3655_v17  ;;  %v9586_v62 = vld [vmem:[#allocation57_spill] sm:$0xff] }
 0x2f8   :  { %v3783_v35 = vmul.f32 4.0, %v3719_v7  ;;  %v4841_v4 = vsel %vm4649_vm15, %v4713_v23, %v4777_v28  ;;  %vm3532_vm0 = vcmp.lt.f32.partialorder %v8434_v53, 0.0  ;;  %v3596_v12 = vceil.f32 %v8434_v53 }
 0x2f9   :  { %5103 = vst [vmem:[#allocation8 + $0xa0] sm:$0xff] %v5039_v51  ;;  %v4971_v41 = vadd.f32 %v4907_v13, %v3849_v0  ;;  %v4905_v10 = vmul.f32 2.0, %v4841_v4  ;;  %v3660_v48 = vfloor.f32 %v8434_v53  ;;  %vm4654_vm1 = vcmp.lt.f32.partialorder %v8436_v57, 0.0 }
 0x2fa   :  { %v3847_v55 = vadd.f32 %v3783_v35, %v9586_v62  ;;  %v4718_v45 = vceil.f32 %v8436_v57  ;;  %v4782_v32 = vfloor.f32 %v8436_v57  ;;  %vm3530_vm2 = vcmp.lt.f32.partialorder %v8443_v6, 0.0 }
 0x2fb   :  { %v5042_v31 = vadd.f32 %v8270_v26, %v4971_v41  ;;  %v3724_v17 = vsel %vm3532_vm0, %v3596_v12, %v3660_v48  ;;  %v3594_v11 = vceil.f32 %v8443_v6  ;;  %v3658_v23 = vfloor.f32 %v8443_v6  ;;  %v8594_v28 = vpop.f32.mrb[104].mxu0  ;;  %v9587_v41 = vld [vmem:[#allocation58_spill] sm:$0xff] }
 0x2fc   :  { %v8596_v53 = vpop.f32.mrb[104].mxu1  ;;  %v4969_v51 = vadd.f32 %v4905_v10, %v3847_v55  ;;  %v3788_v20 = vmul.f32 4.0, %v3724_v17  ;;  %v4846_v0 = vsel %vm4654_vm1, %v4718_v45, %v4782_v32  ;;  %vm4652_vm3 = vcmp.lt.f32.partialorder %v8445_v38, 0.0  ;;  %v8599_v13 = vpop.f32.mrb[105].mxu0 }
 0x2fd   :  { %v8601_v57 = vpop.f32.mrb[105].mxu1  ;;  %5106 = vst [vmem:[#allocation8 + $0xb8] sm:$0xff] %v5042_v31  ;;  %v4910_v7 = vmul.f32 2.0, %v4846_v0  ;;  %v3722_v48 = vsel %vm3530_vm2, %v3594_v11, %v3658_v23  ;;  %v4716_v12 = vceil.f32 %v8445_v38  ;;  %v4780_v6 = vfloor.f32 %v8445_v38  ;;  %v8605_v35 = vpop.f32.mrb[106].mxu0 }
 0x2fe   :  { %v8607_v4 = vpop.f32.mrb[106].mxu1  ;;  %v5040_v10 = vadd.f32 %v8270_v26, %v4969_v51  ;;  %v3852_v62 = vadd.f32 %v3788_v20, %v9587_v41  ;;  %v3786_v55 = vmul.f32 4.0, %v3722_v48  ;;  %vm3533_vm4 = vcmp.lt.f32.partialorder %v8451_v42, 0.0  ;;  %v8612_v45 = vpop.f32.mrb[107].mxu0  ;;  %v9588_v51 = vld [vmem:[#allocation61_spill] sm:$0xff] }
 0x2ff   :  { %v8614_v32 = vpop.f32.mrb[107].mxu1  ;;  %v4844_v31 = vsel %vm4652_vm3, %v4716_v12, %v4780_v6  ;;  %v3597_v17 = vceil.f32 %v8451_v42  ;;  %v3661_v11 = vfloor.f32 %v8451_v42  ;;  %vm4655_vm5 = vcmp.lt.f32.partialorder %v8453_v50, 0.0 }
 0x300   :  { %5104 = vst [vmem:[#allocation8 + $0xa8] sm:$0xff] %v5040_v10  ;;  %v4974_v23 = vadd.f32 %v4910_v7, %v3852_v62  ;;  %v3850_v20 = vadd.f32 %v3786_v55, %v9588_v51  ;;  %v4908_v0 = vmul.f32 2.0, %v4844_v31  ;;  %v4719_v48 = vceil.f32 %v8453_v50 }
 0x301   :  { %v3725_v41 = vsel %vm3533_vm4, %v3597_v17, %v3661_v11  ;;  %v4783_v25 = vfloor.f32 %v8453_v50  ;;  %vm3531_vm6 = vcmp.lt.f32.partialorder %v8457_v59, 0.0  ;;  %v3595_v38 = vceil.f32 %v8457_v59  ;;  %v9589_v17 = vld [vmem:[#allocation62_spill] sm:$0xff] }
 0x302   :  { %v5045_v12 = vadd.f32 %v8270_v26, %v4974_v23  ;;  %v4972_v6 = vadd.f32 %v4908_v0, %v3850_v20  ;;  %v3789_v42 = vmul.f32 4.0, %v3725_v41  ;;  %v3659_v18 = vfloor.f32 %v8457_v59 }
 0x303   :  { %v4847_v10 = vsel %vm4655_vm5, %v4719_v48, %v4783_v25  ;;  %vm4653_vm7 = vcmp.lt.f32.partialorder %v8459_v29, 0.0  ;;  %v4717_v7 = vceil.f32 %v8459_v29  ;;  %v4781_v62 = vfloor.f32 %v8459_v29  ;;  %v8631_v55 = vpop.f32.mrb[108].mxu0 }
 0x304   :  { %v8633_v50 = vpop.f32.mrb[108].mxu1  ;;  %5109 = vst [vmem:[#allocation8 + $0xd0] sm:$0xff] %v5045_v12  ;;  %v5043_v31 = vadd.f32 %v8270_v26, %v4972_v6  ;;  %v3853_v11 = vadd.f32 %v3789_v42, %v9589_v17  ;;  %v4911_v23 = vmul.f32 2.0, %v4847_v10  ;;  %v3723_v51 = vsel %vm3531_vm6, %v3595_v38, %v3659_v18  ;;  %v8639_v25 = vpop.f32.mrb[109].mxu0  ;;  %v9590_v10 = vld [vmem:[#allocation65_spill] sm:$0xff] }
 0x305   :  { %v8641_v20 = vpop.f32.mrb[109].mxu1  ;;  %v3787_v0 = vmul.f32 4.0, %v3723_v51  ;;  %v4845_v48 = vsel %vm4653_vm7, %v4717_v7, %v4781_v62  ;;  %vm3536_vm8 = vcmp.lt.f32.partialorder %v8473_v30, 0.0  ;;  %v3600_v29 = vceil.f32 %v8473_v30  ;;  %v8645_v41 = vpop.f32.mrb[110].mxu0 }
 0x306   :  { %v8647_v12 = vpop.f32.mrb[110].mxu1  ;;  %5107 = vst [vmem:[#allocation8 + $0xc0] sm:$0xff] %v5043_v31  ;;  %v4975_v6 = vadd.f32 %v4911_v23, %v3853_v11  ;;  %v4909_v42 = vmul.f32 2.0, %v4845_v48  ;;  %v3664_v59 = vfloor.f32 %v8473_v30  ;;  %vm4658_vm9 = vcmp.lt.f32.partialorder %v8475_v44, 0.0  ;;  %v8651_v18 = vpop.f32.mrb[111].mxu0  ;;  %v9591_v30 = vld [vmem:[#allocation66_spill] sm:$0xff] }
 0x307   :  { %v8653_v38 = vpop.f32.mrb[111].mxu1  ;;  %v3851_v7 = vadd.f32 %v3787_v0, %v9590_v10  ;;  %v4722_v62 = vceil.f32 %v8475_v44  ;;  %v4786_v17 = vfloor.f32 %v8475_v44  ;;  %vm3534_vm10 = vcmp.lt.f32.partialorder %v8480_v43, 0.0 }
 0x308   :  { %v5046_v31 = vadd.f32 %v8270_v26, %v4975_v6  ;;  %v3728_v11 = vsel %vm3536_vm8, %v3600_v29, %v3664_v59  ;;  %v3598_v23 = vceil.f32 %v8480_v43  ;;  %v3662_v51 = vfloor.f32 %v8480_v43 }
 0x309   :  { %v4973_v48 = vadd.f32 %v4909_v42, %v3851_v7  ;;  %v3792_v14 = vmul.f32 4.0, %v3728_v11  ;;  %v4850_v46 = vsel %vm4658_vm9, %v4722_v62, %v4786_v17  ;;  %vm4656_vm11 = vcmp.lt.f32.partialorder %v8482_v61, 0.0 }
 0x30a   :  { %5110 = vst [vmem:[#allocation8 + $0xd8] sm:$0xff] %v5046_v31  ;;  %v4914_v0 = vmul.f32 2.0, %v4850_v46  ;;  %v3726_v10 = vsel %vm3534_vm10, %v3598_v23, %v3662_v51  ;;  %v4720_v44 = vceil.f32 %v8482_v61  ;;  %v4784_v56 = vfloor.f32 %v8482_v61  ;;  %v9592_v31 = vld [vmem:[#allocation67_spill] sm:$0xff] }
 0x30b   :  { %v5044_v6 = vadd.f32 %v8270_v26, %v4973_v48  ;;  %v3856_v29 = vadd.f32 %v3792_v14, %v9591_v30  ;;  %v3790_v59 = vmul.f32 4.0, %v3726_v10  ;;  %vm3537_vm12 = vcmp.lt.f32.partialorder %v8487_v52, 0.0  ;;  %v8670_v43 = vpop.f32.mrb[112].mxu0 }
 0x30c   :  { %v8672_v42 = vpop.f32.mrb[112].mxu1  ;;  %v4848_v7 = vsel %vm4656_vm11, %v4720_v44, %v4784_v56  ;;  %v3601_v62 = vceil.f32 %v8487_v52  ;;  %v3665_v46 = vfloor.f32 %v8487_v52  ;;  %vm4659_vm13 = vcmp.lt.f32.partialorder %v8489_v36, 0.0  ;;  %v8677_v17 = vpop.f32.mrb[113].mxu0 }
 0x30d   :  { %v8679_v61 = vpop.f32.mrb[113].mxu1  ;;  %5108 = vst [vmem:[#allocation8 + $0xc8] sm:$0xff] %v5044_v6  ;;  %v4978_v14 = vadd.f32 %v4914_v0, %v3856_v29  ;;  %v3854_v11 = vadd.f32 %v3790_v59, %v9592_v31  ;;  %v4912_v23 = vmul.f32 2.0, %v4848_v7  ;;  %v4723_v51 = vceil.f32 %v8489_v36  ;;  %v8683_v48 = vpop.f32.mrb[114].mxu0 }
 0x30e   :  { %9593 = vst [vmem:[#allocation13_spill] sm:$0xff] %v8683_v48  ;;  %v8685_v56 = vpop.f32.mrb[114].mxu1  ;;  %v3729_v10 = vsel %vm3537_vm12, %v3601_v62, %v3665_v46  ;;  %v4787_v44 = vfloor.f32 %v8489_v36  ;;  %vm3535_vm14 = vcmp.lt.f32.partialorder %v8493_v47, 0.0  ;;  %v3599_v30 = vceil.f32 %v8493_v47  ;;  %v8692_v6 = vpop.f32.mrb[115].mxu0 }
 0x30f   :  { %9594 = vst [vmem:[#allocation92_spill] sm:$0xff] %v8685_v56  ;;  %9595 = vst [vmem:[#allocation93_spill] sm:$0xff] %v8692_v6  ;;  %v8694_v0 = vpop.f32.mrb[115].mxu1  ;;  %v5049_v29 = vadd.f32 %v8270_v26, %v4978_v14  ;;  %v4976_v59 = vadd.f32 %v4912_v23, %v3854_v11  ;;  %v3793_v7 = vmul.f32 4.0, %v3729_v10  ;;  %v3663_v31 = vfloor.f32 %v8493_v47  ;;  %v9597_v56 = vld [vmem:[#allocation68_spill] sm:$0xff] }
 0x310   :  { %9596 = vst [vmem:[#allocation14_spill] sm:$0xff] %v8694_v0  ;;  %v4851_v52 = vsel %vm4659_vm13, %v4723_v51, %v4787_v44  ;;  %vm4657_vm15 = vcmp.lt.f32.partialorder %v8495_v40, 0.0  ;;  %v4721_v62 = vceil.f32 %v8495_v40  ;;  %v4785_v46 = vfloor.f32 %v8495_v40  ;;  %v9598_v44 = vld [vmem:[#allocation72_spill] sm:$0xff] }
 0x311   :  { %5113 = vst [vmem:[#allocation8 + $0xf0] sm:$0xff] %v5049_v29  ;;  %v5047_v6 = vadd.f32 %v8270_v26, %v4976_v59  ;;  %v3857_v0 = vadd.f32 %v3793_v7, %v9597_v56  ;;  %v4915_v48 = vmul.f32 2.0, %v4851_v52  ;;  %v3727_v14 = vsel %vm3535_vm14, %v3599_v30, %v3663_v31 }
 0x312   :  { %v3791_v11 = vmul.f32 4.0, %v3727_v14  ;;  %v4849_v23 = vsel %vm4657_vm15, %v4721_v62, %v4785_v46  ;;  %vm3540_vm0 = vcmp.lt.f32.partialorder %v8513_v21, 0.0  ;;  %v3604_v36 = vceil.f32 %v8513_v21 }
 0x313   :  { %5111 = vst [vmem:[#allocation8 + $0xe0] sm:$0xff] %v5047_v6  ;;  %v4979_v51 = vadd.f32 %v4915_v48, %v3857_v0  ;;  %v4913_v10 = vmul.f32 2.0, %v4849_v23  ;;  %v3668_v40 = vfloor.f32 %v8513_v21  ;;  %vm4662_vm1 = vcmp.lt.f32.partialorder %v8515_v9, 0.0  ;;  %v8711_v26 = vpop.f32.mrb[116].mxu0  ;;  %v8726_v6 = vld [vmem:[%s9051_s3] ss:$0 sm:$0xff] }
 0x314   :  { %v8713_v56 = vpop.f32.mrb[116].mxu1  ;;  %v3855_v47 = vadd.f32 %v3791_v11, %v9598_v44  ;;  %v4726_v30 = vceil.f32 %v8515_v9  ;;  %v4790_v29 = vfloor.f32 %v8515_v9  ;;  %vm3538_vm2 = vcmp.lt.f32.partialorder %v8519_v37, 0.0  ;;  %v8719_v59 = vpop.f32.mrb[117].mxu0  ;;  %s6540_s3 = smov [#allocation8]  }
 0x315   :  { %v8721_v48 = vpop.f32.mrb[117].mxu1  ;;  %v5050_v0 = vadd.f32 %v8726_v6, %v4979_v51  ;;  %v3732_v7 = vsel %vm3540_vm0, %v3604_v36, %v3668_v40  ;;  %v3602_v31 = vceil.f32 %v8519_v37  ;;  %v3666_v52 = vfloor.f32 %v8519_v37  ;;  %v8733_v62 = vpop.f32.mrb[118].mxu0  ;;  %s5152_s30 = sshll.u32 %s6540_s3, 4  ;;  %s5153_s30 = int_to_ptr.vmem [resolvable:$true] %s5152_s30 }
 0x316   :  { %v8735_v46 = vpop.f32.mrb[118].mxu1  ;;  %v4977_v14 = vadd.f32 %v4913_v10, %v3855_v47  ;;  %v3796_v11 = vmul.f32 4.0, %v3732_v7  ;;  %v4854_v23 = vsel %vm4662_vm1, %v4726_v30, %v4790_v29  ;;  %vm4660_vm3 = vcmp.lt.f32.partialorder %v8521_v39, 0.0  ;;  %v8740_v44 = vpop.f32.mrb[119].mxu0  ;;  %v9600_v47 = vld [vmem:[#allocation73_spill] sm:$0xff]  ;;  %s6505_s5 = scalar_lea.vmem %s5153_s30, 8192  ;;  %p6510_p11 = scmp.lt.s32.totalorder %s5153_s30, %s5153_s30 }
 0x317   :  { %9599 = vst [vmem:[#allocation15_spill] sm:$0xff] %v8735_v46  ;;  %v8742_v51 = vpop.f32.mrb[119].mxu1  ;;  %5114 = vst [vmem:[#allocation8 + $0xf8] sm:$0xff] %v5050_v0  ;;  %v4918_v21 = vmul.f32 2.0, %v4854_v23  ;;  %v3730_v36 = vsel %vm3538_vm2, %v3602_v31, %v3666_v52  ;;  %v4724_v40 = vceil.f32 %v8521_v39  ;;  %v4788_v46 = vfloor.f32 %v8521_v39  ;;  %v9601_v31 = vld [vmem:[#allocation76_spill] sm:$0xff]  ;;  %p6506_p10 = scmp.ne.s32.totalorder %s5153_s30, %s6505_s5  ;;  %p6511_p12 = scmp.lt.s32.totalorder %s6505_s5, %s6505_s5 }
 0x318   :  { %v5048_v10 = vadd.f32 %v8726_v6, %v4977_v14  ;;  %v3860_v9 = vadd.f32 %v3796_v11, %v9600_v47  ;;  %v3794_v30 = vmul.f32 4.0, %v3730_v36  ;;  %vm3541_vm4 = vcmp.lt.f32.partialorder %v8527_v49, 0.0 }
 0x319   :  { %v4852_v29 = vsel %vm4660_vm3, %v4724_v40, %v4788_v46  ;;  %v3605_v7 = vceil.f32 %v8527_v49  ;;  %v3669_v0 = vfloor.f32 %v8527_v49  ;;  %vm4663_vm5 = vcmp.lt.f32.partialorder %v8529_v5, 0.0  ;;  %p6512_p13 = por %p6511_p12, %p6510_p11 }
 0x31a   :  { %5112 = vst [vmem:[#allocation8 + $0xe8] sm:$0xff] %v5048_v10  ;;  %v4982_v37 = vadd.f32 %v4918_v21, %v3860_v9  ;;  %v3858_v52 = vadd.f32 %v3794_v30, %v9601_v31  ;;  %v4916_v23 = vmul.f32 2.0, %v4852_v29  ;;  %v4727_v39 = vceil.f32 %v8529_v5 }
 0x31b   :  { %v3733_v14 = vsel %vm3541_vm4, %v3605_v7, %v3669_v0  ;;  %v4791_v11 = vfloor.f32 %v8529_v5  ;;  %vm3539_vm6 = vcmp.lt.f32.partialorder %v8536_v33, 0.0  ;;  %v3603_v46 = vceil.f32 %v8536_v33  ;;  %v8759_v36 = vpop.f32.mrb[120].mxu0  ;;  %p6513_p0 = pnand %p6512_p13, %p6506_p10 }
 0x31c   :  { %v8761_v40 = vpop.f32.mrb[120].mxu1  ;;  %v5053_v49 = vadd.f32 %v8726_v6, %v4982_v37  ;;  %v4980_v10 = vadd.f32 %v4916_v23, %v3858_v52  ;;  %v3797_v21 = vmul.f32 4.0, %v3733_v14  ;;  %v3667_v47 = vfloor.f32 %v8536_v33  ;;  %v8765_v9 = vpop.f32.mrb[121].mxu0  ;;  %v9606_v23 = vld [vmem:[#allocation77_spill] sm:$0xff] }
 0x31d   :  { %9602 = vst [vmem:[#allocation16_spill] sm:$0xff] %v8761_v40  ;;  %9603 = vst [vmem:[#allocation17_spill] sm:$0xff] %v8765_v9  ;;  %v8767_v30 = vpop.f32.mrb[121].mxu1  ;;  %v4855_v29 = vsel %vm4663_vm5, %v4727_v39, %v4791_v11  ;;  %vm4661_vm7 = vcmp.lt.f32.partialorder %v8538_v1, 0.0  ;;  %v4725_v7 = vceil.f32 %v8538_v1  ;;  %v4789_v0 = vfloor.f32 %v8538_v1  ;;  %v8774_v31 = vpop.f32.mrb[122].mxu0 }
 0x31e   :  { %9604 = vst [vmem:[#allocation18_spill] sm:$0xff] %v8767_v30  ;;  %v8776_v37 = vpop.f32.mrb[122].mxu1  ;;  %5117 = vst [vmem:[#allocation8 + $0x110] sm:$0xff] %v5053_v49  ;;  %v5051_v52 = vadd.f32 %v8726_v6, %v4980_v10  ;;  %v3861_v14 = vadd.f32 %v3797_v21, %v9606_v23  ;;  %v4919_v9 = vmul.f32 2.0, %v4855_v29  ;;  %v3731_v5 = vsel %vm3539_vm6, %v3603_v46, %v3667_v47  ;;  %v8782_v39 = vpop.f32.mrb[123].mxu0  ;;  %v9607_v21 = vld [vmem:[#allocation80_spill] sm:$0xff] }
 0x31f   :  { %9605 = vst [vmem:[#allocation19_spill] sm:$0xff] %v8776_v37  ;;  %v8784_v11 = vpop.f32.mrb[123].mxu1  ;;  %v3795_v30 = vmul.f32 4.0, %v3731_v5  ;;  %v4853_v40 = vsel %vm4661_vm7, %v4725_v7, %v4789_v0  ;;  %vm3544_vm8 = vcmp.lt.f32.partialorder %v8553_v60, 0.0  ;;  %v3608_v1 = vceil.f32 %v8553_v60 }
 0x320   :  { %5115 = vst [vmem:[#allocation8 + $0x100] sm:$0xff] %v5051_v52  ;;  %v4983_v49 = vadd.f32 %v4919_v9, %v3861_v14  ;;  %v4917_v37 = vmul.f32 2.0, %v4853_v40  ;;  %v3672_v10 = vfloor.f32 %v8553_v60  ;;  %vm4666_vm9 = vcmp.lt.f32.partialorder %v8555_v8, 0.0 }
 0x321   :  { %v3859_v33 = vadd.f32 %v3795_v30, %v9607_v21  ;;  %v4730_v46 = vceil.f32 %v8555_v8  ;;  %v4794_v47 = vfloor.f32 %v8555_v8  ;;  %vm3542_vm10 = vcmp.lt.f32.partialorder %v8560_v19, 0.0 }
 0x322   :  { %v5054_v29 = vadd.f32 %v8726_v6, %v4983_v49  ;;  %v3736_v7 = vsel %vm3544_vm8, %v3608_v1, %v3672_v10  ;;  %v3606_v0 = vceil.f32 %v8560_v19  ;;  %v3670_v9 = vfloor.f32 %v8560_v19 }
 0x323   :  { %v4981_v40 = vadd.f32 %v4917_v37, %v3859_v33  ;;  %v3800_v52 = vmul.f32 4.0, %v3736_v7  ;;  %v4858_v60 = vsel %vm4666_vm9, %v4730_v46, %v4794_v47  ;;  %vm4664_vm11 = vcmp.lt.f32.partialorder %v8562_v2, 0.0  ;;  %v8798_v23 = vpop.f32.mrb[124].mxu0  ;;  %v9608_v37 = vld [vmem:[#allocation81_spill] sm:$0xff] }
 0x324   :  { %v8800_v30 = vpop.f32.mrb[124].mxu1  ;;  %5118 = vst [vmem:[#allocation8 + $0x118] sm:$0xff] %v5054_v29  ;;  %v4922_v8 = vmul.f32 2.0, %v4858_v60  ;;  %v3734_v14 = vsel %vm3542_vm10, %v3606_v0, %v3670_v9  ;;  %v4728_v5 = vceil.f32 %v8562_v2  ;;  %v4792_v1 = vfloor.f32 %v8562_v2  ;;  %v8804_v49 = vpop.f32.mrb[125].mxu0  ;;  %v9613_v60 = vld [vmem:[#allocation85_spill] sm:$0xff] }
 0x325   :  { %v8806_v10 = vpop.f32.mrb[125].mxu1  ;;  %v5052_v19 = vadd.f32 %v8726_v6, %v4981_v40  ;;  %v3864_v21 = vadd.f32 %v3800_v52, %v9608_v37  ;;  %v3798_v33 = vmul.f32 4.0, %v3734_v14  ;;  %vm3545_vm12 = vcmp.lt.f32.partialorder %v8566_v3, 0.0  ;;  %v8811_v46 = vpop.f32.mrb[126].mxu0 }
 0x326   :  { %9609 = vst [vmem:[#allocation20_spill] sm:$0xff] %v8811_v46  ;;  %v8813_v47 = vpop.f32.mrb[126].mxu1  ;;  %v4856_v29 = vsel %vm4664_vm11, %v4728_v5, %v4792_v1  ;;  %v3609_v7 = vceil.f32 %v8566_v3  ;;  %v3673_v0 = vfloor.f32 %v8566_v3  ;;  %vm4667_vm13 = vcmp.lt.f32.partialorder %v8568_v24, 0.0  ;;  %v8820_v9 = vpop.f32.mrb[127].mxu0 }
 0x327   :  { %9610 = vst [vmem:[#allocation21_spill] sm:$0xff] %v8813_v47  ;;  %9611 = vst [vmem:[#allocation22_spill] sm:$0xff] %v8820_v9  ;;  %v8822_v40 = vpop.f32.mrb[127].mxu1  ;;  %v4986_v52 = vadd.f32 %v4922_v8, %v3864_v21  ;;  %v3862_v14 = vadd.f32 %v3798_v33, %v9613_v60  ;;  %v4920_v37 = vmul.f32 2.0, %v4856_v29  ;;  %v4731_v47 = vceil.f32 %v8568_v24  ;;  %v9614_v29 = vld [vmem:[#allocation88_spill] sm:$0xff] }
 0x328   :  { %9612 = vst [vmem:[#allocation23_spill] sm:$0xff] %v8822_v40  ;;  %5116 = vst [vmem:[#allocation8 + $0x108] sm:$0xff] %v5052_v19  ;;  %v3737_v46 = vsel %vm3545_vm12, %v3609_v7, %v3673_v0  ;;  %v4795_v2 = vfloor.f32 %v8568_v24  ;;  %vm3543_vm14 = vcmp.lt.f32.partialorder %v8575_v34, 0.0  ;;  %v3607_v3 = vceil.f32 %v8575_v34 }
 0x329   :  { %v5057_v5 = vadd.f32 %v8726_v6, %v4986_v52  ;;  %v4984_v1 = vadd.f32 %v4920_v37, %v3862_v14  ;;  %v3801_v9 = vmul.f32 4.0, %v3737_v46  ;;  %v3671_v40 = vfloor.f32 %v8575_v34 }
 0x32a   :  { %v4859_v8 = vsel %vm4667_vm13, %v4731_v47, %v4795_v2  ;;  %vm4665_vm15 = vcmp.lt.f32.partialorder %v8577_v22, 0.0  ;;  %v4729_v19 = vceil.f32 %v8577_v22  ;;  %v4793_v21 = vfloor.f32 %v8577_v22  ;;  %v9615_v22 = vld [vmem:[#allocation89_spill] sm:$0xff] }
 0x32b   :  { %5121 = vst [vmem:[#allocation8 + $0x130] sm:$0xff] %v5057_v5  ;;  %v5055_v33 = vadd.f32 %v8726_v6, %v4984_v1  ;;  %v3865_v7 = vadd.f32 %v3801_v9, %v9614_v29  ;;  %v4923_v0 = vmul.f32 2.0, %v4859_v8  ;;  %v3735_v52 = vsel %vm3543_vm14, %v3607_v3, %v3671_v40 }
 0x32c   :  { %v3799_v60 = vmul.f32 4.0, %v3735_v52  ;;  %v4857_v46 = vsel %vm4665_vm15, %v4729_v19, %v4793_v21  ;;  %vm3548_vm0 = vcmp.lt.f32.partialorder %v8594_v28, 0.0  ;;  %v3612_v24 = vceil.f32 %v8594_v28 }
 0x32d   :  { %5119 = vst [vmem:[#allocation8 + $0x120] sm:$0xff] %v5055_v33  ;;  %v4987_v34 = vadd.f32 %v4923_v0, %v3865_v7  ;;  %v4921_v47 = vmul.f32 2.0, %v4857_v46  ;;  %v3676_v14 = vfloor.f32 %v8594_v28  ;;  %vm4670_vm1 = vcmp.lt.f32.partialorder %v8596_v53, 0.0  ;;  %v9616_v0 = vld [vmem:[#allocation55_spill] sm:$0xff] }
 0x32e   :  { %v3863_v37 = vadd.f32 %v3799_v60, %v9615_v22  ;;  %v4734_v2 = vceil.f32 %v8596_v53  ;;  %v4798_v9 = vfloor.f32 %v8596_v53  ;;  %vm3546_vm2 = vcmp.lt.f32.partialorder %v8599_v13, 0.0 }
 0x32f   :  { %v5058_v40 = vadd.f32 %v8726_v6, %v4987_v34  ;;  %v3740_v3 = vsel %vm3548_vm0, %v3612_v24, %v3676_v14  ;;  %v3610_v5 = vceil.f32 %v8599_v13  ;;  %v3674_v1 = vfloor.f32 %v8599_v13 }
 0x330   :  { %v4985_v8 = vadd.f32 %v4921_v47, %v3863_v37  ;;  %v3804_v19 = vmul.f32 4.0, %v3740_v3  ;;  %v4862_v28 = vsel %vm4670_vm1, %v4734_v2, %v4798_v9  ;;  %vm4668_vm3 = vcmp.lt.f32.partialorder %v8601_v57, 0.0  ;;  %v9617_v47 = vld [vmem:[#allocation56_spill] sm:$0xff] }
 0x331   :  { %5122 = vst [vmem:[#allocation8 + $0x138] sm:$0xff] %v5058_v40  ;;  %v4926_v21 = vmul.f32 2.0, %v4862_v28  ;;  %v3738_v33 = vsel %vm3546_vm2, %v3610_v5, %v3674_v1  ;;  %v4732_v29 = vceil.f32 %v8601_v57  ;;  %v4796_v53 = vfloor.f32 %v8601_v57  ;;  %v9618_v28 = vld [vmem:[#allocation59_spill] sm:$0xff] }
 0x332   :  { %v5056_v7 = vadd.f32 %v8726_v6, %v4985_v8  ;;  %v3868_v52 = vadd.f32 %v3804_v19, %v9616_v0  ;;  %v3802_v60 = vmul.f32 4.0, %v3738_v33  ;;  %vm3549_vm4 = vcmp.lt.f32.partialorder %v8605_v35, 0.0 }
 0x333   :  { %v4860_v13 = vsel %vm4668_vm3, %v4732_v29, %v4796_v53  ;;  %v3613_v46 = vceil.f32 %v8605_v35  ;;  %v3677_v24 = vfloor.f32 %v8605_v35  ;;  %vm4671_vm5 = vcmp.lt.f32.partialorder %v8607_v4, 0.0 }
 0x334   :  { %5120 = vst [vmem:[#allocation8 + $0x128] sm:$0xff] %v5056_v7  ;;  %v4990_v34 = vadd.f32 %v4926_v21, %v3868_v52  ;;  %v3866_v14 = vadd.f32 %v3802_v60, %v9617_v47  ;;  %v4924_v22 = vmul.f32 2.0, %v4860_v13  ;;  %v4735_v57 = vceil.f32 %v8607_v4 }
 0x335   :  { %v3741_v37 = vsel %vm3549_vm4, %v3613_v46, %v3677_v24  ;;  %v4799_v2 = vfloor.f32 %v8607_v4  ;;  %vm3547_vm6 = vcmp.lt.f32.partialorder %v8612_v45, 0.0  ;;  %v3611_v9 = vceil.f32 %v8612_v45 }
 0x336   :  { %v5061_v40 = vadd.f32 %v8726_v6, %v4990_v34  ;;  %v4988_v3 = vadd.f32 %v4924_v22, %v3866_v14  ;;  %v3805_v35 = vmul.f32 4.0, %v3741_v37  ;;  %v3675_v5 = vfloor.f32 %v8612_v45 }
 0x337   :  { %v4863_v1 = vsel %vm4671_vm5, %v4735_v57, %v4799_v2  ;;  %vm4669_vm7 = vcmp.lt.f32.partialorder %v8614_v32, 0.0  ;;  %v4733_v8 = vceil.f32 %v8614_v32  ;;  %v4797_v19 = vfloor.f32 %v8614_v32 }
 0x338   :  { %5125 = vst [vmem:[#allocation8 + $0x150] sm:$0xff] %v5061_v40  ;;  %v5059_v4 = vadd.f32 %v8726_v6, %v4988_v3  ;;  %v3869_v21 = vadd.f32 %v3805_v35, %v9618_v28  ;;  %v4927_v33 = vmul.f32 2.0, %v4863_v1  ;;  %v3739_v29 = vsel %vm3547_vm6, %v3611_v9, %v3675_v5 }
 0x339   :  { %v3803_v53 = vmul.f32 4.0, %v3739_v29  ;;  %v4861_v7 = vsel %vm4669_vm7, %v4733_v8, %v4797_v19  ;;  %vm3552_vm8 = vcmp.lt.f32.partialorder %v8631_v55, 0.0  ;;  %v3616_v45 = vceil.f32 %v8631_v55 }
 0x33a   :  { %5123 = vst [vmem:[#allocation8 + $0x140] sm:$0xff] %v5059_v4  ;;  %v4991_v0 = vadd.f32 %v4927_v33, %v3869_v21  ;;  %v4925_v52 = vmul.f32 2.0, %v4861_v7  ;;  %v3680_v60 = vfloor.f32 %v8631_v55  ;;  %vm4674_vm9 = vcmp.lt.f32.partialorder %v8633_v50, 0.0 }
 0x33b   :  { %v3867_v32 = vadd.f32 %v3803_v53, %v8091_v54  ;;  %v4738_v13 = vceil.f32 %v8633_v50  ;;  %v4802_v46 = vfloor.f32 %v8633_v50  ;;  %vm3550_vm10 = vcmp.lt.f32.partialorder %v8639_v25, 0.0 }
 0x33c   :  { %v5062_v24 = vadd.f32 %v8726_v6, %v4991_v0  ;;  %v3744_v34 = vsel %vm3552_vm8, %v3616_v45, %v3680_v60  ;;  %v3614_v47 = vceil.f32 %v8639_v25  ;;  %v3678_v14 = vfloor.f32 %v8639_v25 }
 0x33d   :  { %v4989_v22 = vadd.f32 %v4925_v52, %v3867_v32  ;;  %v3808_v57 = vmul.f32 4.0, %v3744_v34  ;;  %v4866_v55 = vsel %vm4674_vm9, %v4738_v13, %v4802_v46  ;;  %vm4672_vm11 = vcmp.lt.f32.partialorder %v8641_v20, 0.0 }
 0x33e   :  { %5126 = vst [vmem:[#allocation8 + $0x158] sm:$0xff] %v5062_v24  ;;  %v4930_v54 = vmul.f32 2.0, %v4866_v55  ;;  %v3742_v37 = vsel %vm3550_vm10, %v3614_v47, %v3678_v14  ;;  %v4736_v2 = vceil.f32 %v8641_v20  ;;  %v4800_v50 = vfloor.f32 %v8641_v20 }
 0x33f   :  { %v5060_v9 = vadd.f32 %v8726_v6, %v4989_v22  ;;  %v3872_v40 = vadd.f32 %v3808_v57, %v8102_v27  ;;  %v3806_v3 = vmul.f32 4.0, %v3742_v37  ;;  %vm3553_vm12 = vcmp.lt.f32.partialorder %v8645_v41, 0.0 }
 0x340   :  { %v4864_v25 = vsel %vm4672_vm11, %v4736_v2, %v4800_v50  ;;  %v3617_v35 = vceil.f32 %v8645_v41  ;;  %v3681_v5 = vfloor.f32 %v8645_v41  ;;  %vm4675_vm13 = vcmp.lt.f32.partialorder %v8647_v12, 0.0 }
 0x341   :  { %5124 = vst [vmem:[#allocation8 + $0x148] sm:$0xff] %v5060_v9  ;;  %v4994_v1 = vadd.f32 %v4930_v54, %v3872_v40  ;;  %v3870_v8 = vadd.f32 %v3806_v3, %v8110_v16  ;;  %v4928_v19 = vmul.f32 2.0, %v4864_v25  ;;  %v4739_v20 = vceil.f32 %v8647_v12  ;;  %v9619_v3 = vld [vmem:[#allocation13_spill] sm:$0xff] }
 0x342   :  { %v3745_v4 = vsel %vm3553_vm12, %v3617_v35, %v3681_v5  ;;  %v4803_v27 = vfloor.f32 %v8647_v12  ;;  %vm3551_vm14 = vcmp.lt.f32.partialorder %v8651_v18, 0.0  ;;  %v3615_v28 = vceil.f32 %v8651_v18  ;;  %v9620_v5 = vld [vmem:[#allocation92_spill] sm:$0xff] }
 0x343   :  { %v5065_v21 = vadd.f32 %v8726_v6, %v4994_v1  ;;  %v4992_v33 = vadd.f32 %v4928_v19, %v3870_v8  ;;  %v3809_v41 = vmul.f32 4.0, %v3745_v4  ;;  %v3679_v29 = vfloor.f32 %v8651_v18  ;;  %v9621_v8 = vld [vmem:[#allocation60_spill] sm:$0xff] }
 0x344   :  { %v4867_v53 = vsel %vm4675_vm13, %v4739_v20, %v4803_v27  ;;  %vm4673_vm15 = vcmp.lt.f32.partialorder %v8653_v38, 0.0  ;;  %v4737_v16 = vceil.f32 %v8653_v38  ;;  %v4801_v7 = vfloor.f32 %v8653_v38  ;;  %v9622_v27 = vld [vmem:[#allocation93_spill] sm:$0xff] }
 0x345   :  { %5129 = vst [vmem:[#allocation8 + $0x170] sm:$0xff] %v5065_v21  ;;  %v5063_v12 = vadd.f32 %v8726_v6, %v4992_v33  ;;  %v3873_v45 = vadd.f32 %v3809_v41, %v8119_v15  ;;  %v4931_v0 = vmul.f32 2.0, %v4867_v53  ;;  %v3743_v52 = vsel %vm3551_vm14, %v3615_v28, %v3679_v29 }
 0x346   :  { %v3807_v60 = vmul.f32 4.0, %v3743_v52  ;;  %v4865_v32 = vsel %vm4673_vm15, %v4737_v16, %v4801_v7  ;;  %vm3556_vm0 = vcmp.lt.f32.partialorder %v8670_v43, 0.0  ;;  %v3620_v18 = vceil.f32 %v8670_v43  ;;  %v9623_v16 = vld [vmem:[#allocation14_spill] sm:$0xff] }
 0x347   :  { %5127 = vst [vmem:[#allocation8 + $0x160] sm:$0xff] %v5063_v12  ;;  %v4995_v13 = vadd.f32 %v4931_v0, %v3873_v45  ;;  %v4929_v46 = vmul.f32 2.0, %v4865_v32  ;;  %v3684_v24 = vfloor.f32 %v8670_v43  ;;  %vm4678_vm1 = vcmp.lt.f32.partialorder %v8672_v42, 0.0  ;;  %v9624_v0 = vld [vmem:[#allocation63_spill] sm:$0xff] }
 0x348   :  { %v3871_v38 = vadd.f32 %v3807_v60, %v8131_v58  ;;  %v4742_v34 = vceil.f32 %v8672_v42  ;;  %v4806_v15 = vfloor.f32 %v8672_v42  ;;  %vm3554_vm2 = vcmp.lt.f32.partialorder %v8677_v17, 0.0 }
 0x349   :  { %v5066_v47 = vadd.f32 %v8726_v6, %v4995_v13  ;;  %v3748_v14 = vsel %vm3556_vm0, %v3620_v18, %v3684_v24  ;;  %v3618_v22 = vceil.f32 %v8677_v17  ;;  %v3682_v57 = vfloor.f32 %v8677_v17 }
 0x34a   :  { %v4993_v55 = vadd.f32 %v4929_v46, %v3871_v38  ;;  %v3812_v54 = vmul.f32 4.0, %v3748_v14  ;;  %v4870_v43 = vsel %vm4678_vm1, %v4742_v34, %v4806_v15  ;;  %vm4676_vm3 = vcmp.lt.f32.partialorder %v8679_v61, 0.0  ;;  %v9625_v15 = vld [vmem:[#allocation64_spill] sm:$0xff] }
 0x34b   :  { %5130 = vst [vmem:[#allocation8 + $0x178] sm:$0xff] %v5066_v47  ;;  %v4934_v58 = vmul.f32 2.0, %v4870_v43  ;;  %v3746_v37 = vsel %vm3554_vm2, %v3618_v22, %v3682_v57  ;;  %v4740_v2 = vceil.f32 %v8679_v61  ;;  %v4804_v42 = vfloor.f32 %v8679_v61 }
 0x34c   :  { %v5064_v50 = vadd.f32 %v8726_v6, %v4993_v55  ;;  %v3876_v9 = vadd.f32 %v3812_v54, %v8138_v63  ;;  %v3810_v40 = vmul.f32 4.0, %v3746_v37  ;;  %vm3557_vm4 = vcmp.lt.f32.partialorder %v9619_v3, 0.0 }
 0x34d   :  { %v4868_v17 = vsel %vm4676_vm3, %v4740_v2, %v4804_v42  ;;  %v3621_v25 = vceil.f32 %v9619_v3  ;;  %v3685_v35 = vfloor.f32 %v9619_v3  ;;  %vm4679_vm5 = vcmp.lt.f32.partialorder %v9620_v5, 0.0 }
 0x34e   :  { %5128 = vst [vmem:[#allocation8 + $0x168] sm:$0xff] %v5064_v50  ;;  %v4998_v1 = vadd.f32 %v4934_v58, %v3876_v9  ;;  %v3874_v19 = vadd.f32 %v3810_v40, %v9621_v8  ;;  %v4932_v20 = vmul.f32 2.0, %v4868_v17  ;;  %v4743_v61 = vceil.f32 %v9620_v5  ;;  %v9626_v40 = vld [vmem:[#allocation69_spill] sm:$0xff]  ;;  %v9628_v8 = vld [vmem:[#allocation70_spill] sm:$0xff] }
 0x34f   :  { %v3749_v4 = vsel %vm3557_vm4, %v3621_v25, %v3685_v35  ;;  %v4807_v63 = vfloor.f32 %v9620_v5  ;;  %vm3555_vm6 = vcmp.lt.f32.partialorder %v9622_v27, 0.0  ;;  %v3619_v28 = vceil.f32 %v9622_v27  ;;  %v9627_v5 = vld [vmem:[#allocation15_spill] sm:$0xff] }
 0x350   :  { %v5069_v21 = vadd.f32 %v8726_v6, %v4998_v1  ;;  %v4996_v33 = vadd.f32 %v4932_v20, %v3874_v19  ;;  %v3813_v41 = vmul.f32 4.0, %v3749_v4  ;;  %v3683_v29 = vfloor.f32 %v9622_v27 }
 0x351   :  { %v4871_v53 = vsel %vm4679_vm5, %v4743_v61, %v4807_v63  ;;  %vm4677_vm7 = vcmp.lt.f32.partialorder %v9623_v16, 0.0  ;;  %v4741_v7 = vceil.f32 %v9623_v16  ;;  %v4805_v12 = vfloor.f32 %v9623_v16  ;;  %v9629_v16 = vld [vmem:[#allocation71_spill] sm:$0xff] }
 0x352   :  { %5133 = vst [vmem:[#allocation8 + $0x190] sm:$0xff] %v5069_v21  ;;  %v5067_v45 = vadd.f32 %v8726_v6, %v4996_v33  ;;  %v3877_v52 = vadd.f32 %v3813_v41, %v9624_v0  ;;  %v4935_v60 = vmul.f32 2.0, %v4871_v53  ;;  %v3747_v32 = vsel %vm3555_vm6, %v3619_v28, %v3683_v29 }
 0x353   :  { %v3811_v18 = vmul.f32 4.0, %v3747_v32  ;;  %v4869_v13 = vsel %vm4677_vm7, %v4741_v7, %v4805_v12  ;;  %vm3560_vm8 = vcmp.lt.f32.partialorder %v8711_v26, 0.0  ;;  %v3624_v46 = vceil.f32 %v8711_v26 }
 0x354   :  { %5131 = vst [vmem:[#allocation8 + $0x180] sm:$0xff] %v5067_v45  ;;  %v4999_v24 = vadd.f32 %v4935_v60, %v3877_v52  ;;  %v4933_v38 = vmul.f32 2.0, %v4869_v13  ;;  %v3688_v34 = vfloor.f32 %v8711_v26  ;;  %vm4682_vm9 = vcmp.lt.f32.partialorder %v8713_v56, 0.0  ;;  %v9630_v13 = vld [vmem:[#allocation16_spill] sm:$0xff] }
 0x355   :  { %v3875_v47 = vadd.f32 %v3811_v18, %v9625_v15  ;;  %v4746_v14 = vceil.f32 %v8713_v56  ;;  %v4810_v22 = vfloor.f32 %v8713_v56  ;;  %vm3558_vm10 = vcmp.lt.f32.partialorder %v8719_v59, 0.0 }
 0x356   :  { %v5070_v57 = vadd.f32 %v8726_v6, %v4999_v24  ;;  %v3752_v55 = vsel %vm3560_vm8, %v3624_v46, %v3688_v34  ;;  %v3622_v54 = vceil.f32 %v8719_v59  ;;  %v3686_v43 = vfloor.f32 %v8719_v59  ;;  %v9632_v34 = vld [vmem:[#allocation17_spill] sm:$0xff] }
 0x357   :  { %v4997_v58 = vadd.f32 %v4933_v38, %v3875_v47  ;;  %v3816_v37 = vmul.f32 4.0, %v3752_v55  ;;  %v4874_v26 = vsel %vm4682_vm9, %v4746_v14, %v4810_v22  ;;  %vm4680_vm11 = vcmp.lt.f32.partialorder %v8721_v48, 0.0 }
 0x358   :  { %5134 = vst [vmem:[#allocation8 + $0x198] sm:$0xff] %v5070_v57  ;;  %v4938_v2 = vmul.f32 2.0, %v4874_v26  ;;  %v3750_v42 = vsel %vm3558_vm10, %v3622_v54, %v3686_v43  ;;  %v4744_v50 = vceil.f32 %v8721_v48  ;;  %v4808_v56 = vfloor.f32 %v8721_v48  ;;  %v9633_v54 = vld [vmem:[#allocation18_spill] sm:$0xff] }
 0x359   :  { %v5068_v9 = vadd.f32 %v8726_v6, %v4997_v58  ;;  %v3880_v3 = vadd.f32 %v3816_v37, %v9626_v40  ;;  %v3814_v17 = vmul.f32 4.0, %v3750_v42  ;;  %vm3561_vm12 = vcmp.lt.f32.partialorder %v8733_v62, 0.0  ;;  %v9634_v42 = vld [vmem:[#allocation75_spill] sm:$0xff] }
 0x35a   :  { %v4872_v59 = vsel %vm4680_vm11, %v4744_v50, %v4808_v56  ;;  %v3625_v25 = vceil.f32 %v8733_v62  ;;  %v3689_v35 = vfloor.f32 %v8733_v62  ;;  %vm4683_vm13 = vcmp.lt.f32.partialorder %v9627_v5, 0.0 }
 0x35b   :  { %5132 = vst [vmem:[#allocation8 + $0x188] sm:$0xff] %v5068_v9  ;;  %v5002_v1 = vadd.f32 %v4938_v2, %v3880_v3  ;;  %v3878_v19 = vadd.f32 %v3814_v17, %v9628_v8  ;;  %v4936_v20 = vmul.f32 2.0, %v4872_v59  ;;  %v4747_v48 = vceil.f32 %v9627_v5  ;;  %v9635_v17 = vld [vmem:[#allocation19_spill] sm:$0xff] }
 0x35c   :  { %v3753_v61 = vsel %vm3561_vm12, %v3625_v25, %v3689_v35  ;;  %v4811_v4 = vfloor.f32 %v9627_v5  ;;  %vm3559_vm14 = vcmp.lt.f32.partialorder %v8740_v44, 0.0  ;;  %v3623_v63 = vceil.f32 %v8740_v44  ;;  %v9636_v25 = vld [vmem:[#allocation78_spill] sm:$0xff] }
 0x35d   :  { %v5073_v27 = vadd.f32 %v8726_v6, %v5002_v1  ;;  %v5000_v28 = vadd.f32 %v4936_v20, %v3878_v19  ;;  %v3817_v62 = vmul.f32 4.0, %v3753_v61  ;;  %v3687_v21 = vfloor.f32 %v8740_v44 }
 0x35e   :  { %v4875_v33 = vsel %vm4683_vm13, %v4747_v48, %v4811_v4  ;;  %vm4681_vm15 = vcmp.lt.f32.partialorder %v8742_v51, 0.0  ;;  %v4745_v41 = vceil.f32 %v8742_v51  ;;  %v4809_v29 = vfloor.f32 %v8742_v51  ;;  %v9631_v51 = vld [vmem:[#allocation74_spill] sm:$0xff] }
 0x35f   :  { %5137 = vst [vmem:[#allocation8 + $0x1b0] sm:$0xff] %v5073_v27  ;;  %v5071_v53 = vadd.f32 %v8726_v6, %v5000_v28  ;;  %v3881_v7 = vadd.f32 %v3817_v62, %v9629_v16  ;;  %v4939_v12 = vmul.f32 2.0, %v4875_v33  ;;  %v3751_v45 = vsel %vm3559_vm14, %v3623_v63, %v3687_v21  ;;  %v9637_v21 = vld [vmem:[#allocation79_spill] sm:$0xff] }
 0x360   :  { %v3815_v0 = vmul.f32 4.0, %v3751_v45  ;;  %v4873_v52 = vsel %vm4681_vm15, %v4745_v41, %v4809_v29  ;;  %vm3564_vm0 = vcmp.lt.f32.partialorder %v8759_v36, 0.0  ;;  %v3628_v44 = vceil.f32 %v8759_v36 }
 0x361   :  { %5135 = vst [vmem:[#allocation8 + $0x1a0] sm:$0xff] %v5071_v53  ;;  %v5003_v60 = vadd.f32 %v4939_v12, %v3881_v7  ;;  %v4937_v32 = vmul.f32 2.0, %v4873_v52  ;;  %v3692_v18 = vfloor.f32 %v8759_v36  ;;  %vm4686_vm1 = vcmp.lt.f32.partialorder %v9630_v13, 0.0 }
 0x362   :  { %v3879_v46 = vadd.f32 %v3815_v0, %v9631_v51  ;;  %v4750_v24 = vceil.f32 %v9630_v13  ;;  %v4814_v38 = vfloor.f32 %v9630_v13  ;;  %vm3562_vm2 = vcmp.lt.f32.partialorder %v9632_v34, 0.0 }
 0x363   :  { %v5074_v15 = vadd.f32 %v8726_v6, %v5003_v60  ;;  %v3756_v47 = vsel %vm3564_vm0, %v3628_v44, %v3692_v18  ;;  %v3626_v14 = vceil.f32 %v9632_v34  ;;  %v3690_v22 = vfloor.f32 %v9632_v34 }
 0x364   :  { %v5001_v57 = vadd.f32 %v4937_v32, %v3879_v46  ;;  %v3820_v55 = vmul.f32 4.0, %v3756_v47  ;;  %v4878_v36 = vsel %vm4686_vm1, %v4750_v24, %v4814_v38  ;;  %vm4684_vm3 = vcmp.lt.f32.partialorder %v9633_v54, 0.0  ;;  %v9639_v47 = vld [vmem:[#allocation83_spill] sm:$0xff] }
 0x365   :  { %5138 = vst [vmem:[#allocation8 + $0x1b8] sm:$0xff] %v5074_v15  ;;  %v4942_v43 = vmul.f32 2.0, %v4878_v36  ;;  %v3754_v58 = vsel %vm3562_vm2, %v3626_v14, %v3690_v22  ;;  %v4748_v37 = vceil.f32 %v9633_v54  ;;  %v4812_v26 = vfloor.f32 %v9633_v54  ;;  %v9641_v54 = vld [vmem:[#allocation21_spill] sm:$0xff] }
 0x366   :  { %v5072_v2 = vadd.f32 %v8726_v6, %v5001_v57  ;;  %v3884_v50 = vadd.f32 %v3820_v55, %v9634_v42  ;;  %v3818_v56 = vmul.f32 4.0, %v3754_v58  ;;  %vm3565_vm4 = vcmp.lt.f32.partialorder %v8774_v31, 0.0  ;;  %v9640_v57 = vld [vmem:[#allocation20_spill] sm:$0xff]  ;;  %v9642_v58 = vld [vmem:[#allocation86_spill] sm:$0xff] }
 0x367   :  { %v4876_v9 = vsel %vm4684_vm3, %v4748_v37, %v4812_v26  ;;  %v3629_v40 = vceil.f32 %v8774_v31  ;;  %v3693_v3 = vfloor.f32 %v8774_v31  ;;  %vm4687_vm5 = vcmp.lt.f32.partialorder %v9635_v17, 0.0 }
 0x368   :  { %5136 = vst [vmem:[#allocation8 + $0x1a8] sm:$0xff] %v5072_v2  ;;  %v5006_v59 = vadd.f32 %v4942_v43, %v3884_v50  ;;  %v3882_v35 = vadd.f32 %v3818_v56, %v9636_v25  ;;  %v4940_v5 = vmul.f32 2.0, %v4876_v9  ;;  %v4751_v1 = vceil.f32 %v9635_v17  ;;  %v9643_v50 = vld [vmem:[#allocation22_spill] sm:$0xff]  ;;  %v9644_v25 = vld [vmem:[#allocation23_spill] sm:$0xff] }
 0x369   :  { %v3757_v8 = vsel %vm3565_vm4, %v3629_v40, %v3693_v3  ;;  %v4815_v19 = vfloor.f32 %v9635_v17  ;;  %vm3563_vm6 = vcmp.lt.f32.partialorder %v8782_v39, 0.0  ;;  %v3627_v20 = vceil.f32 %v8782_v39 }
 0x36a   :  { %v5077_v48 = vadd.f32 %v8726_v6, %v5006_v59  ;;  %v5004_v61 = vadd.f32 %v4940_v5, %v3882_v35  ;;  %v3821_v31 = vmul.f32 4.0, %v3757_v8  ;;  %v3691_v4 = vfloor.f32 %v8782_v39  ;;  %v9645_v8 = vld [vmem:[#allocation87_spill] sm:$0xff] }
 0x36b   :  { %v4879_v63 = vsel %vm4687_vm5, %v4751_v1, %v4815_v19  ;;  %vm4685_vm7 = vcmp.lt.f32.partialorder %v8784_v11, 0.0  ;;  %v4749_v27 = vceil.f32 %v8784_v11  ;;  %v4813_v28 = vfloor.f32 %v8784_v11  ;;  %v9638_v11 = vld [vmem:[#allocation82_spill] sm:$0xff] }
 0x36c   :  { %5141 = vst [vmem:[#allocation8 + $0x1d0] sm:$0xff] %v5077_v48  ;;  %v5075_v62 = vadd.f32 %v8726_v6, %v5004_v61  ;;  %v3885_v33 = vadd.f32 %v3821_v31, %v9637_v21  ;;  %v4943_v41 = vmul.f32 2.0, %v4879_v63  ;;  %v3755_v29 = vsel %vm3563_vm6, %v3627_v20, %v3691_v4  ;;  %v9646_v63 = vld [vmem:[#allocation12_spill] sm:$0xff] }
 0x36d   :  { %v3819_v53 = vmul.f32 4.0, %v3755_v29  ;;  %v4877_v16 = vsel %vm4685_vm7, %v4749_v27, %v4813_v28  ;;  %vm3568_vm8 = vcmp.lt.f32.partialorder %v8798_v23, 0.0  ;;  %v3632_v39 = vceil.f32 %v8798_v23 }
 0x36e   :  { %5139 = vst [vmem:[#allocation8 + $0x1c0] sm:$0xff] %v5075_v62  ;;  %v5007_v7 = vadd.f32 %v4943_v41, %v3885_v33  ;;  %v4941_v12 = vmul.f32 2.0, %v4877_v16  ;;  %v3696_v45 = vfloor.f32 %v8798_v23  ;;  %vm4690_vm9 = vcmp.lt.f32.partialorder %v8800_v30, 0.0 }
 0x36f   :  { %v3883_v0 = vadd.f32 %v3819_v53, %v9638_v11  ;;  %v4754_v52 = vceil.f32 %v8800_v30  ;;  %v4818_v44 = vfloor.f32 %v8800_v30  ;;  %vm3566_vm10 = vcmp.lt.f32.partialorder %v8804_v49, 0.0 }
 0x370   :  { %v5078_v60 = vadd.f32 %v8726_v6, %v5007_v7  ;;  %v3760_v32 = vsel %vm3568_vm8, %v3632_v39, %v3696_v45  ;;  %v3630_v18 = vceil.f32 %v8804_v49  ;;  %v3694_v13 = vfloor.f32 %v8804_v49 }
 0x371   :  { %v5005_v51 = vadd.f32 %v4941_v12, %v3883_v0  ;;  %v3824_v46 = vmul.f32 4.0, %v3760_v32  ;;  %v4882_v23 = vsel %vm4690_vm9, %v4754_v52, %v4818_v44  ;;  %vm4688_vm11 = vcmp.lt.f32.partialorder %v8806_v10, 0.0 }
 0x372   :  { %5142 = vst [vmem:[#allocation8 + $0x1d8] sm:$0xff] %v5078_v60  ;;  %v4946_v24 = vmul.f32 2.0, %v4882_v23  ;;  %v3758_v38 = vsel %vm3566_vm10, %v3630_v18, %v3694_v13  ;;  %v4752_v34 = vceil.f32 %v8806_v10  ;;  %v4816_v30 = vfloor.f32 %v8806_v10 }
 0x373   :  { %v5076_v15 = vadd.f32 %v8726_v6, %v5005_v51  ;;  %v3888_v14 = vadd.f32 %v3824_v46, %v9639_v47  ;;  %v3822_v22 = vmul.f32 4.0, %v3758_v38  ;;  %vm3569_vm12 = vcmp.lt.f32.partialorder %v9640_v57, 0.0 }
 0x374   :  { %v4880_v49 = vsel %vm4688_vm11, %v4752_v34, %v4816_v30  ;;  %v3633_v55 = vceil.f32 %v9640_v57  ;;  %v3697_v36 = vfloor.f32 %v9640_v57  ;;  %vm4691_vm13 = vcmp.lt.f32.partialorder %v9641_v54, 0.0 }
 0x375   :  { %5140 = vst [vmem:[#allocation8 + $0x1c8] sm:$0xff] %v5076_v15  ;;  %v5010_v43 = vadd.f32 %v4946_v24, %v3888_v14  ;;  %v3886_v37 = vadd.f32 %v3822_v22, %v9642_v58  ;;  %v4944_v26 = vmul.f32 2.0, %v4880_v49  ;;  %v4755_v10 = vceil.f32 %v9641_v54 }
 0x376   :  { %v3761_v2 = vsel %vm3569_vm12, %v3633_v55, %v3697_v36  ;;  %v4819_v42 = vfloor.f32 %v9641_v54  ;;  %vm3567_vm14 = vcmp.lt.f32.partialorder %v9643_v50, 0.0  ;;  %v3631_v56 = vceil.f32 %v9643_v50 }
 0x377   :  { %v5081_v9 = vadd.f32 %v8726_v6, %v5010_v43  ;;  %v5008_v40 = vadd.f32 %v4944_v26, %v3886_v37  ;;  %v3825_v3 = vmul.f32 4.0, %v3761_v2  ;;  %v3695_v17 = vfloor.f32 %v9643_v50 }
 0x378   :  { %v4883_v59 = vsel %vm4691_vm13, %v4755_v10, %v4819_v42  ;;  %vm4689_vm15 = vcmp.lt.f32.partialorder %v9644_v25, 0.0  ;;  %v4753_v35 = vceil.f32 %v9644_v25  ;;  %v4817_v5 = vfloor.f32 %v9644_v25 }
 0x379   :  { %5145 = vst [vmem:[#allocation8 + $0x1f0] sm:$0xff] %v5081_v9  ;;  %v5079_v1 = vadd.f32 %v8726_v6, %v5008_v40  ;;  %v3889_v19 = vadd.f32 %v3825_v3, %v9645_v8  ;;  %v4947_v20 = vmul.f32 2.0, %v4883_v59  ;;  %v3759_v48 = vsel %vm3567_vm14, %v3631_v56, %v3695_v17 }
 0x37a   :  { %v3823_v61 = vmul.f32 4.0, %v3759_v48  ;;  %v4881_v31 = vsel %vm4689_vm15, %v4753_v35, %v4817_v5 }
 0x37b   :  { %5143 = vst [vmem:[#allocation8 + $0x1e0] sm:$0xff] %v5079_v1  ;;  %v5011_v4 = vadd.f32 %v4947_v20, %v3889_v19  ;;  %v4945_v28 = vmul.f32 2.0, %v4881_v31 }
 0x37c   :  { %v3887_v27 = vadd.f32 %v3823_v61, %v9646_v63 }
 0x37d   :  { %v5082_v62 = vadd.f32 %v8726_v6, %v5011_v4 }
 0x37e   :  { %v5009_v21 = vadd.f32 %v4945_v28, %v3887_v27 }
 0x37f   :  { %5146 = vst [vmem:[#allocation8 + $0x1f8] sm:$0xff] %v5082_v62 }
 0x380   :  { %v5080_v33 = vadd.f32 %v8726_v6, %v5009_v21 }
 0x382   :  { %5144 = vst [vmem:[#allocation8 + $0x1e8] sm:$0xff] %v5080_v33 }
 0x383   :  { %6516 = shalt.err (!%p6513_p0)
}
 0x384   :  { %s6517_s8 = scalar_lea.hbm %s9052_s4, 8192 }
 0x385   :  { %p6518_p1 = scmp.ne.s32.totalorder %s9052_s4, %s6517_s8  ;;  %p6521_p2 = scmp.lt.u32.totalorder %s6517_s8, %s9052_s4 }
 0x387   :  { %p6523_p3 = pnand %p6521_p2, %p6518_p1 }
 0x389   :  { %6526 = shalt.err (!%p6523_p3)
}
 0x38a   :  { %5158 = dma.vmem_to_hbm [thread:$0]  %s5153_s30, 8192, %s9052_s4, [#allocation4], %s6537_s1, %s6537_s1, %s6538_s13  }
 0x38b   :  { %6531 = dma.done.wait [#allocation4], 8192  }
 0x38c   :  { %6532 = vsyncadd [#allocation4], 4294959104 }
 0x38d   :  { %5162 = vsyncpa [#allocation3], 1 }
 0x38e   :  { %5163 = vsyncpa [#allocation6], 1 }
 0x38f   :  { %5164 = vsyncpa [#allocation4], 1 }

</bundles_post_ra>
